<compile_context>
chip_gen: v7x
topology: tpu7x:2x2x1
jax: 0.10.0
libtpu: 0.0.40
codegen_flags: <defaults>
</compile_context>

<pallas_src>
import functools
from collections import OrderedDict

import numpy as np
import jax
import jax.numpy as jnp
from jax import lax
from jax.experimental import pallas as pl
from jax.experimental.pallas import tpu as pltpu


def _round_up(x, m):
    return ((x + m - 1) // m) * m


def _make_geometry(S):
    """Static geometry for two (3x3, stride 2, pad 1) stages on an SxS input."""
    assert S % 4 == 0, "input spatial size must be divisible by 4"
    Hp = S + 2                                       # padded side for stage 1
    S1 = S // 2                                      # conv1 output side
    S2 = S // 4                                      # conv2 output side
    # dense stage-1 anchors computed (covers the conv1 extraction rows AND every
    # dilation-2 tap row read by conv2)
    P1 = _round_up(max(Hp * Hp - 2 * Hp - 2, 2 * Hp * S1), 8)
    R_in = _round_up(P1 + 2 * Hp + 2, 8)             # flattened (tail-padded) input rows
    L = _round_up(2 * Hp + 2, 8)                     # lead zero rows in the stage-1 buffer
    q_max = (4 * (S2 - 1) - 2) * Hp + (4 * (S2 - 1) - 2)
    P2 = _round_up(L + q_max + 1, 8)                 # dense stage-2 anchors computed
    R1 = _round_up(max(L + P1, P2 + 4 * Hp + 4), 8)  # stage-1 dense VMEM buffer rows
    return dict(Hp=Hp, P1=P1, R_in=R_in, L=L, S1=S1, S2=S2, P2=P2, R1=R1)


# ----------------------------------------------------------------------------
# Fused Pallas kernel: conv1(3x3,s2,p1)+ReLU -> conv2(3x3,s2,p1)+ReLU
# One grid step per batch element.
# ----------------------------------------------------------------------------
def _backbone_kernel(slab1_ref, w1_ref, b1_ref, w2_ref, b2_ref,
                     o1_ref, o2_ref, buf1, *, geo):
    Hp, P1, L, P2, R1 = geo["Hp"], geo["P1"], geo["L"], geo["P2"], geo["R1"]
    C1 = w1_ref.shape[1]

    # Rows outside [L, L+P1) of the dense stage-1 buffer act as conv2's zero padding.
    # Zero only those rows; [L, L+P1) is fully overwritten below each step.
    buf1[0:L, :] = jnp.zeros((L, C1), jnp.float32)
    if R1 > L + P1:
        buf1[L + P1:R1, :] = jnp.zeros((R1 - L - P1, C1), jnp.float32)

    # ---- stage 1: single matmul over the pre-built im2col slab (K = 9*Cin) ----
    acc1 = jnp.dot(slab1_ref[0, :, :], w1_ref[...],
                   preferred_element_type=jnp.float32)
    acc1 = jnp.maximum(acc1 + b1_ref[...], 0.0)
    # zero the row-wrap ("bleed") anchors so they behave like conv2's zero padding
    xpos = lax.broadcasted_iota(jnp.int32, acc1.shape, 0) % Hp
    acc1 = jnp.where(xpos <= Hp - 3, acc1, 0.0)
    o1_ref[0, :, :] = acc1
    buf1[L:L + P1, :] = acc1

    # ---- stage 2: lane-concat the 9 dilation-2 taps -> single matmul (K = 9*C1) ----
    taps = [buf1[2 * kh * Hp + 2 * kw: 2 * kh * Hp + 2 * kw + P2, :]
            for kh in range(3) for kw in range(3)]
    slab2 = jnp.concatenate(taps, axis=-1)            # (P2, 9*C1)
    acc2 = jnp.dot(slab2, w2_ref[...], preferred_element_type=jnp.float32)
    o2_ref[0, :, :] = jnp.maximum(acc2 + b2_ref[...], 0.0)


@jax.jit
def _backbone_forward(x_nchw, w1t, b1, w2t, b2):
    N, Cin, H, W = x_nchw.shape
    assert H == W
    geo = _make_geometry(H)
    Hp, P1, R_in, L = geo["Hp"], geo["P1"], geo["R_in"], geo["L"]
    S1, S2, P2, R1 = geo["S1"], geo["S2"], geo["P2"], geo["R1"]
    C1 = w1t.shape[1]
    C2 = w2t.shape[1]

    # NCHW -> NHWC, pad spatially by 1, flatten (y, x) rows, zero-pad tail rows.
    x_nhwc = jnp.transpose(x_nchw, (0, 2, 3, 1))
    x_pad = jnp.pad(x_nhwc, ((0, 0), (1, 1), (1, 1), (0, 0)))
    xf = x_pad.reshape(N, Hp * Hp, Cin)
    xf = jnp.pad(xf, ((0, 0), (0, R_in - Hp * Hp), (0, 0)))

    # conv1 im2col slab: 9 unit-stride shifted slices, lane-concatenated so the
    # kernel runs ONE matmul with K = 9*Cin.
    slab1 = jnp.concatenate(
        [xf[:, kh * Hp + kw: kh * Hp + kw + P1, :]
         for kh in range(3) for kw in range(3)], axis=-1)        # (N, P1, 9*Cin)

    flops = 2 * N * (P1 * 9 * Cin * C1 + P2 * 9 * C1 * C2)
    bytes_accessed = 4 * (N * P1 * 9 * Cin + 9 * Cin * C1 + C1
                          + 9 * C1 * C2 + C2 + N * P1 * C1 + N * P2 * C2)

    kernel = functools.partial(_backbone_kernel, geo=geo)
    o1d, o2d = pl.pallas_call(
        kernel,
        out_shape=(jax.ShapeDtypeStruct((N, P1, C1), jnp.float32),
                   jax.ShapeDtypeStruct((N, P2, C2), jnp.float32)),
        grid_spec=pltpu.PrefetchScalarGridSpec(
            num_scalar_prefetch=0,
            grid=(N,),                               # one step per image; auto-pipelined
            in_specs=[
                pl.BlockSpec((1, P1, 9 * Cin), lambda n: (n, 0, 0)),
                pl.BlockSpec((9 * Cin, C1), lambda n: (0, 0)),
                pl.BlockSpec((1, C1), lambda n: (0, 0)),
                pl.BlockSpec((9 * C1, C2), lambda n: (0, 0)),
                pl.BlockSpec((1, C2), lambda n: (0, 0)),
            ],
            out_specs=[
                pl.BlockSpec((1, P1, C1), lambda n: (n, 0, 0)),
                pl.BlockSpec((1, P2, C2), lambda n: (n, 0, 0)),
            ],
            scratch_shapes=[pltpu.VMEM((R1, C1), jnp.float32)]),
        compiler_params=pltpu.CompilerParams(
            dimension_semantics=("parallel",)),
        cost_estimate=pl.CostEstimate(flops=flops, transcendentals=0,
                                      bytes_accessed=bytes_accessed),
    )(slab1, w1t, b1, w2t, b2)

    # conv1: valid outputs sit at dense rows 2*Hp*i1 + 2*j1  -> static strided slices.
    o1g = o1d[:, :2 * Hp * S1, :].reshape(N, S1, 2 * Hp, C1)
    conv1 = jnp.transpose(o1g[:, :, 0:2 * S1:2, :], (0, 3, 1, 2))

    # conv2: valid outputs sit at rows base + 4*Hp*i2 + 4*j2 -> static strided slices
    # (no gather).
    base = L - 2 * Hp - 2
    need = base + 4 * Hp * S2
    if need > P2:
        o2d = jnp.pad(o2d, ((0, 0), (0, need - P2), (0, 0)))
    o2g = o2d[:, base:need, :].reshape(N, S2, 4 * Hp, C2)
    conv2 = jnp.transpose(o2g[:, :, 0:4 * S2:4, :], (0, 3, 1, 2))
    return conv1, conv2


# ----------------------------------------------------------------------------
# BackboneCNN analogue: conv1 -> conv2, returning a dict of stage outputs (NCHW)
# ----------------------------------------------------------------------------
class BackboneCNNPallas:
    num_blocks = 2
    # 'stride' is the cumulative feature stride of each stage (infer_stride semantics);
    # each conv itself has spatial stride 2.
    blocks = {
        'conv1': {'channel': 8, 'stride': 2},
        'conv2': {'channel': 16, 'stride': 4},
    }

    def __init__(self, in_channels=4):
        key = jax.random.PRNGKey(0)
        cin = in_channels
        packed = []
        for i in range(1, self.num_blocks + 1):
            name = 'conv{}'.format(i)
            cout = self.blocks[name]['channel']
            key, kw_, kb_ = jax.random.split(key, 3)
            fan_in, fan_out = cin * 9, cout * 9
            limit = (6.0 / (fan_in + fan_out)) ** 0.5
            w = jax.random.uniform(kw_, (cout, cin, 3, 3), jnp.float32, -limit, limit)
            b = jax.random.uniform(kb_, (cout,), jnp.float32, -0.1, 0.1)
            setattr(self, name + "_w", w)   # PyTorch-layout params (for the reference)
            setattr(self, name + "_b", b)
            # pre-pack ONCE: OIHW -> (9*Cin, Cout) matching the im2col lane order
            # (tap = kh*3+kw major, input channel minor); bias -> (1, Cout).
            w_mat = jnp.transpose(w, (2, 3, 1, 0)).reshape(9 * cin, cout)
            packed.append((w_mat, b.reshape(1, cout)))
            cin = cout
        (self.w1t, self.b1), (self.w2t, self.b2) = packed

    @classmethod
    def infer_channels(cls, name):
        if isinstance(name, (tuple, list)):
            return [cls.infer_channels(n) for n in name]
        return cls.blocks[name]['channel']

    @classmethod
    def infer_stride(cls, name):
        if isinstance(name, (tuple, list)):
            return [cls.infer_stride(n) for n in name]
        return cls.blocks[name]['stride']

    def __call__(self, x):
        conv1, conv2 = _backbone_forward(x, self.w1t, self.b1, self.w2t, self.b2)
        return OrderedDict([('conv1', conv1), ('conv2', conv2)])


# ----------------------------------------------------------------------------
# Plain-JAX reference for the correctness sanity-check
# ----------------------------------------------------------------------------
def _ref_conv_block(x, w, b, stride, padding):
    y = lax.conv_general_dilated(
        x, w, window_strides=(stride, stride),
        padding=((padding, padding), (padding, padding)),
        dimension_numbers=('NCHW', 'OIHW', 'NCHW'))
    return jnp.maximum(y + b.reshape(1, -1, 1, 1), 0.0)


if __name__ == "__main__":
    key = jax.random.PRNGKey(0)
    x = jax.random.normal(key, (2, 4, 16, 16), jnp.float32)   # NCHW, like PyTorch

    model = BackboneCNNPallas(in_channels=4)
    feats = model(x)
    jax.block_until_ready(feats['conv2'])

    ref = x
    for i in range(1, model.num_blocks + 1):
        name = 'conv{}'.format(i)
        w = getattr(model, name + "_w")
        b = getattr(model, name + "_b")
        ref = _ref_conv_block(ref, w, b, stride=2, padding=1)
        got = feats[name]
        assert got.shape == ref.shape, (name, got.shape, ref.shape)
        err = float(jnp.max(jnp.abs(got - ref)))
        assert err < 1e-4, (name, err)

    assert feats['conv1'].shape == (2, 8, 8, 8)
    assert feats['conv2'].shape == (2, 16, 4, 4)
    print("KERNEL_OK")
</pallas_src>

<mosaic_0001>
module attributes {stable_mosaic.version = 11 : i64} {
  func.func @_backbone_kernel(%arg0: i32, %arg1: memref<1x288x36xf32, #tpu.memory_space<vmem>>, %arg2: memref<36x8xf32, #tpu.memory_space<vmem>>, %arg3: memref<1x8xf32, #tpu.memory_space<vmem>>, %arg4: memref<72x16xf32, #tpu.memory_space<vmem>>, %arg5: memref<1x16xf32, #tpu.memory_space<vmem>>, %arg6: memref<1x288x8xf32, #tpu.memory_space<vmem>>, %arg7: memref<1x232x16xf32, #tpu.memory_space<vmem>>, %arg8: memref<328x8xf32, #tpu.memory_space<vmem>>) attributes {dimension_semantics = [#tpu.dimension_semantics<parallel>], iteration_bounds = array<i64: 2>, scalar_prefetch = 0 : i64, scratch_operands = 1 : i64, tpu.core_type = #tpu.core_type<tc>, window_params = [{transform_indices = @transform_0, window_bounds = array<i64: 1, 288, 36>}, {pipeline_mode = #tpu.pipeline_mode<synchronous>, transform_indices = @transform_1, window_bounds = array<i64: 36, 8>}, {pipeline_mode = #tpu.pipeline_mode<synchronous>, transform_indices = @transform_2, window_bounds = array<i64: 1, 8>}, {pipeline_mode = #tpu.pipeline_mode<synchronous>, transform_indices = @transform_3, window_bounds = array<i64: 72, 16>}, {pipeline_mode = #tpu.pipeline_mode<synchronous>, transform_indices = @transform_4, window_bounds = array<i64: 1, 16>}, {transform_indices = @transform_5, window_bounds = array<i64: 1, 288, 8>}, {transform_indices = @transform_6, window_bounds = array<i64: 1, 232, 16>}]} {
    %cst = arith.constant 0.000000e+00 : f32
    %0 = vector.broadcast %cst : f32 to vector<40x8xf32>
    %c0 = arith.constant 0 : index
    %c0_0 = arith.constant 0 : index
    %1 = vector.load %arg8[%c0, %c0_0] : memref<328x8xf32, #tpu.memory_space<vmem>>, vector<40x8xf32>
    tpu.vector_store %arg8[%c0, %c0_0], %0 {strides = array<i32>} : memref<328x8xf32, #tpu.memory_space<vmem>>, vector<40x8xf32>,
    %c0_1 = arith.constant 0 : index
    %c0_2 = arith.constant 0 : index
    %c0_3 = arith.constant 0 : index
    %2 = vector.load %arg1[%c0_1, %c0_2, %c0_3] : memref<1x288x36xf32, #tpu.memory_space<vmem>>, vector<1x288x36xf32>
    %3 = vector.shape_cast %2 : vector<1x288x36xf32> to vector<288x36xf32>
    %c0_4 = arith.constant 0 : index
    %c0_5 = arith.constant 0 : index
    %4 = vector.load %arg2[%c0_4, %c0_5] : memref<36x8xf32, #tpu.memory_space<vmem>>, vector<36x8xf32>
    %cst_6 = arith.constant dense<0.000000e+00> : vector<288x8xf32>
    %5 = tpu.matmul %3, %4, %cst_6 {dimension_numbers = #tpu.dot_dimension_numbers<[1], [0], [0], [1], [0, 0, 1, 1], [], []>} : vector<288x36xf32>, vector<36x8xf32>, vector<288x8xf32> -> vector<288x8xf32>
    %c0_7 = arith.constant 0 : index
    %c0_8 = arith.constant 0 : index
    %6 = vector.load %arg3[%c0_7, %c0_8] : memref<1x8xf32, #tpu.memory_space<vmem>>, vector<1x8xf32>
    %7 = vector.broadcast %6 : vector<1x8xf32> to vector<288x8xf32>
    %8 = arith.addf %5, %7 : vector<288x8xf32>
    %cst_9 = arith.constant 0.000000e+00 : f32
    %9 = vector.broadcast %cst_9 : f32 to vector<288x8xf32>
    %10 = arith.maximumf %8, %9 : vector<288x8xf32>
    %11 = tpu.iota {dimensions = array<i32: 0>} : vector<288x8xi32>
    %c18_i32 = arith.constant 18 : i32
    %c0_i32 = arith.constant 0 : i32
    %12 = arith.cmpi eq, %c18_i32, %c0_i32 : i32
    %c1_i32 = arith.constant 1 : i32
    %13 = arith.select %12, %c1_i32, %c18_i32 : i32
    %14 = vector.broadcast %13 : i32 to vector<288x8xi32>
    %15 = arith.remsi %11, %14 : vector<288x8xi32>
    %c0_i32_10 = arith.constant 0 : i32
    %16 = vector.broadcast %c0_i32_10 : i32 to vector<288x8xi32>
    %17 = arith.cmpi ne, %15, %16 : vector<288x8xi32>
    %c0_i32_11 = arith.constant 0 : i32
    %18 = vector.broadcast %c0_i32_11 : i32 to vector<288x8xi32>
    %19 = arith.cmpi slt, %15, %18 : vector<288x8xi32>
    %c0_i32_12 = arith.constant 0 : i32
    %20 = arith.cmpi slt, %13, %c0_i32_12 : i32
    %21 = vector.broadcast %20 : i1 to vector<288x8xi1>
    %22 = vector.broadcast %21 : vector<288x8xi1> to vector<288x8xi1>
    %23 = arith.xori %19, %22 : vector<288x8xi1>
    %24 = arith.andi %23, %17 : vector<288x8xi1>
    %25 = vector.broadcast %13 : i32 to vector<288x8xi32>
    %26 = arith.addi %15, %25 : vector<288x8xi32>
    %27 = arith.select %24, %26, %15 : vector<288x8xi1>, vector<288x8xi32>
    %c15_i32 = arith.constant 15 : i32
    %28 = vector.broadcast %c15_i32 : i32 to vector<288x8xi32>
    %29 = arith.cmpi sle, %27, %28 : vector<288x8xi32>
    %cst_13 = arith.constant 0.000000e+00 : f32
    %30 = vector.broadcast %cst_13 : f32 to vector<288x8xf32>
    %31 = arith.select %29, %10, %30 : vector<288x8xi1>, vector<288x8xf32>
    %c0_14 = arith.constant 0 : index
    %c0_15 = arith.constant 0 : index
    %c0_16 = arith.constant 0 : index
    %32 = vector.load %arg6[%c0_14, %c0_15, %c0_16] : memref<1x288x8xf32, #tpu.memory_space<vmem>>, vector<1x288x8xf32>
    %33 = vector.shape_cast %32 : vector<1x288x8xf32> to vector<288x8xf32>
    %34 = vector.shape_cast %31 : vector<288x8xf32> to vector<1x288x8xf32>
    tpu.vector_store %arg6[%c0_14, %c0_15, %c0_16], %34 {strides = array<i32>} : memref<1x288x8xf32, #tpu.memory_space<vmem>>, vector<1x288x8xf32>,
    %c40 = arith.constant 40 : index
    %c0_17 = arith.constant 0 : index
    %35 = vector.load %arg8[%c40, %c0_17] : memref<328x8xf32, #tpu.memory_space<vmem>>, vector<288x8xf32>
    tpu.vector_store %arg8[%c40, %c0_17], %31 {strides = array<i32>} : memref<328x8xf32, #tpu.memory_space<vmem>>, vector<288x8xf32>,
    %c0_18 = arith.constant 0 : index
    %c0_19 = arith.constant 0 : index
    %36 = vector.load %arg8[%c0_18, %c0_19] : memref<328x8xf32, #tpu.memory_space<vmem>>, vector<232x8xf32>
    %c2 = arith.constant 2 : index
    %c0_20 = arith.constant 0 : index
    %37 = vector.load %arg8[%c2, %c0_20] : memref<328x8xf32, #tpu.memory_space<vmem>>, vector<232x8xf32>
    %c4 = arith.constant 4 : index
    %c0_21 = arith.constant 0 : index
    %38 = vector.load %arg8[%c4, %c0_21] : memref<328x8xf32, #tpu.memory_space<vmem>>, vector<232x8xf32>
    %c36 = arith.constant 36 : index
    %c0_22 = arith.constant 0 : index
    %39 = vector.load %arg8[%c36, %c0_22] : memref<328x8xf32, #tpu.memory_space<vmem>>, vector<232x8xf32>
    %c38 = arith.constant 38 : index
    %c0_23 = arith.constant 0 : index
    %40 = vector.load %arg8[%c38, %c0_23] : memref<328x8xf32, #tpu.memory_space<vmem>>, vector<232x8xf32>
    %c40_24 = arith.constant 40 : index
    %c0_25 = arith.constant 0 : index
    %41 = vector.load %arg8[%c40_24, %c0_25] : memref<328x8xf32, #tpu.memory_space<vmem>>, vector<232x8xf32>
    %c72 = arith.constant 72 : index
    %c0_26 = arith.constant 0 : index
    %42 = vector.load %arg8[%c72, %c0_26] : memref<328x8xf32, #tpu.memory_space<vmem>>, vector<232x8xf32>
    %c74 = arith.constant 74 : index
    %c0_27 = arith.constant 0 : index
    %43 = vector.load %arg8[%c74, %c0_27] : memref<328x8xf32, #tpu.memory_space<vmem>>, vector<232x8xf32>
    %c76 = arith.constant 76 : index
    %c0_28 = arith.constant 0 : index
    %44 = vector.load %arg8[%c76, %c0_28] : memref<328x8xf32, #tpu.memory_space<vmem>>, vector<232x8xf32>
    %45 = tpu.concatenate %36, %37, %38, %39, %40, %41, %42, %43, %44 in 1 : vector<232x8xf32>, vector<232x8xf32>, vector<232x8xf32>, vector<232x8xf32>, vector<232x8xf32>, vector<232x8xf32>, vector<232x8xf32>, vector<232x8xf32>, vector<232x8xf32> -> vector<232x72xf32>
    %c0_29 = arith.constant 0 : index
    %c0_30 = arith.constant 0 : index
    %46 = vector.load %arg4[%c0_29, %c0_30] : memref<72x16xf32, #tpu.memory_space<vmem>>, vector<72x16xf32>
    %cst_31 = arith.constant dense<0.000000e+00> : vector<232x16xf32>
    %47 = tpu.matmul %45, %46, %cst_31 {dimension_numbers = #tpu.dot_dimension_numbers<[1], [0], [0], [1], [0, 0, 1, 1], [], []>} : vector<232x72xf32>, vector<72x16xf32>, vector<232x16xf32> -> vector<232x16xf32>
    %c0_32 = arith.constant 0 : index
    %c0_33 = arith.constant 0 : index
    %48 = vector.load %arg5[%c0_32, %c0_33] : memref<1x16xf32, #tpu.memory_space<vmem>>, vector<1x16xf32>
    %49 = vector.broadcast %48 : vector<1x16xf32> to vector<232x16xf32>
    %50 = arith.addf %47, %49 : vector<232x16xf32>
    %cst_34 = arith.constant 0.000000e+00 : f32
    %51 = vector.broadcast %cst_34 : f32 to vector<232x16xf32>
    %52 = arith.maximumf %50, %51 : vector<232x16xf32>
    %c0_35 = arith.constant 0 : index
    %c0_36 = arith.constant 0 : index
    %c0_37 = arith.constant 0 : index
    %53 = vector.load %arg7[%c0_35, %c0_36, %c0_37] : memref<1x232x16xf32, #tpu.memory_space<vmem>>, vector<1x232x16xf32>
    %54 = vector.shape_cast %53 : vector<1x232x16xf32> to vector<232x16xf32>
    %55 = vector.shape_cast %52 : vector<232x16xf32> to vector<1x232x16xf32>
    tpu.vector_store %arg7[%c0_35, %c0_36, %c0_37], %55 {strides = array<i32>} : memref<1x232x16xf32, #tpu.memory_space<vmem>>, vector<1x232x16xf32>,
    return
  }
  func.func @transform_0(%arg0: i32) -> (i32, i32, i32) {
    %c0_i32 = arith.constant 0 : i32
    %c0_i32_0 = arith.constant 0 : i32
    %c0_i32_1 = arith.constant 0 : i32
    return %arg0, %c0_i32, %c0_i32_0 : i32, i32, i32
  }
  func.func @transform_1(%arg0: i32) -> (i32, i32) {
    %c0_i32 = arith.constant 0 : i32
    %c0_i32_0 = arith.constant 0 : i32
    %c0_i32_1 = arith.constant 0 : i32
    return %c0_i32, %c0_i32_0 : i32, i32
  }
  func.func @transform_2(%arg0: i32) -> (i32, i32) {
    %c0_i32 = arith.constant 0 : i32
    %c0_i32_0 = arith.constant 0 : i32
    %c0_i32_1 = arith.constant 0 : i32
    return %c0_i32, %c0_i32_0 : i32, i32
  }
  func.func @transform_3(%arg0: i32) -> (i32, i32) {
    %c0_i32 = arith.constant 0 : i32
    %c0_i32_0 = arith.constant 0 : i32
    %c0_i32_1 = arith.constant 0 : i32
    return %c0_i32, %c0_i32_0 : i32, i32
  }
  func.func @transform_4(%arg0: i32) -> (i32, i32) {
    %c0_i32 = arith.constant 0 : i32
    %c0_i32_0 = arith.constant 0 : i32
    %c0_i32_1 = arith.constant 0 : i32
    return %c0_i32, %c0_i32_0 : i32, i32
  }
  func.func @transform_5(%arg0: i32) -> (i32, i32, i32) {
    %c0_i32 = arith.constant 0 : i32
    %c0_i32_0 = arith.constant 0 : i32
    %c0_i32_1 = arith.constant 0 : i32
    return %arg0, %c0_i32, %c0_i32_0 : i32, i32, i32
  }
  func.func @transform_6(%arg0: i32) -> (i32, i32, i32) {
    %c0_i32 = arith.constant 0 : i32
    %c0_i32_0 = arith.constant 0 : i32
    %c0_i32_1 = arith.constant 0 : i32
    return %arg0, %c0_i32, %c0_i32_0 : i32, i32, i32
  }
}

</mosaic_0001>

<bundles_post_ra>
// kernel: _backbone_forward.1
= control target key start
LH: loop header
LB: loop body
LE: loop exit
PB: predicated region body
PF: predicated region fallthrough
CT: control target
= control target key end

     0   :  { %s3687_s21 = smov 0   ;;  %s5855_s0 = inlined_call_operand.vmem [shape: f32[2,288,36], index: 0, kind: input, shape index: {}]   ;;  %s5856_s1 = inlined_call_operand.vmem [shape: f32[36,8], index: 1, kind: input, shape index: {}]   ;;  %s5857_s2 = inlined_call_operand.vmem [shape: f32[1,8], index: 2, kind: input, shape index: {}]   ;;  %s5858_s3 = inlined_call_operand.vmem [shape: f32[72,16], index: 3, kind: input, shape index: {}]   ;;  %s5859_s4 = inlined_call_operand.vmem [shape: f32[1,16], index: 4, kind: input, shape index: {}]   ;;  %s5860_s5 = inlined_call_operand.vmem [shape: f32[2,288,8], index: 5, kind: output, shape index: {0}]   ;;  %s5861_s6 = inlined_call_operand.vmem [shape: f32[2,232,16], index: 6, kind: output, shape index: {1}]  }
   0x1 LB: > { %s3146_s22 = sadd.s32 4294967295, %s3639_s21   ;;  %p3150_p0 = scmp.ge.s32.totalorder %s3639_s21, 1  ;;  %s3639_s21 = sphi %s3687_s21, %s17_s21  }
   0x2   : > { %p215_p1 = scmp.lt.s32.totalorder %s3639_s21, 3 }
   0x4   : > { %p216_p2 = pnand %p3150_p0, %p215_p1 }
   0x6   : > { %219 = sbr.rel (%p216_p2) target bundleno = 1030 (0x406), region = 40 }
   0xd   : > { %v307_v0 = vld [vmem:[%s5856_s1] sm:$0xff]  ;;  %v308_v1 = vld [vmem:[%s5856_s1 + $0x8] sm:$0xff]  ;;  %v309_v2 = vld [vmem:[%s5856_s1 + $0x10] sm:$0xff]  ;;  %p250_p3 = scmp.lt.s32.totalorder %s3146_s22, 1  ;;  %vm265_vm0 = vcmask 64512   ;;  %v5862_v6 = vmov 0.0   ;;  %v713_v46 = vlaneseq }
   0xe   : > { %v3472_v3 = vpack.c.bf16 %v308_v1, %v307_v0  ;;  %v310_v4 = vld [vmem:[%s5856_s1 + $0x18] sm:$0xff]  ;;  %268 = vst.msk [vmem:[#allocation2 + $0x10] sm:$0xff] %vm265_vm0, %v5862_v6  ;;  %269 = vst.msk [vmem:[#allocation2 + $0x18] sm:$0xff] %vm265_vm0, %v5862_v6  ;;  %vm319_vm1 = vcmask 293888   ;;  %v311_v7 = vld [vmem:[%s5856_s1 + $0x20] sm:$0xf] }
   0xf   : > { %v3476_v5 = vpack.c.bf16 %v310_v4, %v309_v2  ;;  %s5966_s22 = smov (!%p250_p3, %s3146_s22), 1  ;;  %266 = vst.msk [vmem:[#allocation2] sm:$0xff] %vm265_vm0, %v5862_v6  ;;  %267 = vst.msk [vmem:[#allocation2 + $0x8] sm:$0xff] %vm265_vm0, %v5862_v6  ;;  %vm428_vm2 = vcmask 1043456   ;;  %s3642_s13 = smov 8   ;;  %v3798_v47 = vshrl.u32 %v713_v46, 7 }
  0x10   : > { %270 = vst.msk [vmem:[#allocation2 + $0x20] sm:$0xff] %vm265_vm0, %v5862_v6  ;;  %3473 = vmatprep.subr.bf16.mxu0 %v3472_v3  ;;  %s3502_s7 = smul.u32 288, %s5966_s22  ;;  %s3643_s14 = smov 16  }
  0x11   : > { %3475 = vmatpush3.bf16.msra.mxu0 %v3472_v3  ;;  %5866 = vst [vmem:[#allocation3_spill] sm:$0xff] %v3798_v47  ;;  %v715_v48 = vadd.s32 8, %v3798_v47  ;;  %v716_v49 = vadd.s32 16, %v3798_v47  ;;  %v717_v52 = vadd.s32 24, %v3798_v47  ;;  %v718_v59 = vadd.s32 32, %v3798_v47  ;;  %s3644_s20 = smov 40  }
  0x12   : > { %3477 = vmatprep.subr.bf16.mxu0 %v3476_v5  ;;  %s3728_s12 = scalar_lea.vmem %s5855_s0, %s3502_s7  ;;  %v3807_v53 = vmul.u32.u64.low 3817748708, %v3798_v47  ;;  %v3808_v54 = vmul.u32.u64.high 3817748708, %v3798_v47, %v3807_v53  ;;  %v3820_v62 = vadd.s32 40, %v3798_v47  ;;  %v3826_v1 = vadd.s32 56, %v3798_v47  ;;  %s4131_s19 = scalar_lea.vmem %s5860_s5, %s3502_s7 }
  0x13   : > { %v271_v8 = vld [vmem:[%s3728_s12] sm:$0xff]  ;;  %v272_v9 = vld [vmem:[%s3728_s12 + $0x8] sm:$0xff]  ;;  %v273_v10 = vld [vmem:[%s3728_s12 + $0x10] sm:$0xff]  ;;  %v3802_v50 = vmul.u32.u64.low 3817748708, %v715_v48  ;;  %v3803_v51 = vmul.u32.u64.high 3817748708, %v715_v48, %v3802_v50  ;;  %v3829_v2 = vadd.s32 48, %v3798_v47 }
  0x14   : > { %3313 = vmatprep.mubr.msk.f32.mxu0 %vm319_vm1, %v271_v8  ;;  %v274_v11 = vld [vmem:[%s3728_s12 + $0x18] sm:$0xff]  ;;  %v275_v13 = vld [vmem:[%s3728_s12 + $0x20] sm:$0xff]  ;;  %v276_v17 = vld [vmem:[%s3728_s12 + $0x28] sm:$0xff]  ;;  %v3810_v55 = vmul.u32.u64.low 3817748708, %v716_v49  ;;  %v3811_v56 = vmul.u32.u64.high 3817748708, %v716_v49, %v3810_v55  ;;  %v756_v61 = vshrl.u32 %v3808_v54, 4 }
  0x15   : > { %3479 = vmatpush3.bf16.msra.mxu0 %v3476_v5  ;;  %v1501_v12 = vld [vmem:[#allocation2 + $0x12] sm:$0xff]  ;;  %v279_v22 = vld [vmem:[%s3728_s12 + $0x40] sm:$0xff]  ;;  %v280_v24 = vld [vmem:[%s3728_s12 + $0x48] sm:$0xff]  ;;  %v3813_v57 = vmul.u32.u64.low 3817748708, %v717_v52  ;;  %v3814_v58 = vmul.u32.u64.high 3817748708, %v717_v52, %v3813_v57  ;;  %v767_v60 = vshrl.u32 %v3803_v51, 4 }
  0x16   : > { %3311 = vmatprep.subr.msk.mxu0 %vm428_vm2, %v311_v7  ;;  %1646 = vrot.lane.b32.xlu1 %v1501_v12, %s3642_s13  ;;  %v1499_v14 = vld [vmem:[#allocation2 + $0x2] sm:$0xff]  ;;  %v1500_v16 = vld [vmem:[#allocation2 + $0xa] sm:$0xff]  ;;  %v278_v21 = vld [vmem:[%s3728_s12 + $0x38] sm:$0xff]  ;;  %v3822_v63 = vmul.u32.u64.low 3817748708, %v718_v59  ;;  %v3823_v0 = vmul.u32.u64.high 3817748708, %v718_v59, %v3822_v63  ;;  %v778_v3 = vshrl.u32 %v3811_v56, 4 }
  0x17   : > { %v1502_v15 = vld [vmem:[#allocation2 + $0x1a] sm:$0xff]  ;;  %1642 = vrot.lane.b32.xlu0 %v1499_v14, %s3642_s13  ;;  %v277_v18 = vld [vmem:[%s3728_s12 + $0x30] sm:$0xff]  ;;  %v1528_v19 = vld [vmem:[#allocation2 + $0x4] sm:$0xff]  ;;  %v3833_v4 = vadd.s32 64, %v3798_v47  ;;  %v768_v5 = vmul.u32 18, %v767_v60  ;;  %v3837_v8 = vadd.s32 72, %v3798_v47 }
  0x18   : > { %v1529_v20 = vld [vmem:[#allocation2 + $0xc] sm:$0xff]  ;;  %v1530_v23 = vld [vmem:[#allocation2 + $0x14] sm:$0xff]  ;;  %v283_v27 = vld [vmem:[%s3728_s12 + $0x60] sm:$0xff]  ;;  %v3935_v55 = vadd.s32 96, %v3798_v47  ;;  %s3645_s23 = smov 32   ;;  %s3647_s28 = smov 24  }
  0x19   : > { %3312 = vmatpush3.msk.msra.mxu0 %vm428_vm2, %v311_v7  ;;  %v281_v25 = vld [vmem:[%s3728_s12 + $0x50] sm:$0xff]  ;;  %v282_v26 = vld [vmem:[%s3728_s12 + $0x58] sm:$0xff]  ;;  %v284_v28 = vld [vmem:[%s3728_s12 + $0x68] sm:$0xff]  ;;  %v789_v7 = vshrl.u32 %v3814_v58, 4  ;;  %s3648_s16 = smov 48   ;;  %s3650_s29 = smov 56  }
  0x1a   : > { %3314 = vmatmul.mubr.msk.f32.vlgmr.msra.gmra.mrb[0].mxu0 %vm319_vm1, %v272_v9  ;;  %1648 = vrot.lane.b32.xlu1 %v1502_v15, %s3642_s13  ;;  %v285_v29 = vld [vmem:[%s3728_s12 + $0x70] sm:$0xff]  ;;  %v286_v30 = vld [vmem:[%s3728_s12 + $0x78] sm:$0xff]  ;;  %v287_v31 = vld [vmem:[%s3728_s12 + $0x80] sm:$0xff]  ;;  %s3651_s30 = smov 64  }
  0x1b   : > { %3316 = vmatprep.mubr.msk.f32.mxu0 %vm319_vm1, %v273_v10  ;;  %1644 = vrot.lane.b32.xlu0 %v1500_v16, %s3642_s13  ;;  %v288_v32 = vld [vmem:[%s3728_s12 + $0x88] sm:$0xff]  ;;  %v289_v33 = vld [vmem:[%s3728_s12 + $0x90] sm:$0xff]  ;;  %v290_v34 = vld [vmem:[%s3728_s12 + $0x98] sm:$0xff]  ;;  %v757_v10 = vmul.u32 18, %v756_v61  ;;  %v3850_v15 = vmul.u32.u64.low 3817748708, %v3829_v2  ;;  %v3851_v16 = vmul.u32.u64.high 3817748708, %v3829_v2, %v3850_v15 }
  0x1c   : > { %v291_v35 = vld [vmem:[%s3728_s12 + $0xa0] sm:$0xff]  ;;  %v292_v36 = vld [vmem:[%s3728_s12 + $0xa8] sm:$0xff]  ;;  %v293_v37 = vld [vmem:[%s3728_s12 + $0xb0] sm:$0xff]  ;;  %v4173_v15 = vadd.s32 144, %v3798_v47 }
  0x1d   : > { %v294_v38 = vld [vmem:[%s3728_s12 + $0xb8] sm:$0xff]  ;;  %v295_v40 = vld [vmem:[%s3728_s12 + $0xc0] sm:$0xff]  ;;  %v296_v41 = vld [vmem:[%s3728_s12 + $0xc8] sm:$0xff] }
  0x1e   : > { %3317 = vmatmul.mubr.msk.f32.gmra.mrb[2].mxu0 %vm319_vm1, %v274_v11  ;;  %1758 = vrot.lane.b32.xlu1 %v1528_v19, %s3643_s14  ;;  %v1531_v39 = vld [vmem:[#allocation2 + $0x1c] sm:$0xff]  ;;  %v297_v42 = vld [vmem:[%s3728_s12 + $0xd0] sm:$0xff]  ;;  %v300_v45 = vld [vmem:[%s3728_s12 + $0xe8] sm:$0xff]  ;;  %v3841_v11 = vmul.u32.u64.low 3817748708, %v3820_v62  ;;  %v3842_v12 = vmul.u32.u64.high 3817748708, %v3820_v62, %v3841_v11 }
  0x1f   : > { %3319 = vmatprep.mubr.msk.f32.mxu0 %vm319_vm1, %v275_v13  ;;  %1760 = vrot.lane.b32.xlu0 %v1529_v20, %s3643_s14  ;;  %v298_v43 = vld [vmem:[%s3728_s12 + $0xd8] sm:$0xff]  ;;  %v299_v44 = vld [vmem:[%s3728_s12 + $0xe0] sm:$0xff]  ;;  %v301_v9 = vld [vmem:[%s3728_s12 + $0xf0] sm:$0xff]  ;;  %v3846_v13 = vmul.u32.u64.low 3817748708, %v3826_v1  ;;  %v3847_v14 = vmul.u32.u64.high 3817748708, %v3826_v1, %v3846_v13  ;;  %v3857_v20 = vsub.s32 %v715_v48, %v768_v5 }
  0x21   : > { %vm1147_vm3 = vcmp.ne.s32.totalorder %v3857_v20, 0  ;;  %vm1183_vm4 = vcmp.lt.s32.totalorder %v3857_v20, 0 }
  0x22   : > { %3320 = vmatmul.mubr.msk.f32.gmra.mrb[4].mxu0 %vm319_vm1, %v276_v17  ;;  %1762 = vrot.lane.b32.xlu1 %v1530_v23, %s3643_s14  ;;  %v779_v17 = vmul.u32 18, %v778_v3  ;;  %vm3900_vm9 = vmand %vm1183_vm4, %vm1147_vm3 }
  0x23   : > { %3322 = vmatprep.mubr.msk.f32.mxu0 %vm319_vm1, %v277_v18  ;;  %1764 = vrot.lane.b32.xlu0 %v1531_v39, %s3643_s14  ;;  %v3854_v18 = vmul.u32.u64.low 3817748708, %v3833_v4  ;;  %v3855_v19 = vmul.u32.u64.high 3817748708, %v3833_v4, %v3854_v18 }
  0x26   : > { %3323 = vmatmul.mubr.msk.f32.gmra.mrb[6].mxu0 %vm319_vm1, %v278_v21  ;;  %v790_v21 = vmul.u32 18, %v789_v7 }
  0x27   : > { %3325 = vmatprep.mubr.msk.f32.mxu0 %vm319_vm1, %v279_v22  ;;  %v3860_v22 = vmul.u32.u64.low 3817748708, %v3837_v8  ;;  %v3861_v23 = vmul.u32.u64.high 3817748708, %v3837_v8, %v3860_v22 }
  0x2a   : > { %3326 = vmatmul.mubr.msk.f32.gmra.mrb[8].mxu0 %vm319_vm1, %v280_v24  ;;  %v302_v24 = vld [vmem:[%s3728_s12 + $0xf8] sm:$0xff] }
  0x2b   : > { %3328 = vmatprep.mubr.msk.f32.mxu0 %vm319_vm1, %v281_v25  ;;  %v800_v25 = vshrl.u32 %v3823_v0, 4 }
  0x2e   : > { %3329 = vmatmul.mubr.msk.f32.gmra.mrb[10].mxu0 %vm319_vm1, %v282_v26  ;;  %v3866_v26 = vadd.s32 80, %v3798_v47 }
  0x2f   : > { %3331 = vmatprep.mubr.msk.f32.mxu0 %vm319_vm1, %v283_v27  ;;  %v3870_v27 = vsub.s32 %v3798_v47, %v757_v10 }
  0x31   : > { %vm1146_vm5 = vcmp.ne.s32.totalorder %v3870_v27, 0  ;;  %vm1182_vm6 = vcmp.lt.s32.totalorder %v3870_v27, 0 }
  0x32   : > { %3332 = vmatmul.mubr.msk.f32.gmra.mrb[12].mxu0 %vm319_vm1, %v284_v28  ;;  %v3872_v28 = vsub.s32 %v716_v49, %v779_v17  ;;  %vm3910_vm12 = vmand %vm1182_vm6, %vm1146_vm5 }
  0x33   : > { %3334 = vmatprep.mubr.msk.f32.mxu0 %vm319_vm1, %v285_v29  ;;  %v3877_v29 = vadd.s32 18, %v3857_v20 }
  0x34   : > { %vm1148_vm7 = vcmp.ne.s32.totalorder %v3872_v28, 0  ;;  %vm1184_vm8 = vcmp.lt.s32.totalorder %v3872_v28, 0 }
  0x35   : > { %vm3922_vm13 = vmand %vm1184_vm8, %vm1148_vm7  ;;  %v1291_v56 = vsel %vm3900_vm9, %v3877_v29, %v3857_v20 }
  0x36   : > { %3335 = vmatmul.mubr.msk.f32.gmra.mrb[14].mxu0 %vm319_vm1, %v286_v30  ;;  %v3879_v30 = vsub.s32 %v717_v52, %v790_v21 }
  0x37   : > { %3337 = vmatprep.mubr.msk.f32.mxu0 %vm319_vm1, %v287_v31  ;;  %v811_v31 = vshrl.u32 %v3842_v12, 4 }
  0x38   : > { %vm1149_vm10 = vcmp.ne.s32.totalorder %v3879_v30, 0  ;;  %vm1185_vm11 = vcmp.lt.s32.totalorder %v3879_v30, 0  ;;  %v1257_v46 = vadd.s32 18, %v3879_v30 }
  0x39   : > { %vm3926_vm14 = vmand %vm1185_vm11, %vm1149_vm10 }
  0x3a   : > { %3338 = vmatmul.mubr.msk.f32.gmra.mrb[16].mxu0 %vm319_vm1, %v288_v32  ;;  %v801_v32 = vmul.u32 18, %v800_v25  ;;  %v1293_v0 = vsel %vm3926_vm14, %v1257_v46, %v3879_v30 }
  0x3b   : > { %3340 = vmatprep.mubr.msk.f32.mxu0 %vm319_vm1, %v289_v33 }
  0x3e   : > { %3341 = vmatmul.mubr.msk.f32.gmra.mrb[18].mxu0 %vm319_vm1, %v290_v34  ;;  %v3883_v33 = vmul.u32.u64.low 3817748708, %v3866_v26  ;;  %v3884_v34 = vmul.u32.u64.high 3817748708, %v3866_v26, %v3883_v33 }
  0x3f   : > { %3343 = vmatprep.mubr.msk.f32.mxu0 %vm319_vm1, %v291_v35  ;;  %v833_v35 = vshrl.u32 %v3847_v14, 4 }
  0x40   : > { %v866_v63 = vshrl.u32 %v3884_v34, 4 }
  0x41   : > { %v834_v49 = vmul.u32 18, %v833_v35 }
  0x42   : > { %3344 = vmatmul.mubr.msk.f32.gmra.mrb[20].mxu0 %vm319_vm1, %v292_v36  ;;  %v822_v36 = vshrl.u32 %v3851_v16, 4 }
  0x43   : > { %3346 = vmatprep.mubr.msk.f32.mxu0 %vm319_vm1, %v293_v37  ;;  %v844_v37 = vshrl.u32 %v3855_v19, 4  ;;  %v3968_v7 = vsub.s32 %v3826_v1, %v834_v49  ;;  %v867_v1 = vmul.u32 18, %v866_v63  ;;  %v4109_v49 = vadd.s32 128, %v3798_v47 }
  0x44   : > { %v823_v50 = vmul.u32 18, %v822_v36 }
  0x45   : > { %v845_v52 = vmul.u32 18, %v844_v37  ;;  %vm1153_vm8 = vcmp.ne.s32.totalorder %v3968_v7, 0  ;;  %vm1189_vm9 = vcmp.lt.s32.totalorder %v3968_v7, 0  ;;  %v4026_v21 = vsub.s32 %v3866_v26, %v867_v1  ;;  %v4049_v26 = vld [vmem:[%s5857_s2] ss:$0 sm:$0xff] }
  0x46   : > { %3347 = vmatmul.mubr.msk.f32.gmra.mrb[22].mxu0 %vm319_vm1, %v294_v38  ;;  %v3894_v38 = vadd.s32 88, %v3798_v47  ;;  %v3965_v5 = vsub.s32 %v3829_v2, %v823_v50  ;;  %v3985_v2 = vadd.s32 112, %v3798_v47 }
  0x47   : > { %3349 = vmatprep.mubr.msk.f32.mxu0 %vm319_vm1, %v295_v40  ;;  %v3905_v40 = vadd.s32 18, %v3870_v27 }
  0x48   : > { %v3931_v53 = vmul.u32.u64.low 3817748708, %v3894_v38  ;;  %v3932_v54 = vmul.u32.u64.high 3817748708, %v3894_v38, %v3931_v53  ;;  %vm1152_vm5 = vcmp.ne.s32.totalorder %v3965_v5, 0  ;;  %vm1188_vm6 = vcmp.lt.s32.totalorder %v3965_v5, 0 }
  0x49   : > { %v1290_v57 = vsel %vm3910_vm12, %v3905_v40, %v3870_v27  ;;  %v4017_v18 = vmul.u32.u64.low 3817748708, %v3985_v2  ;;  %v4018_v19 = vmul.u32.u64.high 3817748708, %v3985_v2, %v4017_v18  ;;  %vm4020_vm14 = vmand %vm1188_vm6, %vm1152_vm5  ;;  %v1261_v27 = vadd.s32 18, %v3968_v7 }
  0x4a   : > { %3350 = vmatmul.mubr.msk.f32.gmra.mrb[24].mxu0 %vm319_vm1, %v296_v41  ;;  %v855_v41 = vshrl.u32 %v3861_v23, 4  ;;  %v877_v16 = vshrl.u32 %v3932_v54, 4  ;;  %vm4055_vm5 = vcmp.le.s32.totalorder %v1293_v0, 15  ;;  %v4124_v54 = vadd.s32 18, %v4026_v21 }
  0x4b   : > { %3352 = vmatprep.mubr.msk.f32.mxu0 %vm319_vm1, %v297_v42 }
  0x4c   : > { %v856_v58 = vmul.u32 18, %v855_v41  ;;  %v878_v33 = vmul.u32 18, %v877_v16 }
  0x4e   : > { %3353 = vmatmul.mubr.msk.f32.gmra.mrb[26].mxu0 %vm319_vm1, %v298_v43  ;;  %v3915_v43 = vadd.s32 18, %v3872_v28  ;;  %v3978_v11 = vsub.s32 %v3837_v8, %v856_v58  ;;  %v3996_v8 = vadd.s32 18, %v3965_v5  ;;  %v4121_v53 = vsub.s32 %v3894_v38, %v878_v33 }
  0x4f   : > { %3355 = vmatprep.mubr.msk.f32.mxu0 %vm319_vm1, %v299_v44  ;;  %v812_v44 = vmul.u32 18, %v811_v31  ;;  %v4210_v30 = vmul.u32.u64.low 3817748708, %v4173_v15  ;;  %v4211_v33 = vmul.u32.u64.high 3817748708, %v4173_v15, %v4210_v30 }
  0x50   : > { %v1292_v60 = vsel %vm3922_vm13, %v3915_v43, %v3872_v28  ;;  %vm1155_vm12 = vcmp.ne.s32.totalorder %v3978_v11, 0  ;;  %v4060_v31 = vadd.s32 18, %v3978_v11  ;;  %v1296_v42 = vsel %vm4020_vm14, %v3996_v8, %v3965_v5 }
  0x51   : > { %v3953_v61 = vsub.s32 %v3820_v62, %v812_v44  ;;  %v3971_v62 = vsub.s32 %v3833_v4, %v845_v52  ;;  %v3990_v4 = vadd.s32 120, %v3798_v47  ;;  %v4098_v43 = vadd.s32 136, %v3798_v47 }
  0x52   : > { %3356 = vmatmul.mubr.msk.f32.gmra.mrb[28].mxu0 %vm319_vm1, %v300_v45  ;;  %v3917_v45 = vsub.s32 %v718_v59, %v801_v32  ;;  %v3946_v59 = vadd.s32 104, %v3798_v47  ;;  %v4222_v34 = vadd.s32 18, %v4121_v53 }
  0x53   : > { %3358 = vmatprep.mubr.msk.f32.mxu0 %vm319_vm1, %v301_v9  ;;  %v3974_v9 = vmul.u32.u64.low 3817748708, %v3935_v55  ;;  %v3975_v10 = vmul.u32.u64.high 3817748708, %v3935_v55, %v3974_v9  ;;  %vm1151_vm3 = vcmp.ne.s32.totalorder %v3953_v61, 0  ;;  %vm1187_vm4 = vcmp.lt.s32.totalorder %v3953_v61, 0 }
  0x54   : > { %vm1150_vm15 = vcmp.ne.s32.totalorder %v3917_v45, 0  ;;  %vm1186_vm2 = vcmp.lt.s32.totalorder %v3917_v45, 0  ;;  %v3962_v3 = vadd.s32 18, %v3917_v45  ;;  %v1259_v14 = vadd.s32 18, %v3953_v61  ;;  %vm4010_vm11 = vmand %vm1187_vm4, %vm1151_vm3 }
  0x55   : > { %v3981_v12 = vmul.u32.u64.low 3817748708, %v3946_v59  ;;  %v3982_v13 = vmul.u32.u64.high 3817748708, %v3946_v59, %v3981_v12  ;;  %vm4002_vm7 = vmand %vm1186_vm2, %vm1150_vm15  ;;  %vm1154_vm10 = vcmp.ne.s32.totalorder %v3971_v62, 0  ;;  %vm1190_vm13 = vcmp.lt.s32.totalorder %v3971_v62, 0 }
  0x56   : > { %3359 = vmatmul.mubr.msk.f32.gmra.mrb[30].mxu0 %vm319_vm1, %v302_v24  ;;  %vm1191_vm15 = vcmp.lt.s32.totalorder %v3978_v11, 0  ;;  %v4029_v22 = vmul.u32.u64.low 3817748708, %v3990_v4  ;;  %v4030_v23 = vmul.u32.u64.high 3817748708, %v3990_v4, %v4029_v22  ;;  %vm4032_vm2 = vcmp.le.s32.totalorder %v1291_v56, 15  ;;  %vm4038_vm3 = vmand %vm1189_vm9, %vm1153_vm8 }
  0x57   : > { %v4044_v28 = vadd.s32 18, %v3971_v62  ;;  %vm4051_vm4 = vcmp.le.s32.totalorder %v1290_v57, 15  ;;  %vm4066_vm6 = vmand %vm1190_vm13, %vm1154_vm10  ;;  %vm4070_vm8 = vcmp.le.s32.totalorder %v1292_v60, 15  ;;  %v1295_v35 = vsel %vm4010_vm11, %v1259_v14, %v3953_v61 }
  0x58   : > { %v1294_v36 = vsel %vm4002_vm7, %v3962_v3, %v3917_v45  ;;  %vm4085_vm9 = vmand %vm1191_vm15, %vm1155_vm12  ;;  %v899_v39 = vshrl.u32 %v3982_v13, 4  ;;  %v888_v40 = vshrl.u32 %v3975_v10, 4  ;;  %vm1156_vm7 = vcmp.ne.s32.totalorder %v4026_v21, 0 }
  0x59   : > { %vm1192_vm10 = vcmp.lt.s32.totalorder %v4026_v21, 0  ;;  %v1297_v46 = vsel %vm4038_vm3, %v1261_v27, %v3968_v7  ;;  %v1298_v48 = vsel %vm4066_vm6, %v4044_v28, %v3971_v62  ;;  %vm4112_vm11 = vcmp.le.s32.totalorder %v1295_v35, 15 }
  0x5a   : > { %v1299_v52 = vsel %vm4085_vm9, %v4060_v31, %v3978_v11  ;;  %vm4133_vm12 = vcmp.le.s32.totalorder %v1294_v36, 15  ;;  %vm4141_vm13 = vmand %vm1192_vm10, %vm1156_vm7  ;;  %v900_v58 = vmul.u32 18, %v899_v39  ;;  %v889_v60 = vmul.u32 18, %v888_v40 }
  0x5b   : > { %v910_v61 = vshrl.u32 %v4018_v19, 4  ;;  %v921_v3 = vshrl.u32 %v4030_v23, 4  ;;  %v4148_v5 = vmul.u32.u64.low 3817748708, %v4098_v43  ;;  %v4149_v7 = vmul.u32.u64.high 3817748708, %v4098_v43, %v4148_v5 }
  0x5c   : > { %v4155_v11 = vmul.u32.u64.low 3817748708, %v4109_v49  ;;  %v4156_v12 = vmul.u32.u64.high 3817748708, %v4109_v49, %v4155_v11  ;;  %vm4164_vm14 = vcmp.le.s32.totalorder %v1297_v46, 15  ;;  %v1300_v8 = vsel %vm4141_vm13, %v4124_v54, %v4026_v21 }
  0x5d   : > { %vm4178_vm15 = vcmp.le.s32.totalorder %v1296_v42, 15  ;;  %v911_v18 = vmul.u32 18, %v910_v61  ;;  %v4184_v19 = vadd.s32 152, %v3798_v47  ;;  %v4187_v22 = vsub.s32 %v3946_v59, %v900_v58  ;;  %v304_v61 = vld [vmem:[%s3728_s12 + $0x108] sm:$0xff] }
  0x5e   : > { %v4190_v23 = vsub.s32 %v3935_v55, %v889_v60  ;;  %v922_v24 = vmul.u32 18, %v921_v3  ;;  %vm4205_vm3 = vcmp.le.s32.totalorder %v1299_v52, 15  ;;  %v943_v42 = vshrl.u32 %v4149_v7, 4 }
  0x5f   : > { %v4196_v29 = vmul.u32.u64.low 3817748708, %v4184_v19  ;;  %v4197_v31 = vmul.u32.u64.high 3817748708, %v4184_v19, %v4196_v29  ;;  %v4225_v37 = vsub.s32 %v3985_v2, %v911_v18  ;;  %v932_v2 = vshrl.u32 %v4156_v12, 4 }
  0x60   : > { %vm1158_vm6 = vcmp.ne.s32.totalorder %v4190_v23, 0  ;;  %vm1159_vm9 = vcmp.ne.s32.totalorder %v4187_v22, 0  ;;  %vm1195_vm7 = vcmp.lt.s32.totalorder %v4187_v22, 0  ;;  %v1267_v57 = vadd.s32 18, %v4187_v22 }
  0x61   : > { %v1266_v38 = vadd.s32 18, %v4190_v23  ;;  %v1268_v17 = vadd.s32 18, %v4225_v37 }
  0xed   : > { %v3315_v41 = vpop.f32.mrb[0].mxu0 }
  0xee   : > { %v504_v44 = vadd.f32 %v3315_v41, %v4049_v26  ;;  %v498_v45 = vpop.f32.mrb[1].mxu0  ;;  %v4229_v41 = vsub.s32 %v3990_v4, %v922_v24 }
  0xef   : > { %v499_v50 = vadd.f32 %v4049_v26, %v498_v45 }
  0xf0   : > { %v678_v56 = vmax.f32 %v504_v44, 0.0 }
  0xf1   : > { %v677_v63 = vmax.f32 %v499_v50, 0.0  ;;  %v3318_v0 = vpop.f32.mrb[2].mxu0 }
  0xf2   : > { %v1363_v62 = vsel %vm4032_vm2, %v678_v56, 0.0  ;;  %v514_v9 = vadd.f32 %v3318_v0, %v4049_v26  ;;  %v508_v10 = vpop.f32.mrb[3].mxu0  ;;  %vm1157_vm2 = vcmp.ne.s32.totalorder %v4121_v53, 0 }
  0xf3   : > { %1399 = vst.msk [vmem:[%s4131_s19 + $0x8] sm:$0xff] %vm265_vm0, %v1363_v62  ;;  %1435 = vst.msk [vmem:[#allocation2 + $0x30] sm:$0xff] %vm265_vm0, %v1363_v62  ;;  %v1362_v13 = vsel %vm4051_vm4, %v677_v63, 0.0  ;;  %v509_v1 = vadd.f32 %v4049_v26, %v508_v10  ;;  %vm4216_vm4 = vcmp.le.s32.totalorder %v1298_v48, 15  ;;  %v944_v63 = vmul.u32 18, %v943_v42 }
  0xf4   : > { %1398 = vst.msk [vmem:[%s4131_s19] sm:$0xff] %vm265_vm0, %v1362_v13  ;;  %1434 = vst.msk [vmem:[#allocation2 + $0x28] sm:$0xff] %vm265_vm0, %v1362_v13  ;;  %v680_v16 = vmax.f32 %v514_v9, 0.0  ;;  %v933_v62 = vmul.u32 18, %v932_v2  ;;  %v965_v9 = vshrl.u32 %v4197_v31, 4 }
  0xf5   : > { %v679_v20 = vmax.f32 %v509_v1, 0.0  ;;  %v3321_v21 = vpop.f32.mrb[4].mxu0  ;;  %v954_v1 = vshrl.u32 %v4211_v33, 4 }
  0xf6   : > { %v1365_v25 = vsel %vm4055_vm5, %v680_v16, 0.0  ;;  %v524_v27 = vadd.f32 %v3321_v21, %v4049_v26  ;;  %v518_v28 = vpop.f32.mrb[5].mxu0  ;;  %vm1193_vm5 = vcmp.lt.s32.totalorder %v4121_v53, 0  ;;  %v4335_v31 = vsub.s32 %v4109_v49, %v933_v62 }
  0xf7   : > { %1401 = vst.msk [vmem:[%s4131_s19 + $0x18] sm:$0xff] %vm265_vm0, %v1365_v25  ;;  %1437 = vst.msk [vmem:[#allocation2 + $0x40] sm:$0xff] %vm265_vm0, %v1365_v25  ;;  %v1364_v59 = vsel %vm4070_vm8, %v679_v20, 0.0  ;;  %v519_v55 = vadd.f32 %v4049_v26, %v518_v28  ;;  %vm1194_vm8 = vcmp.lt.s32.totalorder %v4190_v23, 0  ;;  %v1269_v25 = vadd.s32 18, %v4229_v41 }
  0xf8   : > { %1400 = vst.msk [vmem:[%s4131_s19 + $0x10] sm:$0xff] %vm265_vm0, %v1364_v59  ;;  %1436 = vst.msk [vmem:[#allocation2 + $0x38] sm:$0xff] %vm265_vm0, %v1364_v59  ;;  %v682_v35 = vmax.f32 %v524_v27, 0.0  ;;  %v955_v33 = vmul.u32 18, %v954_v1 }
  0xf9   : > { %v681_v39 = vmax.f32 %v519_v55, 0.0  ;;  %v3324_v40 = vpop.f32.mrb[6].mxu0  ;;  %vm4254_vm10 = vmand %vm1193_vm5, %vm1157_vm2  ;;  %vm1161_vm2 = vcmp.ne.s32.totalorder %v4229_v41, 0  ;;  %vm1196_vm5 = vcmp.lt.s32.totalorder %v4225_v37, 0 }
  0xfa   : > { %v1367_v44 = vsel %vm4112_vm11, %v682_v35, 0.0  ;;  %v534_v45 = vadd.f32 %v3324_v40, %v4049_v26  ;;  %v528_v46 = vpop.f32.mrb[7].mxu0  ;;  %vm4258_vm11 = vcmp.le.s32.totalorder %v1300_v8, 15  ;;  %vm4269_vm13 = vmand %vm1194_vm8, %vm1158_vm6  ;;  %v1301_v8 = vsel %vm4254_vm10, %v4222_v34, %v4121_v53 }
  0xfb   : > { %1403 = vst.msk [vmem:[%s4131_s19 + $0x28] sm:$0xff] %vm265_vm0, %v1367_v44  ;;  %1439 = vst.msk [vmem:[#allocation2 + $0x50] sm:$0xff] %vm265_vm0, %v1367_v44  ;;  %v1366_v4 = vsel %vm4133_vm12, %v681_v39, 0.0  ;;  %v1504_v48 = vld [vmem:[#allocation2 + $0x2a] sm:$0xff]  ;;  %v1503_v50 = vld [vmem:[#allocation2 + $0x22] sm:$0xff]  ;;  %v529_v52 = vadd.f32 %v4049_v26, %v528_v46  ;;  %vm1160_vm12 = vcmp.ne.s32.totalorder %v4225_v37, 0  ;;  %v1302_v16 = vsel %vm4269_vm13, %v1266_v38, %v4190_v23 }
  0xfc   : > { %1402 = vst.msk [vmem:[%s4131_s19 + $0x20] sm:$0xff] %vm265_vm0, %v1366_v4  ;;  %1438 = vst.msk [vmem:[#allocation2 + $0x48] sm:$0xff] %vm265_vm0, %v1366_v4  ;;  %v684_v51 = vmax.f32 %v534_v45, 0.0  ;;  %1652 = vrot.lane.b32.xlu1 %v1504_v48, %s3642_s13  ;;  %1650 = vrot.lane.b32.xlu0 %v1503_v50, %s3642_s13  ;;  %v1532_v11 = vld [vmem:[#allocation2 + $0x24] sm:$0xff]  ;;  %v1533_v12 = vld [vmem:[#allocation2 + $0x2c] sm:$0xff]  ;;  %v4321_v23 = vsub.s32 %v4098_v43, %v944_v63  ;;  %v966_v43 = vmul.u32 18, %v965_v9 }
  0xfd   : > { %v683_v58 = vmax.f32 %v529_v52, 0.0  ;;  %v3327_v60 = vpop.f32.mrb[8].mxu0  ;;  %vm4282_vm6 = vmand %vm1195_vm7, %vm1159_vm9  ;;  %vm1198_vm13 = vcmp.lt.s32.totalorder %v4335_v31, 0  ;;  %v4383_v50 = vsub.s32 %v4173_v15, %v955_v33 }
  0xfe   : > { %v1369_v0 = vsel %vm4164_vm14, %v684_v51, 0.0  ;;  %v544_v3 = vadd.f32 %v3327_v60, %v4049_v26  ;;  %v538_v5 = vpop.f32.mrb[9].mxu0  ;;  %vm1197_vm14 = vcmp.lt.s32.totalorder %v4229_v41, 0  ;;  %v1303_v24 = vsel %vm4282_vm6, %v1267_v57, %v4187_v22  ;;  %v303_v60 = vld [vmem:[%s3728_s12 + $0x100] sm:$0xff] }
  0xff   : > { %1405 = vst.msk [vmem:[%s4131_s19 + $0x38] sm:$0xff] %vm265_vm0, %v1369_v0  ;;  %1441 = vst.msk [vmem:[#allocation2 + $0x60] sm:$0xff] %vm265_vm0, %v1369_v0  ;;  %v1368_v10 = vsel %vm4178_vm15, %v683_v58, 0.0  ;;  %v539_v13 = vadd.f32 %v4049_v26, %v538_v5  ;;  %v1506_v18 = vld [vmem:[#allocation2 + $0x3a] sm:$0xff]  ;;  %v1505_v59 = vld [vmem:[#allocation2 + $0x32] sm:$0xff]  ;;  %vm4352_vm9 = vcmp.le.s32.totalorder %v1303_v24, 15  ;;  %3361 = vmatprep.mubr.msk.f32.mxu0 %vm319_vm1, %v303_v60 }
 0x100   : > { %1404 = vst.msk [vmem:[%s4131_s19 + $0x30] sm:$0xff] %vm265_vm0, %v1368_v10  ;;  %1440 = vst.msk [vmem:[#allocation2 + $0x58] sm:$0xff] %vm265_vm0, %v1368_v10  ;;  %1766 = vrot.lane.b32.xlu1 %v1532_v11, %s3643_s14  ;;  %1768 = vrot.lane.b32.xlu0 %v1533_v12, %s3643_s14  ;;  %v686_v14 = vmax.f32 %v544_v3, 0.0  ;;  %vm1163_vm7 = vcmp.ne.s32.totalorder %v4321_v23, 0  ;;  %vm1199_vm10 = vcmp.lt.s32.totalorder %v4321_v23, 0  ;;  %v1534_v2 = vld [vmem:[#allocation2 + $0x34] sm:$0xff] }
 0x101   : > { %v685_v20 = vmax.f32 %v539_v13, 0.0  ;;  %v3330_v21 = vpop.f32.mrb[10].mxu0  ;;  %vm4316_vm15 = vmand %vm1196_vm5, %vm1160_vm12  ;;  %vm1162_vm12 = vcmp.ne.s32.totalorder %v4335_v31, 0  ;;  %v1535_v4 = vld [vmem:[#allocation2 + $0x3c] sm:$0xff]  ;;  %v1271_v54 = vadd.s32 18, %v4321_v23  ;;  %v1270_v58 = vadd.s32 18, %v4335_v31  ;;  %3362 = vmatmul.mubr.msk.f32.gmra.mrb[32].mxu0 %vm319_vm1, %v304_v61 }
 0x102   : > { %v1371_v27 = vsel %vm4205_vm3, %v686_v14, 0.0  ;;  %v554_v28 = vadd.f32 %v3330_v21, %v4049_v26  ;;  %v548_v22 = vpop.f32.mrb[11].mxu0  ;;  %vm4330_vm8 = vmand %vm1197_vm14, %vm1161_vm2  ;;  %vm4342_vm3 = vcmp.le.s32.totalorder %v1301_v8, 15  ;;  %v1304_v34 = vsel %vm4316_vm15, %v1268_v17, %v4225_v37  ;;  %v2686_v5 = vld [vmem:[%s5858_s3] sm:$0xff] }
 0x103   : > { %1407 = vst.msk [vmem:[%s4131_s19 + $0x48] sm:$0xff] %vm265_vm0, %v1371_v27  ;;  %1443 = vst.msk [vmem:[#allocation2 + $0x70] sm:$0xff] %vm265_vm0, %v1371_v27  ;;  %v1370_v55 = vsel %vm4216_vm4, %v685_v20, 0.0  ;;  %v549_v30 = vadd.f32 %v4049_v26, %v548_v22  ;;  %vm4356_vm4 = vcmp.le.s32.totalorder %v1302_v16, 15  ;;  %v1305_v42 = vsel %vm4330_vm8, %v1269_v25, %v4229_v41  ;;  %v1508_v56 = vld [vmem:[#allocation2 + $0x4a] sm:$0xff]  ;;  %v1507_v7 = vld [vmem:[#allocation2 + $0x42] sm:$0xff] }
 0x104   : > { %1656 = vrot.lane.b32.xlu1 %v1506_v18, %s3642_s13  ;;  %1654 = vrot.lane.b32.xlu0 %v1505_v59, %s3642_s13  ;;  %1406 = vst.msk [vmem:[%s4131_s19 + $0x40] sm:$0xff] %vm265_vm0, %v1370_v55  ;;  %1442 = vst.msk [vmem:[#allocation2 + $0x68] sm:$0xff] %vm265_vm0, %v1370_v55  ;;  %v688_v49 = vmax.f32 %v554_v28, 0.0  ;;  %v4373_v37 = vsub.s32 %v4184_v19, %v966_v43  ;;  %vm4390_vm2 = vcmp.le.s32.totalorder %v1305_v42, 15  ;;  %vm1164_vm8 = vcmp.ne.s32.totalorder %v4383_v50, 0  ;;  %v1537_v27 = vld [vmem:[#allocation2 + $0x4c] sm:$0xff] }
 0x105   : > { %v687_v39 = vmax.f32 %v549_v30, 0.0  ;;  %v3333_v40 = vpop.f32.mrb[12].mxu0  ;;  %vm4402_vm5 = vmand %vm1199_vm10, %vm1163_vm7  ;;  %v734_v13 = vadd.s32 160, %v3798_v47  ;;  %v1272_v17 = vadd.s32 18, %v4383_v50  ;;  %v735_v42 = vadd.s32 168, %v3798_v47 }
 0x106   : > { %v1373_v44 = vsel %vm4342_vm3, %v688_v49, 0.0  ;;  %v564_v45 = vadd.f32 %v3333_v40, %v4049_v26  ;;  %v558_v46 = vpop.f32.mrb[13].mxu0  ;;  %vm4417_vm6 = vmand %vm1198_vm13, %vm1162_vm12  ;;  %vm1165_vm14 = vcmp.ne.s32.totalorder %v4373_v37, 0  ;;  %vm1201_vm15 = vcmp.lt.s32.totalorder %v4373_v37, 0  ;;  %v1482_v59 = vld [vmem:[#allocation2 + $0x60] sm:$0xff] }
 0x107   : > { %1409 = vst.msk [vmem:[%s4131_s19 + $0x58] sm:$0xff] %vm265_vm0, %v1373_v44  ;;  %1445 = vst.msk [vmem:[#allocation2 + $0x80] sm:$0xff] %vm265_vm0, %v1373_v44  ;;  %v1372_v41 = vsel %vm4258_vm11, %v687_v39, 0.0  ;;  %v559_v48 = vadd.f32 %v4049_v26, %v558_v46  ;;  %vm4394_vm11 = vcmp.le.s32.totalorder %v1304_v34, 15  ;;  %vm1200_vm3 = vcmp.lt.s32.totalorder %v4383_v50, 0  ;;  %v1510_v43 = vld [vmem:[#allocation2 + $0x5a] sm:$0xff] }
 0x108   : > { %1770 = vrot.lane.b32.xlu1 %v1534_v2, %s3643_s14  ;;  %1772 = vrot.lane.b32.xlu0 %v1535_v4, %s3643_s14  ;;  %1408 = vst.msk [vmem:[%s4131_s19 + $0x50] sm:$0xff] %vm265_vm0, %v1372_v41  ;;  %1444 = vst.msk [vmem:[#allocation2 + $0x78] sm:$0xff] %vm265_vm0, %v1372_v41  ;;  %v690_v19 = vmax.f32 %v564_v45, 0.0  ;;  %v1307_v11 = vsel %vm4402_vm5, %v1271_v54, %v4321_v23  ;;  %v1273_v12 = vadd.s32 18, %v4373_v37  ;;  %v1536_v23 = vld [vmem:[#allocation2 + $0x44] sm:$0xff]  ;;  %v1481_v16 = vld [vmem:[#allocation2 + $0x58] sm:$0xff] }
 0x109   : > { %v689_v57 = vmax.f32 %v559_v48, 0.0  ;;  %v3336_v38 = vpop.f32.mrb[14].mxu0  ;;  %v1306_v8 = vsel %vm4417_vm6, %v1270_v58, %v4335_v31  ;;  %v4466_v25 = vmul.u32.u64.low 3817748708, %v734_v13  ;;  %v4467_v53 = vmul.u32.u64.high 3817748708, %v734_v13, %v4466_v25  ;;  %v1538_v48 = vld [vmem:[#allocation2 + $0x54] sm:$0xff] }
 0x10a   : > { %v1375_v63 = vsel %vm4352_vm9, %v690_v19, 0.0  ;;  %v574_v0 = vadd.f32 %v3336_v38, %v4049_v26  ;;  %v568_v3 = vpop.f32.mrb[15].mxu0  ;;  %vm4450_vm9 = vmand %vm1201_vm15, %vm1165_vm14  ;;  %vm1343_vm7 = vcmp.le.s32.totalorder %v1307_v11, 15  ;;  %vm1342_vm10 = vcmp.le.s32.totalorder %v1306_v8, 15  ;;  %v1539_v38 = vld [vmem:[#allocation2 + $0x5c] sm:$0xff]  ;;  %v2692_v25 = vld [vmem:[%s5858_s3 + $0x30] sm:$0xff] }
 0x10b   : > { %1411 = vst.msk [vmem:[%s4131_s19 + $0x68] sm:$0xff] %vm265_vm0, %v1375_v63  ;;  %1447 = vst.msk [vmem:[#allocation2 + $0x90] sm:$0xff] %vm265_vm0, %v1375_v63  ;;  %v1374_v62 = vsel %vm4356_vm4, %v689_v57, 0.0  ;;  %v569_v9 = vadd.f32 %v4049_v26, %v568_v3  ;;  %v1309_v31 = vsel %vm4450_vm9, %v1273_v12, %v4373_v37  ;;  %v976_v36 = vshrl.u32 %v4467_v53, 4  ;;  %v1567_v57 = vld [vmem:[#allocation2 + $0x56] sm:$0xff]  ;;  %v1512_v63 = vld [vmem:[#allocation2 + $0x6a] sm:$0xff] }
 0x10c   : > { %1660 = vrot.lane.b32.xlu1 %v1508_v56, %s3642_s13  ;;  %1658 = vrot.lane.b32.xlu0 %v1507_v7, %s3642_s13  ;;  %1410 = vst.msk [vmem:[%s4131_s19 + $0x60] sm:$0xff] %vm265_vm0, %v1374_v62  ;;  %1446 = vst.msk [vmem:[#allocation2 + $0x88] sm:$0xff] %vm265_vm0, %v1374_v62  ;;  %v692_v10 = vmax.f32 %v574_v0, 0.0  ;;  %vm1345_vm12 = vcmp.le.s32.totalorder %v1309_v31, 15  ;;  %v4498_v2 = vmul.u32.u64.low 3817748708, %v735_v42  ;;  %v4499_v4 = vmul.u32.u64.high 3817748708, %v735_v42, %v4498_v2 }
 0x10d   : > { %v691_v1 = vmax.f32 %v569_v9, 0.0  ;;  %v3339_v14 = vpop.f32.mrb[16].mxu0  ;;  %vm4462_vm4 = vmand %vm1200_vm3, %vm1164_vm8  ;;  %v977_v44 = vmul.u32 18, %v976_v36  ;;  %v3646_v3 = vmov 0.0|0.0   ;;  %v2687_v7 = vld [vmem:[%s5858_s3 + $0x8] sm:$0xff]  ;;  %v2688_v12 = vld [vmem:[%s5858_s3 + $0x10] sm:$0xff] }
 0x10e   : > { %v1377_v18 = vsel %vm4390_vm2, %v692_v10, 0.0  ;;  %v584_v20 = vadd.f32 %v3339_v14, %v4049_v26  ;;  %v578_v21 = vpop.f32.mrb[17].mxu0  ;;  %v1308_v30 = vsel %vm4462_vm4, %v1272_v17, %v4383_v50  ;;  %v1509_v50 = vld [vmem:[#allocation2 + $0x52] sm:$0xff]  ;;  %v987_v56 = vshrl.u32 %v4499_v4, 4  ;;  %3492 = vmatprep.subr.bf16.mxu1 %v3646_v3  ;;  %3480 = vmatprep.subr.bf16.mxu0 %v3646_v3  ;;  %v1540_v8 = vld [vmem:[#allocation2 + $0x64] sm:$0xff] }
 0x10f   : > { %1413 = vst.msk [vmem:[%s4131_s19 + $0x78] sm:$0xff] %vm265_vm0, %v1377_v18  ;;  %1449 = vst.msk [vmem:[#allocation2 + $0xa0] sm:$0xff] %vm265_vm0, %v1377_v18  ;;  %v1376_v28 = vsel %vm4394_vm11, %v691_v1, 0.0  ;;  %v579_v22 = vadd.f32 %v4049_v26, %v578_v21  ;;  %vm1344_vm13 = vcmp.le.s32.totalorder %v1308_v30, 15  ;;  %v978_v51 = vsub.s32 %v734_v13, %v977_v44  ;;  %v2689_v13 = vld [vmem:[%s5858_s3 + $0x18] sm:$0xff]  ;;  %v4533_v18 = vld [vmem:[#allocation2 + $0x80] sm:$0xff] }
 0x110   : > { %1774 = vrot.lane.b32.xlu1 %v1536_v23, %s3643_s14  ;;  %1776 = vrot.lane.b32.xlu0 %v1537_v27, %s3643_s14  ;;  %1412 = vst.msk [vmem:[%s4131_s19 + $0x70] sm:$0xff] %vm265_vm0, %v1376_v28  ;;  %1448 = vst.msk [vmem:[#allocation2 + $0x98] sm:$0xff] %vm265_vm0, %v1376_v28  ;;  %v694_v29 = vmax.f32 %v584_v20, 0.0  ;;  %v988_v61 = vmul.u32 18, %v987_v56  ;;  %v3481_v9 = vpack.c.bf16 %v2687_v7, %v2686_v5  ;;  %v2690_v20 = vld [vmem:[%s5858_s3 + $0x20] sm:$0xff]  ;;  %vm3649_vm9 = vmmov 0  }
 0x111   : > { %v693_v55 = vmax.f32 %v579_v22, 0.0  ;;  %v3342_v32 = vpop.f32.mrb[18].mxu0  ;;  %vm1166_vm2 = vcmp.ne.s32.totalorder %v978_v51, 0  ;;  %vm1202_vm11 = vcmp.lt.s32.totalorder %v978_v51, 0  ;;  %v1274_v54 = vadd.s32 18, %v978_v51  ;;  %v2691_v21 = vld [vmem:[%s5858_s3 + $0x28] sm:$0xff]  ;;  %3403 = vmatprep.mubr.msk.f32.mxu1 %vm3649_vm9, %v5862_v6 }
 0x112   : > { %v1379_v33 = vsel %vm1343_vm7, %v694_v29, 0.0  ;;  %v594_v49 = vadd.f32 %v3342_v32, %v4049_v26  ;;  %v588_v35 = vpop.f32.mrb[19].mxu0  ;;  %vm1238_vm5 = vmand %vm1202_vm11, %vm1166_vm2  ;;  %v989_v62 = vsub.s32 %v735_v42, %v988_v61  ;;  %3497 = vmatpush3.bf16.msra.mxu1 %v3481_v9  ;;  %3482 = vmatpush3.bf16.msra.mxu0 %v3481_v9  ;;  %v3484_v14 = vpack.c.bf16 %v2689_v13, %v2688_v12  ;;  %v2693_v53 = vld [vmem:[%s5858_s3 + $0x38] sm:$0xff]  ;;  %v1484_v29 = vld [vmem:[#allocation2 + $0x70] sm:$0xff] }
 0x113   : > { %1415 = vst.msk [vmem:[%s4131_s19 + $0x88] sm:$0xff] %vm265_vm0, %v1379_v33  ;;  %1451 = vst.msk [vmem:[#allocation2 + $0xb0] sm:$0xff] %vm265_vm0, %v1379_v33  ;;  %v1378_v34 = vsel %vm1342_vm10, %v693_v55, 0.0  ;;  %v589_v39 = vadd.f32 %v4049_v26, %v588_v35  ;;  %v1310_v58 = vsel %vm1238_vm5, %v1274_v54, %v978_v51  ;;  %3493 = vmatprep.subr.bf16.mxu1 %v3646_v3  ;;  %3483 = vmatprep.subr.bf16.mxu0 %v3646_v3  ;;  %v1514_v27 = vld [vmem:[#allocation2 + $0x7a] sm:$0xff]  ;;  %v1541_v33 = vld [vmem:[#allocation2 + $0x6c] sm:$0xff] }
 0x114   : > { %1664 = vrot.lane.b32.xlu1 %v1510_v43, %s3642_s13  ;;  %2095 = vrot.lane.b32.xlu0 %v1482_v59, %s3644_s20  ;;  %1414 = vst.msk [vmem:[%s4131_s19 + $0x80] sm:$0xff] %vm265_vm0, %v1378_v34  ;;  %1450 = vst.msk [vmem:[#allocation2 + $0xa8] sm:$0xff] %vm265_vm0, %v1378_v34  ;;  %v696_v40 = vmax.f32 %v594_v49, 0.0  ;;  %vm1346_vm6 = vcmp.le.s32.totalorder %v1310_v58, 15  ;;  %vm1167_vm14 = vcmp.ne.s32.totalorder %v989_v62, 0  ;;  %vm1203_vm15 = vcmp.lt.s32.totalorder %v989_v62, 0 }
 0x115   : > { %v695_v45 = vmax.f32 %v589_v39, 0.0  ;;  %v3345_v46 = vpop.f32.mrb[20].mxu0  ;;  %v1275_v11 = vadd.s32 18, %v989_v62  ;;  %vm1239_vm8 = vmand %vm1203_vm15, %vm1167_vm14  ;;  %v3487_v24 = vpack.c.bf16 %v2691_v21, %v2690_v20  ;;  %v3490_v23 = vpack.c.bf16 %v2693_v53, %v2692_v25  ;;  %v1568_v28 = vld [vmem:[#allocation2 + $0x5e] sm:$0xff]  ;;  %v4557_v22 = vld [vmem:[#allocation2 + $0x74] sm:$0xff] }
 0x116   : > { %v1381_v37 = vsel %vm1345_vm12, %v696_v40, 0.0  ;;  %v598_v41 = vpop.f32.mrb[21].mxu0  ;;  %v604_v60 = vadd.f32 %v3345_v46, %v4049_v26  ;;  %3498 = vmatpush3.bf16.msra.mxu1 %v3484_v14  ;;  %3485 = vmatpush3.bf16.msra.mxu0 %v3484_v14  ;;  %v2694_v31 = vld [vmem:[%s5858_s3 + $0x40] sm:$0xff]  ;;  %v4567_v43 = vld [vmem:[#allocation2 + $0x78] sm:$0xff]  ;;  %v736_v55 = vadd.s32 176, %v3798_v47  ;;  %v737_v34 = vadd.s32 184, %v3798_v47 }
 0x117   : > { %1417 = vst.msk [vmem:[%s4131_s19 + $0x98] sm:$0xff] %vm265_vm0, %v1381_v37  ;;  %1453 = vst.msk [vmem:[#allocation2 + $0xc0] sm:$0xff] %vm265_vm0, %v1381_v37  ;;  %v1380_v19 = vsel %vm1344_vm13, %v695_v45, 0.0  ;;  %v599_v52 = vadd.f32 %v4049_v26, %v598_v41  ;;  %v1311_v1 = vsel %vm1239_vm8, %v1275_v11, %v989_v62  ;;  %3494 = vmatprep.subr.bf16.mxu1 %v3646_v3  ;;  %3486 = vmatprep.subr.bf16.mxu0 %v3646_v3  ;;  %v1511_v59 = vld [vmem:[#allocation2 + $0x62] sm:$0xff]  ;;  %v4585_v40 = vld [vmem:[#allocation2 + $0x90] sm:$0xff]  ;;  %v4629_v11 = vpop.permute.xlu0 %1642 }
 0x118   : > { %1778 = vrot.lane.b32.xlu1 %v1538_v48, %s3643_s14  ;;  %1662 = vrot.lane.b32.xlu0 %v1509_v50, %s3642_s13  ;;  %1416 = vst.msk [vmem:[%s4131_s19 + $0x90] sm:$0xff] %vm265_vm0, %v1380_v19  ;;  %1452 = vst.msk [vmem:[#allocation2 + $0xb8] sm:$0xff] %vm265_vm0, %v1380_v19  ;;  %v698_v10 = vmax.f32 %v604_v60, 0.0  ;;  %vm1347_vm3 = vcmp.le.s32.totalorder %v1311_v1, 15  ;;  %v4573_v32 = vmul.u32.u64.low 3817748708, %v736_v55  ;;  %v4574_v30 = vmul.u32.u64.high 3817748708, %v736_v55, %v4573_v32 }
 0x119   : > { %v697_v15 = vmax.f32 %v599_v52, 0.0  ;;  %v4579_v35 = vld [vmem:[#allocation2 + $0x7c] sm:$0xff]  ;;  %v3348_v36 = vpop.f32.mrb[22].mxu0  ;;  %v4587_v44 = vmul.u32.u64.low 3817748708, %v737_v34  ;;  %v4588_v45 = vmul.u32.u64.high 3817748708, %v737_v34, %v4587_v44  ;;  %v1569_v2 = vld [vmem:[#allocation2 + $0x66] sm:$0xff] }
 0x11a   : > { %v1383_v17 = vsel %vm1347_vm3, %v698_v10, 0.0  ;;  %3499 = vmatpush3.bf16.msra.mxu1 %v3487_v24  ;;  %3488 = vmatpush3.bf16.msra.mxu0 %v3487_v24  ;;  %v998_v49 = vshrl.u32 %v4574_v30, 4  ;;  %v608_v42 = vpop.f32.mrb[23].mxu0  ;;  %v1516_v19 = vld [vmem:[#allocation2 + $0x8a] sm:$0xff]  ;;  %v614_v51 = vadd.f32 %v3348_v36, %v4049_v26  ;;  %v4606_v61 = vld [vmem:[#allocation2 + $0x82] sm:$0xff]  ;;  %v1513_v5 = vld [vmem:[#allocation2 + $0x72] sm:$0xff]  ;;  %v4627_v10 = vpop.permute.xlu1 %1646 }
 0x11b   : > { %v1382_v0 = vsel %vm1346_vm6, %v697_v15, 0.0  ;;  %1419 = vst.msk [vmem:[%s4131_s19 + $0xa8] sm:$0xff] %vm265_vm0, %v1383_v17  ;;  %1455 = vst.msk [vmem:[#allocation2 + $0xd0] sm:$0xff] %vm265_vm0, %v1383_v17  ;;  %3495 = vmatprep.subr.bf16.mxu1 %v3646_v3  ;;  %3489 = vmatprep.subr.bf16.mxu0 %v3646_v3  ;;  %v609_v46 = vadd.f32 %v4049_v26, %v608_v42  ;;  %v1483_v52 = vld [vmem:[#allocation2 + $0x68] sm:$0xff]  ;;  %v738_v7 = vadd.s32 192, %v3798_v47  ;;  %v739_v1 = vadd.s32 200, %v3798_v47  ;;  %v4649_v25 = vpop.permute.xlu0 %1644 }
 0x11c   : > { %1977 = vrot.lane.b32.xlu1 %v1567_v57, %s3645_s23  ;;  %1780 = vrot.lane.b32.xlu0 %v1539_v38, %s3643_s14  ;;  %1418 = vst.msk [vmem:[%s4131_s19 + $0xa0] sm:$0xff] %vm265_vm0, %v1382_v0  ;;  %1454 = vst.msk [vmem:[#allocation2 + $0xc8] sm:$0xff] %vm265_vm0, %v1382_v0  ;;  %v999_v39 = vmul.u32 18, %v998_v49  ;;  %v4601_v57 = vld [vmem:[#allocation2 + $0x84] sm:$0xff]  ;;  %v4635_v13 = vld [vmem:[#allocation2 + $0x8c] sm:$0xff]  ;;  %v740_v30 = vadd.s32 208, %v3798_v47 }
 0x11d   : > { %v699_v4 = vmax.f32 %v609_v46, 0.0  ;;  %v4618_v3 = vld [vmem:[#allocation2 + $0x88] sm:$0xff]  ;;  %v4624_v62 = vmul.u32.u64.low 3817748708, %v738_v7  ;;  %v4625_v9 = vmul.u32.u64.high 3817748708, %v738_v7, %v4624_v62  ;;  %5939 = vst [vmem:[#allocation4_spill] sm:$0xff] %v4627_v10  ;;  %5941 = vst [vmem:[#allocation6_spill] sm:$0xff] %v4649_v25 }
 0x11e   : > { %3500 = vmatpush3.bf16.msra.mxu1 %v3490_v23  ;;  %3491 = vmatpush3.bf16.msra.mxu0 %v3490_v23  ;;  %v1000_v37 = vsub.s32 %v736_v55, %v999_v39  ;;  %v4647_v24 = vpop.permute.xlu1 %1648  ;;  %v1571_v23 = vld [vmem:[#allocation2 + $0x76] sm:$0xff] }
 0x11f   : > { %3496 = vmatprep.subr.mxu1 %v5862_v6  ;;  %3383 = vmatprep.subr.mxu0 %v5862_v6  ;;  %v1020_v12 = vshrl.u32 %v4625_v9, 4  ;;  %5940 = vst [vmem:[#allocation5_spill] sm:$0xff] %v4647_v24  ;;  %v4662_v49 = vpop.permute.xlu0 %1760  ;;  %v4674_v39 = vld [vmem:[#allocation2 + $0x94] sm:$0xff] }
 0x120   : > { %1668 = vrot.lane.b32.xlu1 %v1512_v63, %s3642_s13  ;;  %1861 = vrot.lane.b32.xlu0 %v1538_v48, %s3647_s28  ;;  %vm1168_vm4 = vcmp.ne.s32.totalorder %v1000_v37, 0  ;;  %vm1204_vm7 = vcmp.lt.s32.totalorder %v1000_v37, 0  ;;  %v1276_v41 = vadd.s32 18, %v1000_v37  ;;  %v1009_v48 = vshrl.u32 %v4588_v45, 4  ;;  %v1570_v63 = vld [vmem:[#allocation2 + $0x6e] sm:$0xff]  ;;  %5942 = vst [vmem:[#allocation7_spill] sm:$0xff] %v4662_v49 }
 0x121   : > { %vm1240_vm10 = vmand %vm1204_vm7, %vm1168_vm4  ;;  %v1021_v14 = vmul.u32 18, %v1020_v12  ;;  %v4716_v9 = vld [vmem:[#allocation2 + $0x98] sm:$0xff] }
 0x122   : > { %3501 = vmatpush3.msra.mxu1 %v2694_v31  ;;  %3384 = vmatpush3.msra.mxu0 %v2694_v31  ;;  %v1312_v50 = vsel %vm1240_vm10, %v1276_v41, %v1000_v37  ;;  %v1010_v15 = vmul.u32 18, %v1009_v48  ;;  %v4656_v31 = vld [vmem:[#allocation2 + $0x9a] sm:$0xff]  ;;  %v741_v48 = vadd.s32 216, %v3798_v47 }
 0x123   : > { %vm1348_vm12 = vcmp.le.s32.totalorder %v1312_v50, 15  ;;  %v1022_v21 = vsub.s32 %v738_v7, %v1021_v14  ;;  %v4683_v37 = vpop.permute.xlu0 %1764 }
 0x124   : > { %1782 = vrot.lane.b32.xlu1 %v1540_v8, %s3643_s14  ;;  %2093 = vrot.lane.b32.xlu0 %v1481_v16, %s3644_s20  ;;  %v1384_v54 = vsel %vm1348_vm12, %v699_v4, 0.0  ;;  %v1011_v56 = vsub.s32 %v737_v34, %v1010_v15  ;;  %v4642_v16 = vld [vmem:[#allocation2 + $0xa0] sm:$0xff]  ;;  %5944 = vst [vmem:[#allocation9_spill] sm:$0xff] %v4683_v37 }
 0x125   : > { %1420 = vst.msk [vmem:[%s4131_s19 + $0xb0] sm:$0xff] %vm265_vm0, %v1384_v54  ;;  %1456 = vst.msk [vmem:[#allocation2 + $0xd8] sm:$0xff] %vm265_vm0, %v1384_v54  ;;  %vm1170_vm6 = vcmp.ne.s32.totalorder %v1022_v21, 0  ;;  %vm1206_vm14 = vcmp.lt.s32.totalorder %v1022_v21, 0  ;;  %v1572_v4 = vld [vmem:[#allocation2 + $0x7e] sm:$0xff] }
 0x126   : > { %vm1169_vm13 = vcmp.ne.s32.totalorder %v1011_v56, 0  ;;  %vm1205_vm2 = vcmp.lt.s32.totalorder %v1011_v56, 0  ;;  %v1277_v58 = vadd.s32 18, %v1011_v56  ;;  %vm1242_vm15 = vmand %vm1206_vm14, %vm1170_vm6 }
 0x127   : > { %vm1241_vm11 = vmand %vm1205_vm2, %vm1169_vm13 }
 0x128   : > { %2186 = vrot.lane.b32.xlu1 %v4533_v18, %s3648_s16  ;;  %1863 = vrot.lane.b32.xlu0 %v1539_v38, %s3647_s28  ;;  %v700_v38 = vmax.f32 %v614_v51, 0.0  ;;  %v1313_v60 = vsel %vm1241_vm11, %v1277_v58, %v1011_v56 }
 0x129   : > { %vm1349_vm5 = vcmp.le.s32.totalorder %v1313_v60, 15 }
 0x12a   : > { %v1385_v0 = vsel %vm1349_vm5, %v700_v38, 0.0  ;;  %v4704_v38 = vld [vmem:[%s5857_s2] ss:$0 sm:$0xff] }
 0x12b   : > { %1421 = vst.msk [vmem:[%s4131_s19 + $0xb8] sm:$0xff] %vm265_vm0, %v1385_v0  ;;  %1457 = vst.msk [vmem:[#allocation2 + $0xe0] sm:$0xff] %vm265_vm0, %v1385_v0 }
 0x12c   : > { %1672 = vrot.lane.b32.xlu1 %v1514_v27, %s3642_s13  ;;  %1979 = vrot.lane.b32.xlu0 %v1568_v28, %s3645_s23 }
 0x130   : > { %1786 = vrot.lane.b32.xlu1 %v4557_v22, %s3643_s14  ;;  %2099 = vrot.lane.b32.xlu0 %v1484_v29, %s3644_s20 }
 0x134   : > { %2184 = vrot.lane.b32.xlu1 %v4567_v43, %s3648_s16  ;;  %1666 = vrot.lane.b32.xlu0 %v1511_v59, %s3642_s13 }
 0x138   : > { %2280 = vrot.lane.b32.xlu1 %v1514_v27, %s3650_s29  ;;  %1784 = vrot.lane.b32.xlu0 %v1541_v33, %s3643_s14  ;;  %v1278_v27 = vadd.s32 18, %v1022_v21 }
 0x13a   : > { %v1314_v29 = vsel %vm1242_vm15, %v1278_v27, %v1022_v21 }
 0x13b   : > { %vm1350_vm8 = vcmp.le.s32.totalorder %v1314_v29, 15 }
 0x13c   : > { %2372 = vrot.lane.b32.xlu1 %v4579_v35, %s3651_s30  ;;  %1865 = vrot.lane.b32.xlu0 %v1540_v8, %s3647_s28  ;;  %v3351_v8 = vpop.f32.mrb[24].mxu0 }
 0x13d   : > { %v618_v20 = vpop.f32.mrb[25].mxu0  ;;  %v624_v59 = vadd.f32 %v3351_v8, %v4049_v26 }
 0x13e   : > { %v619_v53 = vadd.f32 %v4049_v26, %v618_v20  ;;  %v4671_v26 = vmul.u32.u64.low 3817748708, %v740_v30  ;;  %v4672_v34 = vmul.u32.u64.high 3817748708, %v740_v30, %v4671_v26  ;;  %v742_v20 = vadd.s32 224, %v3798_v47 }
 0x13f   : > { %v702_v42 = vmax.f32 %v624_v59, 0.0  ;;  %v4760_v26 = vld [vmem:[#allocation2 + $0xb0] sm:$0xff] }
 0x140   : > { %2190 = vrot.lane.b32.xlu1 %v4585_v40, %s3648_s16  ;;  %1981 = vrot.lane.b32.xlu0 %v1569_v2, %s3645_s23  ;;  %v701_v28 = vmax.f32 %v619_v53, 0.0  ;;  %v1042_v45 = vshrl.u32 %v4672_v34, 4  ;;  %v4685_v2 = vld [vmem:[#allocation2 + $0x92] sm:$0xff] }
 0x142   : > { %v1386_v32 = vsel %vm1350_vm8, %v701_v28, 0.0  ;;  %v1043_v50 = vmul.u32 18, %v1042_v45  ;;  %v4739_v27 = vmul.u32.u64.low 3817748708, %v742_v20  ;;  %v4740_v28 = vmul.u32.u64.high 3817748708, %v742_v20, %v4739_v27 }
 0x143   : > { %1422 = vst.msk [vmem:[%s4131_s19 + $0xc0] sm:$0xff] %vm265_vm0, %v1386_v32  ;;  %1458 = vst.msk [vmem:[#allocation2 + $0xe8] sm:$0xff] %vm265_vm0, %v1386_v32  ;;  %v1573_v32 = vld [vmem:[#allocation2 + $0x86] sm:$0xff] }
 0x144   : > { %1676 = vrot.lane.b32.xlu1 %v1516_v19, %s3642_s13  ;;  %2097 = vrot.lane.b32.xlu0 %v1483_v52, %s3644_s20  ;;  %v1044_v15 = vsub.s32 %v740_v30, %v1043_v50 }
 0x146   : > { %vm1172_vm12 = vcmp.ne.s32.totalorder %v1044_v15, 0  ;;  %vm1208_vm13 = vcmp.lt.s32.totalorder %v1044_v15, 0 }
 0x147   : > { %vm1244_vm2 = vmand %vm1208_vm13, %vm1172_vm12 }
 0x148   : > { %1790 = vrot.lane.b32.xlu1 %v4601_v57, %s3643_s14  ;;  %1867 = vrot.lane.b32.xlu0 %v1541_v33, %s3647_s28  ;;  %v4660_v33 = vpop.permute.xlu1 %1758 }
 0x14c   : > { %2282 = vrot.lane.b32.xlu1 %v4606_v61, %s3650_s29  ;;  %1983 = vrot.lane.b32.xlu0 %v1570_v63, %s3645_s23  ;;  %v4681_v46 = vpop.permute.xlu1 %1762  ;;  %v1280_v63 = vadd.s32 18, %v1044_v15 }
 0x14d   : > { %5943 = vst [vmem:[#allocation8_spill] sm:$0xff] %v4681_v46 }
 0x14e   : > { %v1316_v62 = vsel %vm1244_vm2, %v1280_v63, %v1044_v15  ;;  %v1520_v15 = vld [vmem:[#allocation2 + $0xaa] sm:$0xff] }
 0x14f   : > { %vm1352_vm11 = vcmp.le.s32.totalorder %v1316_v62, 15 }
 0x150   : > { %2374 = vrot.lane.b32.xlu1 %v4601_v57, %s3651_s30  ;;  %2103 = vrot.lane.b32.xlu0 %v4533_v18, %s3644_s20  ;;  %v4644_v17 = vmul.u32.u64.low 3817748708, %v739_v1  ;;  %v4645_v18 = vmul.u32.u64.high 3817748708, %v739_v1, %v4644_v17 }
 0x154   : > { %2188 = vrot.lane.b32.xlu1 %v4618_v3, %s3648_s16  ;;  %1670 = vrot.lane.b32.xlu0 %v1513_v5, %s3642_s13 }
 0x158   : > { %2284 = vrot.lane.b32.xlu1 %v1516_v19, %s3650_s29  ;;  %1788 = vrot.lane.b32.xlu0 %v4579_v35, %s3643_s14  ;;  %v4694_v19 = vmul.u32.u64.low 3817748708, %v741_v48  ;;  %v4695_v52 = vmul.u32.u64.high 3817748708, %v741_v48, %v4694_v19 }
 0x15a   : > { %v1053_v0 = vshrl.u32 %v4695_v52, 4 }
 0x15c   : > { %2376 = vrot.lane.b32.xlu1 %v4635_v13, %s3651_s30  ;;  %1869 = vrot.lane.b32.xlu0 %v4557_v22, %s3647_s28  ;;  %v1031_v22 = vshrl.u32 %v4645_v18, 4  ;;  %v1054_v12 = vmul.u32 18, %v1053_v0 }
 0x15e   : > { %v1032_v55 = vmul.u32 18, %v1031_v22  ;;  %v1055_v14 = vsub.s32 %v741_v48, %v1054_v12  ;;  %v4742_v22 = vld [vmem:[#allocation2 + $0x9c] sm:$0xff] }
 0x15f   : > { %v4790_v12 = vld [vmem:[#allocation2 + $0xa2] sm:$0xff] }
 0x160   : > { %2194 = vrot.lane.b32.xlu1 %v4642_v16, %s3648_s16  ;;  %1985 = vrot.lane.b32.xlu0 %v1571_v23, %s3645_s23  ;;  %v1033_v36 = vsub.s32 %v739_v1, %v1032_v55  ;;  %vm1173_vm5 = vcmp.ne.s32.totalorder %v1055_v14, 0  ;;  %vm1209_vm6 = vcmp.lt.s32.totalorder %v1055_v14, 0  ;;  %v1281_v18 = vadd.s32 18, %v1055_v14 }
 0x161   : > { %vm1245_vm14 = vmand %vm1209_vm6, %vm1173_vm5  ;;  %v1064_v55 = vshrl.u32 %v4740_v28, 4  ;;  %vm2476_vm5 = vcmask 130048   ;;  %vm2536_vm6 = vcmask 261120  }
 0x162   : > { %vm1171_vm3 = vcmp.ne.s32.totalorder %v1033_v36, 0  ;;  %vm1207_vm4 = vcmp.lt.s32.totalorder %v1033_v36, 0  ;;  %v1279_v44 = vadd.s32 18, %v1033_v36  ;;  %v1317_v23 = vsel %vm1245_vm14, %v1281_v18, %v1055_v14 }
 0x163   : > { %vm1243_vm7 = vmand %vm1207_vm4, %vm1171_vm3  ;;  %vm1353_vm15 = vcmp.le.s32.totalorder %v1317_v23, 15  ;;  %vm2566_vm14 = vcmask 326656  }
 0x164   : > { %1680 = vrot.lane.b32.xlu1 %v4656_v31, %s3642_s13  ;;  %2101 = vrot.lane.b32.xlu0 %v4567_v43, %s3644_s20  ;;  %v1315_v43 = vsel %vm1243_vm7, %v1279_v44, %v1033_v36  ;;  %v1065_v36 = vmul.u32 18, %v1064_v55 }
 0x165   : > { %vm1351_vm10 = vcmp.le.s32.totalorder %v1315_v43, 15 }
 0x166   : > { %v1387_v41 = vsel %vm1351_vm10, %v702_v42, 0.0 }
 0x167   : > { %1423 = vst.msk [vmem:[%s4131_s19 + $0xc8] sm:$0xff] %vm265_vm0, %v1387_v41  ;;  %1459 = vst.msk [vmem:[#allocation2 + $0xf0] sm:$0xff] %vm265_vm0, %v1387_v41  ;;  %v1066_v41 = vsub.s32 %v742_v20, %v1065_v36  ;;  %v4797_v20 = vld [vmem:[#allocation2 + $0xa4] sm:$0xff]  ;;  %v1575_v36 = vld [vmem:[#allocation2 + $0x96] sm:$0xff] }
 0x168   : > { %1794 = vrot.lane.b32.xlu1 %v4674_v39, %s3643_s14  ;;  %1871 = vrot.lane.b32.xlu0 %v4579_v35, %s3647_s28  ;;  %v3354_v35 = vpop.f32.mrb[26].mxu0 }
 0x169   : > { %v628_v51 = vpop.f32.mrb[27].mxu0  ;;  %vm1174_vm8 = vcmp.ne.s32.totalorder %v1066_v41, 0  ;;  %vm1210_vm3 = vcmp.lt.s32.totalorder %v1066_v41, 0  ;;  %v1282_v50 = vadd.s32 18, %v1066_v41 }
 0x16a   : > { %v629_v58 = vadd.f32 %v4704_v38, %v628_v51  ;;  %v3357_v30 = vpop.f32.mrb[28].mxu0  ;;  %vm1246_vm4 = vmand %vm1210_vm3, %vm1174_vm8  ;;  %vm2626_vm8 = vcmask 457728   ;;  %vm2656_vm3 = vcmask 523264  }
 0x16b   : > { %v638_v34 = vpop.f32.mrb[29].mxu0  ;;  %v1318_v51 = vsel %vm1246_vm4, %v1282_v50, %v1066_v41  ;;  %v4847_v50 = vld [vmem:[#allocation2 + $0x30] sm:$0xff] }
 0x16c   : > { %2286 = vrot.lane.b32.xlu1 %v4685_v2, %s3650_s29  ;;  %1987 = vrot.lane.b32.xlu0 %v1572_v4, %s3645_s23  ;;  %v703_v60 = vmax.f32 %v629_v58, 0.0  ;;  %v639_v4 = vadd.f32 %v4704_v38, %v638_v34  ;;  %vm1354_vm7 = vcmp.le.s32.totalorder %v1318_v51, 15 }
 0x16e   : > { %v4697_v54 = vpop.permute.xlu1 %1652  ;;  %v4699_v56 = vpop.permute.xlu0 %1650  ;;  %v1388_v1 = vsel %vm1352_vm11, %v703_v60, 0.0  ;;  %v705_v48 = vmax.f32 %v639_v4, 0.0  ;;  %vm2506_vm11 = vcmask 195584  }
 0x16f   : > { %5945 = vst [vmem:[#allocation10_spill] sm:$0xff] %v4697_v54  ;;  %5946 = vst [vmem:[#allocation11_spill] sm:$0xff] %v4699_v56 }
 0x170   : > { %2378 = vrot.lane.b32.xlu1 %v4674_v39, %s3651_s30  ;;  %2107 = vrot.lane.b32.xlu0 %v4585_v40, %s3644_s20  ;;  %v634_v40 = vadd.f32 %v4704_v38, %v3354_v35  ;;  %1424 = vst.msk [vmem:[%s4131_s19 + $0xd0] sm:$0xff] %vm265_vm0, %v1388_v1  ;;  %1460 = vst.msk [vmem:[#allocation2 + $0xf8] sm:$0xff] %vm265_vm0, %v1388_v1  ;;  %v1390_v60 = vsel %vm1354_vm7, %v705_v48, 0.0 }
 0x171   : > { %1426 = vst.msk [vmem:[%s4131_s19 + $0xe0] sm:$0xff] %vm265_vm0, %v1390_v60  ;;  %1462 = vst.msk [vmem:[#allocation2 + $0x108] sm:$0xff] %vm265_vm0, %v1390_v60  ;;  %v745_v60 = vadd.s32 248, %v3798_v47 }
 0x172   : > { %v4712_v5 = vpop.permute.xlu1 %1766  ;;  %v4714_v7 = vpop.permute.xlu0 %1768 }
 0x173   : > { %5947 = vst [vmem:[#allocation12_spill] sm:$0xff] %v4712_v5  ;;  %5948 = vst [vmem:[#allocation13_spill] sm:$0xff] %v4714_v7 }
 0x174   : > { %2192 = vrot.lane.b32.xlu1 %v4716_v9, %s3648_s16  ;;  %1674 = vrot.lane.b32.xlu0 %v4606_v61, %s3642_s13  ;;  %v704_v61 = vmax.f32 %v634_v40, 0.0  ;;  %v1574_v40 = vld [vmem:[#allocation2 + $0x8e] sm:$0xff] }
 0x176   : > { %v4726_v8 = vpop.permute.xlu1 %1656  ;;  %v4728_v17 = vpop.permute.xlu0 %1654  ;;  %v1389_v29 = vsel %vm1353_vm15, %v704_v61, 0.0  ;;  %vm2596_vm15 = vcmask 392192  }
 0x177   : > { %1425 = vst.msk [vmem:[%s4131_s19 + $0xd8] sm:$0xff] %vm265_vm0, %v1389_v29  ;;  %1461 = vst.msk [vmem:[#allocation2 + $0x100] sm:$0xff] %vm265_vm0, %v1389_v29  ;;  %v4808_v29 = vld [vmem:[#allocation2 + $0xa8] sm:$0xff]  ;;  %v1600_v5 = vld [vmem:[#allocation2 + $0xf2] sm:$0xff] }
 0x178   : > { %2288 = vrot.lane.b32.xlu1 %v4656_v31, %s3650_s29  ;;  %1792 = vrot.lane.b32.xlu0 %v4635_v13, %s3643_s14 }
 0x17a   : > { %v4735_v21 = vpop.permute.xlu1 %1770  ;;  %v4737_v53 = vpop.permute.xlu0 %1772 }
 0x17c   : > { %2380 = vrot.lane.b32.xlu1 %v4742_v22, %s3651_s30  ;;  %1873 = vrot.lane.b32.xlu0 %v4601_v57, %s3647_s28  ;;  %v743_v57 = vadd.s32 232, %v3798_v47 }
 0x17e   : > { %v4751_v31 = vpop.permute.xlu1 %1660  ;;  %v4753_v59 = vpop.permute.xlu0 %1658  ;;  %v4766_v43 = vmul.u32.u64.low 3817748708, %v743_v57  ;;  %v4767_v45 = vmul.u32.u64.high 3817748708, %v743_v57, %v4766_v43 }
 0x17f   : > { %v744_v43 = vadd.s32 240, %v3798_v47 }
 0x180   : > { %1796 = vrot.lane.b32.xlu1 %v4742_v22, %s3643_s14  ;;  %1989 = vrot.lane.b32.xlu0 %v1573_v32, %s3645_s23  ;;  %v1075_v52 = vshrl.u32 %v4767_v45, 4 }
 0x181   : > { %v4837_v45 = vmul.u32.u64.low 3817748708, %v744_v43  ;;  %v4838_v4 = vmul.u32.u64.high 3817748708, %v744_v43, %v4837_v45 }
 0x182   : > { %v4762_v42 = vpop.permute.xlu1 %1774  ;;  %v4764_v44 = vpop.permute.xlu0 %1776  ;;  %v1076_v58 = vmul.u32 18, %v1075_v52  ;;  %v1522_v45 = vld [vmem:[#allocation2 + $0xba] sm:$0xff] }
 0x183   : > { %v1086_v52 = vshrl.u32 %v4838_v4, 4 }
 0x184   : > { %2198 = vrot.lane.b32.xlu1 %v4760_v26, %s3648_s16  ;;  %2105 = vrot.lane.b32.xlu0 %v4618_v3, %s3644_s20  ;;  %v644_v3 = vadd.f32 %v4704_v38, %v3357_v30  ;;  %v1077_v62 = vsub.s32 %v743_v57, %v1076_v58  ;;  %v4823_v57 = vld [vmem:[#allocation2 + $0xac] sm:$0xff]  ;;  %v1576_v58 = vld [vmem:[#allocation2 + $0x9e] sm:$0xff] }
 0x186   : > { %v4774_v35 = vpop.permute.xlu1 %1664  ;;  %v4776_v19 = vpop.permute.xlu0 %2095  ;;  %vm1175_vm10 = vcmp.ne.s32.totalorder %v1077_v62, 0  ;;  %vm1211_vm12 = vcmp.lt.s32.totalorder %v1077_v62, 0  ;;  %v1283_v1 = vadd.s32 18, %v1077_v62 }
 0x187   : > { %vm1247_vm13 = vmand %vm1211_vm12, %vm1175_vm10  ;;  %vm2702_vm12 = vcmask 588800  }
 0x188   : > { %1684 = vrot.lane.b32.xlu1 %v1520_v15, %s3642_s13  ;;  %1875 = vrot.lane.b32.xlu0 %v4635_v13, %s3647_s28  ;;  %v706_v13 = vmax.f32 %v644_v3, 0.0  ;;  %v1319_v18 = vsel %vm1247_vm13, %v1283_v1, %v1077_v62 }
 0x189   : > { %vm1355_vm2 = vcmp.le.s32.totalorder %v1319_v18, 15 }
 0x18a   : > { %v4786_v63 = vpop.permute.xlu1 %1778  ;;  %v4788_v0 = vpop.permute.xlu0 %1662  ;;  %v1391_v23 = vsel %vm1355_vm2, %v706_v13, 0.0 }
 0x18b   : > { %1427 = vst.msk [vmem:[%s4131_s19 + $0xe8] sm:$0xff] %vm265_vm0, %v1391_v23  ;;  %1463 = vst.msk [vmem:[#allocation2 + $0x110] sm:$0xff] %vm265_vm0, %v1391_v23 }
 0x18c   : > { %2290 = vrot.lane.b32.xlu1 %v4790_v12, %s3650_s29  ;;  %1991 = vrot.lane.b32.xlu0 %v1574_v40, %s3645_s23  ;;  %v3360_v40 = vpop.f32.mrb[30].mxu0 }
 0x18d   : > { %v648_v1 = vpop.f32.mrb[31].mxu0 }
 0x18e   : > { %v1978_v14 = vpop.permute.xlu1 %1977  ;;  %v4795_v61 = vpop.permute.xlu0 %1780 }
 0x190   : > { %2382 = vrot.lane.b32.xlu1 %v4797_v20, %s3651_s30  ;;  %2111 = vrot.lane.b32.xlu0 %v4642_v16, %s3644_s20 }
 0x192   : > { %v4806_v27 = vpop.permute.xlu1 %1668  ;;  %v1862_v28 = vpop.permute.xlu0 %1861 }
 0x194   : > { %2196 = vrot.lane.b32.xlu1 %v4808_v29, %s3648_s16  ;;  %1678 = vrot.lane.b32.xlu0 %v4685_v2, %s3642_s13 }
 0x196   : > { %v4814_v55 = vpop.permute.xlu1 %1782  ;;  %v2094_v32 = vpop.permute.xlu0 %2093 }
 0x198   : > { %2292 = vrot.lane.b32.xlu1 %v1520_v15, %s3650_s29  ;;  %1877 = vrot.lane.b32.xlu0 %v4674_v39, %s3647_s28  ;;  %v1494_v39 = vld [vmem:[#allocation2 + $0xc0] sm:$0xff] }
 0x19a   : > { %v4819_v16 = vpop.permute.xlu1 %2186  ;;  %v4821_v30 = vpop.permute.xlu0 %1863 }
 0x19c   : > { %2384 = vrot.lane.b32.xlu1 %v4823_v57, %s3651_s30  ;;  %1993 = vrot.lane.b32.xlu0 %v1575_v36, %s3645_s23  ;;  %v649_v36 = vadd.f32 %v4704_v38, %v648_v1 }
 0x19e   : > { %v4828_v2 = vpop.permute.xlu1 %1672  ;;  %v4830_v34 = vpop.permute.xlu0 %1979 }
 0x1a0   : > { %1800 = vrot.lane.b32.xlu1 %v4823_v57, %s3643_s14  ;;  %2109 = vrot.lane.b32.xlu0 %v4716_v9, %s3644_s20  ;;  %v2453_v9 = vsel %vm265_vm0, %v4847_v50, %v4728_v17  ;;  %v4861_v17 = vmul.u32.u64.low 3817748708, %v745_v60  ;;  %v4862_v13 = vmul.u32.u64.high 3817748708, %v745_v60, %v4861_v17 }
 0x1a1   : > { %v2483_v3 = vsel %vm2476_vm5, %v2453_v9, %v4735_v21 }
 0x1a2   : > { %v4840_v41 = vpop.permute.xlu1 %1786  ;;  %v4842_v48 = vpop.permute.xlu0 %2099  ;;  %v2513_v62 = vsel %vm2506_vm11, %v2483_v3, %v1862_v28  ;;  %v1097_v9 = vshrl.u32 %v4862_v13, 4 }
 0x1a3   : > { %v2543_v28 = vsel %vm2536_vm6, %v2513_v62, %v1978_v14  ;;  %v4878_v62 = vld [vmem:[#allocation2 + $0xb2] sm:$0xff] }
 0x1a4   : > { %2202 = vrot.lane.b32.xlu1 %v1494_v39, %s3648_s16  ;;  %1879 = vrot.lane.b32.xlu0 %v4742_v22, %s3647_s28  ;;  %v1087_v22 = vmul.u32 18, %v1086_v52  ;;  %v1098_v17 = vmul.u32 18, %v1097_v9 }
 0x1a6   : > { %v2185_v51 = vpop.permute.xlu1 %2184  ;;  %v4853_v15 = vpop.permute.xlu0 %1666  ;;  %v1088_v18 = vsub.s32 %v744_v43, %v1087_v22  ;;  %v707_v43 = vmax.f32 %v649_v36, 0.0  ;;  %v1099_v13 = vsub.s32 %v745_v60, %v1098_v17 }
 0x1a8   : > { %2119 = vrot.lane.b32.xlu1 %v1494_v39, %s3644_s20  ;;  %1995 = vrot.lane.b32.xlu0 %v1576_v58, %s3645_s23  ;;  %vm1176_vm4 = vcmp.ne.s32.totalorder %v1088_v18, 0  ;;  %v2573_v39 = vsel %vm2566_vm14, %v2543_v28, %v2094_v32  ;;  %vm1212_vm7 = vcmp.lt.s32.totalorder %v1088_v18, 0  ;;  %v1284_v4 = vadd.s32 18, %v1088_v18 }
 0x1a9   : > { %v2603_v52 = vsel %vm2596_vm15, %v2573_v39, %v2185_v51  ;;  %vm1248_vm10 = vmand %vm1212_vm7, %vm1176_vm4  ;;  %vm1177_vm2 = vcmp.ne.s32.totalorder %v1099_v13, 0  ;;  %vm1213_vm4 = vcmp.lt.s32.totalorder %v1099_v13, 0  ;;  %v4901_v39 = vld [vmem:[#allocation2 + $0x38] sm:$0xff] }
 0x1aa   : > { %v2281_v21 = vpop.permute.xlu1 %2280  ;;  %v4864_v23 = vpop.permute.xlu0 %1784  ;;  %v1320_v32 = vsel %vm1248_vm10, %v1284_v4, %v1088_v18  ;;  %vm1249_vm7 = vmand %vm1213_vm4, %vm1177_vm2  ;;  %v1577_v4 = vld [vmem:[#allocation2 + $0xa6] sm:$0xff]  ;;  %v2454_v9 = vsel %vm265_vm0, %v4901_v39, %v4726_v8 }
 0x1ab   : > { %v2633_v14 = vsel %vm2626_vm8, %v2603_v52, %v2281_v21  ;;  %vm1356_vm13 = vcmp.le.s32.totalorder %v1320_v32, 15 }
 0x1ac   : > { %1688 = vrot.lane.b32.xlu1 %v1522_v45, %s3642_s13  ;;  %2115 = vrot.lane.b32.xlu0 %v4760_v26, %s3644_s20  ;;  %v654_v26 = vadd.f32 %v4704_v38, %v3360_v40  ;;  %v1392_v51 = vsel %vm1356_vm13, %v707_v43, 0.0  ;;  %v4893_v40 = vld [vmem:[#allocation2 + $0xb4] sm:$0xff] }
 0x1ad   : > { %1428 = vst.msk [vmem:[%s4131_s19 + $0xf0] sm:$0xff] %vm265_vm0, %v1392_v51  ;;  %1464 = vst.msk [vmem:[#allocation2 + $0x118] sm:$0xff] %vm265_vm0, %v1392_v51  ;;  %v4903_v43 = vld [vmem:[#allocation2 + $0xb8] sm:$0xff] }
 0x1ae   : > { %v2373_v3 = vpop.permute.xlu1 %2372  ;;  %v4875_v58 = vpop.permute.xlu0 %1865  ;;  %v708_v21 = vmax.f32 %v654_v26, 0.0  ;;  %v4929_v51 = vld [vmem:[#allocation2 + $0xbc] sm:$0xff] }
 0x1af   : > { %v2663_v22 = vsel %vm2656_vm3, %v2633_v14, %v2373_v3  ;;  %v2484_v14 = vsel %vm2476_vm5, %v2454_v9, %v4737_v53 }
 0x1b0   : > { %2294 = vrot.lane.b32.xlu1 %v4878_v62, %s3650_s29  ;;  %1682 = vrot.lane.b32.xlu0 %v4790_v12, %s3642_s13  ;;  %v1285_v12 = vadd.s32 18, %v1099_v13  ;;  %v2514_v3 = vsel %vm2506_vm11, %v2484_v14, %v4821_v30 }
 0x1b1   : > { %3404 = vmatmul.mubr.msk.f32.vlgmr.msra.gmra.mrb[0].mxu1 %vm2702_vm12, %v2663_v22  ;;  %v2544_v8 = vsel %vm2536_vm6, %v2514_v3, %v4830_v34 }
 0x1b2   : > { %v4889_v1 = vpop.permute.xlu1 %2190  ;;  %v1982_v18 = vpop.permute.xlu0 %1981  ;;  %3406 = vmatprep.mubr.msk.f32.mxu1 %vm3649_vm9, %v5862_v6  ;;  %v1321_v60 = vsel %vm1249_vm7, %v1285_v12, %v1099_v13  ;;  %v2574_v26 = vsel %vm2566_vm14, %v2544_v8, %v4776_v19  ;;  %v1578_v13 = vld [vmem:[#allocation2 + $0xae] sm:$0xff]  ;;  %v1580_v12 = vld [vmem:[#allocation2 + $0xbe] sm:$0xff] }
 0x1b3   : > { %vm1357_vm10 = vcmp.le.s32.totalorder %v1321_v60, 15  ;;  %v2604_v30 = vsel %vm2596_vm15, %v2574_v26, %v4819_v16  ;;  %v4949_v16 = vld [vmem:[#allocation2 + $0x40] sm:$0xff] }
 0x1b4   : > { %2386 = vrot.lane.b32.xlu1 %v4893_v40, %s3651_s30  ;;  %1881 = vrot.lane.b32.xlu0 %v4797_v20, %s3647_s28  ;;  %v1393_v52 = vsel %vm1357_vm10, %v708_v21, 0.0  ;;  %v2455_v60 = vsel %vm265_vm0, %v4949_v16, %v4753_v59 }
 0x1b5   : > { %1429 = vst.msk [vmem:[%s4131_s19 + $0xf8] sm:$0xff] %vm265_vm0, %v1393_v52  ;;  %1465 = vst.msk [vmem:[#allocation2 + $0x120] sm:$0xff] %vm265_vm0, %v1393_v52  ;;  %v1496_v52 = vld [vmem:[#allocation2 + $0xd0] sm:$0xff] }
 0x1b6   : > { %v4899_v36 = vpop.permute.xlu1 %1676  ;;  %v2098_v28 = vpop.permute.xlu0 %2097 }
 0x1b8   : > { %2200 = vrot.lane.b32.xlu1 %v4903_v43, %s3648_s16  ;;  %1997 = vrot.lane.b32.xlu0 %v1577_v4, %s3645_s23  ;;  %v2485_v4 = vsel %vm2476_vm5, %v2455_v60, %v4762_v42  ;;  %v1523_v60 = vld [vmem:[#allocation2 + $0xc2] sm:$0xff] }
 0x1b9   : > { %v2515_v9 = vsel %vm2506_vm11, %v2485_v4, %v4875_v58 }
 0x1ba   : > { %v4918_v32 = vpop.permute.xlu1 %1790  ;;  %v4920_v22 = vpop.permute.xlu0 %1867  ;;  %v2545_v8 = vsel %vm2536_vm6, %v2515_v9, %v1982_v18 }
 0x1bb   : > { %v2575_v26 = vsel %vm2566_vm14, %v2545_v8, %v2098_v28 }
 0x1bc   : > { %2296 = vrot.lane.b32.xlu1 %v1522_v45, %s3650_s29  ;;  %2113 = vrot.lane.b32.xlu0 %v4808_v29, %s3644_s20 }
 0x1be   : > { %v2283_v17 = vpop.permute.xlu1 %2282  ;;  %v1984_v53 = vpop.permute.xlu0 %1983 }
 0x1bf   : > { %v2634_v34 = vsel %vm2626_vm8, %v2604_v30, %v2283_v17  ;;  %v1579_v30 = vld [vmem:[#allocation2 + $0xb6] sm:$0xff] }
 0x1c0   : > { %2388 = vrot.lane.b32.xlu1 %v4929_v51, %s3651_s30  ;;  %1883 = vrot.lane.b32.xlu0 %v4823_v57, %s3647_s28 }
 0x1c2   : > { %v2375_v45 = vpop.permute.xlu1 %2374  ;;  %v4938_v29 = vpop.permute.xlu0 %2103 }
 0x1c3   : > { %v2664_v19 = vsel %vm2656_vm3, %v2634_v34, %v2375_v45  ;;  %v746_v34 = vadd.s32 256, %v3798_v47 }
 0x1c4   : > { %1887 = vrot.lane.b32.xlu1 %v4929_v51, %s3647_s28  ;;  %1999 = vrot.lane.b32.xlu0 %v1578_v13, %s3645_s23 }
 0x1c5   : > { %3407 = vmatmul.mubr.msk.f32.gmra.mrb[2].mxu1 %vm2702_vm12, %v2664_v19 }
 0x1c6   : > { %v2189_v21 = vpop.permute.xlu1 %2188  ;;  %v4945_v57 = vpop.permute.xlu0 %1670  ;;  %3409 = vmatprep.mubr.msk.f32.mxu1 %vm3649_vm9, %v5862_v6 }
 0x1c7   : > { %v2605_v59 = vsel %vm2596_vm15, %v2575_v26, %v2189_v21  ;;  %v4990_v13 = vmul.u32.u64.low 3817748708, %v746_v34  ;;  %v4991_v21 = vmul.u32.u64.high 3817748708, %v746_v34, %v4990_v13 }
 0x1c8   : > { %2003 = vrot.lane.b32.xlu1 %v1580_v12, %s3645_s23  ;;  %1798 = vrot.lane.b32.xlu0 %v4797_v20, %s3643_s14  ;;  %v4993_v12 = vld [vmem:[#allocation2 + $0x48] sm:$0xff] }
 0x1c9   : > { %v2456_v4 = vsel %vm265_vm0, %v4993_v12, %v4751_v31  ;;  %v1108_v26 = vshrl.u32 %v4991_v21, 4  ;;  %v5011_v31 = vld [vmem:[#allocation2 + $0xc4] sm:$0xff] }
 0x1ca   : > { %v2285_v14 = vpop.permute.xlu1 %2284  ;;  %v4961_v3 = vpop.permute.xlu0 %1788  ;;  %v1495_v13 = vld [vmem:[#allocation2 + $0xc8] sm:$0xff] }
 0x1cb   : > { %v2635_v42 = vsel %vm2626_vm8, %v2605_v59, %v2285_v14 }
 0x1cc   : > { %2206 = vrot.lane.b32.xlu1 %v1496_v52, %s3648_s16  ;;  %1686 = vrot.lane.b32.xlu0 %v4878_v62, %s3642_s13  ;;  %v1524_v62 = vld [vmem:[#allocation2 + $0xca] sm:$0xff] }
 0x1ce   : > { %v2377_v20 = vpop.permute.xlu1 %2376  ;;  %v4970_v17 = vpop.permute.xlu0 %1869 }
 0x1cf   : > { %v2665_v58 = vsel %vm2656_vm3, %v2635_v42, %v2377_v20  ;;  %v747_v42 = vadd.s32 264, %v3798_v47 }
 0x1d0   : > { %2123 = vrot.lane.b32.xlu1 %v1496_v52, %s3644_s20  ;;  %1885 = vrot.lane.b32.xlu0 %v4893_v40, %s3647_s28  ;;  %v2486_v52 = vsel %vm2476_vm5, %v2456_v4, %v4764_v44  ;;  %v1109_v44 = vmul.u32 18, %v1108_v26 }
 0x1d1   : > { %3410 = vmatmul.mubr.msk.f32.gmra.mrb[4].mxu1 %vm2702_vm12, %v2665_v58  ;;  %v2516_v9 = vsel %vm2506_vm11, %v2486_v52, %v4920_v22 }
 0x1d2   : > { %v4977_v18 = vpop.permute.xlu1 %2194  ;;  %v4979_v28 = vpop.permute.xlu0 %1985  ;;  %3412 = vmatprep.mubr.msk.f32.mxu1 %vm3649_vm9, %v5862_v6  ;;  %v2546_v59 = vsel %vm2536_vm6, %v2516_v9, %v1984_v53  ;;  %v1110_v53 = vsub.s32 %v746_v34, %v1109_v44 }
 0x1d3   : > { %v2576_v20 = vsel %vm2566_vm14, %v2546_v59, %v4842_v48 }
 0x1d4   : > { %1692 = vrot.lane.b32.xlu1 %v1524_v62, %s3642_s13  ;;  %2001 = vrot.lane.b32.xlu0 %v1579_v30, %s3645_s23  ;;  %v3363_v21 = vpop.f32.mrb[32].mxu0  ;;  %vm1178_vm13 = vcmp.ne.s32.totalorder %v1110_v53, 0  ;;  %vm1214_vm2 = vcmp.lt.s32.totalorder %v1110_v53, 0  ;;  %v1286_v9 = vadd.s32 18, %v1110_v53 }
 0x1d5   : > { %v658_v4 = vpop.f32.mrb[33].mxu0  ;;  %vm1250_vm4 = vmand %vm1214_vm2, %vm1178_vm13 }
 0x1d6   : > { %v4986_v45 = vpop.permute.xlu1 %1680  ;;  %v4988_v19 = vpop.permute.xlu0 %2101  ;;  %v659_v48 = vadd.f32 %v4704_v38, %v658_v4  ;;  %v1322_v54 = vsel %vm1250_vm4, %v1286_v9, %v1110_v53  ;;  %v5949_v53 = vmov 0.0   ;;  %v1525_v9 = vld [vmem:[#allocation2 + $0xd2] sm:$0xff] }
 0x1d7   : > { %vm1358_vm7 = vcmp.le.s32.totalorder %v1322_v54, 15  ;;  %v5051_v54 = vld [vmem:[#allocation2 + $0xcc] sm:$0xff] }
 0x1d8   : > { %2298 = vrot.lane.b32.xlu1 %v1523_v60, %s3650_s29  ;;  %2117 = vrot.lane.b32.xlu0 %v4903_v43, %s3644_s20  ;;  %v5017_v43 = vmul.u32.u64.low 3817748708, %v747_v42  ;;  %v5018_v22 = vmul.u32.u64.high 3817748708, %v747_v42, %v5017_v43  ;;  %v709_v7 = vmax.f32 %v659_v48, 0.0 }
 0x1d9   : > { %v1581_v43 = vld [vmem:[#allocation2 + $0xc6] sm:$0xff] }
 0x1da   : > { %v5005_v14 = vpop.permute.xlu1 %1794  ;;  %v5007_v8 = vpop.permute.xlu0 %1871  ;;  %v1119_v52 = vshrl.u32 %v5018_v22, 4  ;;  %v5038_v22 = vld [vmem:[#allocation2 + $0x50] sm:$0xff] }
 0x1db   : > { %v2457_v4 = vsel %vm265_vm0, %v5038_v22, %v4788_v0 }
 0x1dc   : > { %2390 = vrot.lane.b32.xlu1 %v5011_v31, %s3651_s30  ;;  %1690 = vrot.lane.b32.xlu0 %v1523_v60, %s3642_s13  ;;  %v2606_v60 = vsel %vm2596_vm15, %v2576_v20, %v4889_v1  ;;  %v1120_v6 = vmul.u32 18, %v1119_v52  ;;  %v664_v1 = vadd.f32 %v4704_v38, %v3363_v21 }
 0x1de   : > { %v2287_v58 = vpop.permute.xlu1 %2286  ;;  %v5022_v30 = vpop.permute.xlu0 %1987  ;;  %v1121_v20 = vsub.s32 %v747_v42, %v1120_v6  ;;  %v710_v6 = vmax.f32 %v664_v1, 0.0 }
 0x1df   : > { %v2636_v34 = vsel %vm2626_vm8, %v2606_v60, %v2287_v58  ;;  %v1394_v58 = vsel %vm1358_vm7, %v709_v7, 0.0  ;;  %v2487_v7 = vsel %vm2476_vm5, %v2457_v4, %v4786_v63  ;;  %v1526_v4 = vld [vmem:[#allocation2 + $0xda] sm:$0xff] }
 0x1e0   : > { %2204 = vrot.lane.b32.xlu1 %v1495_v13, %s3648_s16  ;;  %1889 = vrot.lane.b32.xlu0 %v5011_v31, %s3647_s28  ;;  %1430 = vst.msk [vmem:[%s4131_s19 + $0x100] sm:$0xff] %vm265_vm0, %v1394_v58  ;;  %1466 = vst.msk [vmem:[#allocation2 + $0x128] sm:$0xff] %vm265_vm0, %v1394_v58  ;;  %vm1179_vm10 = vcmp.ne.s32.totalorder %v1121_v20, 0  ;;  %vm1215_vm13 = vcmp.lt.s32.totalorder %v1121_v20, 0  ;;  %v1287_v38 = vadd.s32 18, %v1121_v20  ;;  %v2517_v0 = vsel %vm2506_vm11, %v2487_v7, %v4970_v17  ;;  %v5085_v58 = vld [vmem:[#allocation2 + $0xe0] sm:$0xff] }
 0x1e1   : > { %vm1251_vm2 = vmand %vm1215_vm13, %vm1179_vm10  ;;  %v2547_v48 = vsel %vm2536_vm6, %v2517_v0, %v4979_v28  ;;  %v5094_v7 = vld [vmem:[#allocation2 + $0x58] sm:$0xff] }
 0x1e2   : > { %v2379_v26 = vpop.permute.xlu1 %2378  ;;  %v5032_v59 = vpop.permute.xlu0 %2107  ;;  %v1323_v21 = vsel %vm1251_vm2, %v1287_v38, %v1121_v20  ;;  %v5092_v38 = vld [vmem:[#allocation2 + $0xdc] sm:$0xff]  ;;  %v2458_v0 = vsel %vm265_vm0, %v5094_v7, %v4774_v35 }
 0x1e3   : > { %v2666_v44 = vsel %vm2656_vm3, %v2636_v34, %v2379_v26  ;;  %vm1359_vm4 = vcmp.le.s32.totalorder %v1323_v21, 15 }
 0x1e4   : > { %2300 = vrot.lane.b32.xlu1 %v1524_v62, %s3650_s29  ;;  %2005 = vrot.lane.b32.xlu0 %v1581_v43, %s3645_s23  ;;  %v1395_v63 = vsel %vm1359_vm4, %v710_v6, 0.0  ;;  %v1582_v43 = vld [vmem:[#allocation2 + $0xce] sm:$0xff] }
 0x1e5   : > { %3413 = vmatmul.mubr.msk.f32.gmra.mrb[6].mxu1 %vm2702_vm12, %v2666_v44  ;;  %1431 = vst.msk [vmem:[%s4131_s19 + $0x108] sm:$0xff] %vm265_vm0, %v1395_v63  ;;  %1467 = vst.msk [vmem:[#allocation2 + $0x130] sm:$0xff] %vm265_vm0, %v1395_v63 }
 0x1e6   : > { %v2193_v60 = vpop.permute.xlu1 %2192  ;;  %v5044_v52 = vpop.permute.xlu0 %1674  ;;  %3415 = vmatprep.mubr.msk.f32.mxu1 %vm3649_vm9, %v5949_v53 }
 0x1e8   : > { %2392 = vrot.lane.b32.xlu1 %v5051_v54, %s3651_s30  ;;  %2121 = vrot.lane.b32.xlu0 %v1495_v13, %s3644_s20  ;;  %v2577_v13 = vsel %vm2566_vm14, %v2547_v48, %v4988_v19  ;;  %v5075_v19 = vld [vmem:[#allocation2 + $0xd8] sm:$0xff] }
 0x1e9   : > { %v2607_v17 = vsel %vm2596_vm15, %v2577_v13, %v2193_v60 }
 0x1ea   : > { %v2289_v62 = vpop.permute.xlu1 %2288  ;;  %v5060_v42 = vpop.permute.xlu0 %1792 }
 0x1eb   : > { %v2637_v34 = vsel %vm2626_vm8, %v2607_v17, %v2289_v62  ;;  %v2488_v62 = vsel %vm2476_vm5, %v2458_v0, %v4795_v61  ;;  %v1527_v17 = vld [vmem:[#allocation2 + $0xe2] sm:$0xff] }
 0x1ec   : > { %1891 = vrot.lane.b32.xlu1 %v5051_v54, %s3647_s28  ;;  %1694 = vrot.lane.b32.xlu0 %v1525_v9, %s3642_s13  ;;  %v2518_v21 = vsel %vm2506_vm11, %v2488_v62, %v5007_v8  ;;  %v5120_v8 = vld [vmem:[#allocation2 + $0xe8] sm:$0xff]  ;;  %v5135_v0 = vld [vmem:[#allocation2 + $0x60] sm:$0xff] }
 0x1ed   : > { %v2548_v63 = vsel %vm2536_vm6, %v2518_v21, %v5022_v30 }
 0x1ee   : > { %v2381_v28 = vpop.permute.xlu1 %2380  ;;  %v1874_v26 = vpop.permute.xlu0 %1873  ;;  %v2578_v35 = vsel %vm2566_vm14, %v2548_v63, %v4938_v29  ;;  %v5144_v63 = vld [vmem:[#allocation2 + $0xe4] sm:$0xff] }
 0x1ef   : > { %v2667_v44 = vsel %vm2656_vm3, %v2637_v34, %v2381_v28  ;;  %v5118_v28 = vld [vmem:[#allocation2 + $0xd4] sm:$0xff]  ;;  %v2608_v30 = vsel %vm2596_vm15, %v2578_v35, %v4977_v18  ;;  %v2459_v18 = vsel %vm265_vm0, %v5135_v0, %v4853_v15  ;;  %v5146_v35 = vld [vmem:[#allocation2 + $0xec] sm:$0xff] }
 0x1f0   : > { %2007 = vrot.lane.b32.xlu1 %v1582_v43, %s3645_s23  ;;  %2208 = vrot.lane.b32.xlu0 %v5075_v19, %s3648_s16 }
 0x1f1   : > { %3416 = vmatmul.mubr.msk.f32.gmra.mrb[8].mxu1 %vm2702_vm12, %v2667_v44 }
 0x1f2   : > { %v5081_v1 = vpop.permute.xlu1 %1796  ;;  %v1990_v20 = vpop.permute.xlu0 %1989  ;;  %3418 = vmatprep.mubr.msk.f32.mxu1 %vm3649_vm9, %v5949_v53 }
 0x1f4   : > { %2210 = vrot.lane.b32.xlu1 %v5085_v58, %s3648_s16  ;;  %2304 = vrot.lane.b32.xlu0 %v1526_v4, %s3650_s29 }
 0x1f6   : > { %v5090_v60 = vpop.permute.xlu1 %2198  ;;  %v2106_v6 = vpop.permute.xlu0 %2105 }
 0x1f8   : > { %1696 = vrot.lane.b32.xlu1 %v1526_v4, %s3642_s13  ;;  %2396 = vrot.lane.b32.xlu0 %v5092_v38, %s3651_s30  ;;  %v1599_v4 = vld [vmem:[#allocation2 + $0xea] sm:$0xff] }
 0x1fa   : > { %v5106_v48 = vpop.permute.xlu1 %1684  ;;  %v5108_v13 = vpop.permute.xlu0 %1875 }
 0x1fc   : > { %2302 = vrot.lane.b32.xlu1 %v1525_v9, %s3650_s29  ;;  %1698 = vrot.lane.b32.xlu0 %v1527_v17, %s3642_s13 }
 0x1fe   : > { %v2291_v34 = vpop.permute.xlu1 %2290  ;;  %v5116_v61 = vpop.permute.xlu0 %1991 }
 0x1ff   : > { %v2638_v9 = vsel %vm2626_vm8, %v2608_v30, %v2291_v34 }
 0x200   : > { %2394 = vrot.lane.b32.xlu1 %v5118_v28, %s3651_s30  ;;  %2212 = vrot.lane.b32.xlu0 %v5120_v8, %s3648_s16 }
 0x202   : > { %v2383_v44 = vpop.permute.xlu1 %2382  ;;  %v5129_v29 = vpop.permute.xlu0 %2111 }
 0x203   : > { %v2668_v43 = vsel %vm2656_vm3, %v2638_v9, %v2383_v44  ;;  %v5158_v44 = vld [vmem:[#allocation2 + $0xf0] sm:$0xff] }
 0x204   : > { %2306 = vrot.lane.b32.xlu1 %v1527_v17, %s3650_s29  ;;  %2308 = vrot.lane.b32.xlu0 %v1599_v4, %s3650_s29  ;;  %v2489_v17 = vsel %vm2476_vm5, %v2459_v18, %v4814_v55 }
 0x205   : > { %3419 = vmatmul.mubr.msk.f32.gmra.mrb[10].mxu1 %vm2702_vm12, %v2668_v43  ;;  %v2519_v15 = vsel %vm2506_vm11, %v2489_v17, %v1874_v26 }
 0x206   : > { %v2197_v62 = vpop.permute.xlu1 %2196  ;;  %v5140_v21 = vpop.permute.xlu0 %1678  ;;  %3421 = vmatprep.mubr.msk.f32.mxu1 %vm3649_vm9, %v5949_v53  ;;  %v2549_v9 = vsel %vm2536_vm6, %v2519_v15, %v1990_v20 }
 0x207   : > { %v2579_v43 = vsel %vm2566_vm14, %v2549_v9, %v2106_v6 }
 0x208   : > { %2398 = vrot.lane.b32.xlu1 %v5144_v63, %s3651_s30  ;;  %2400 = vrot.lane.b32.xlu0 %v5146_v35, %s3651_s30  ;;  %v2609_v4 = vsel %vm2596_vm15, %v2579_v43, %v2197_v62  ;;  %v1583_v62 = vld [vmem:[#allocation2 + $0xd6] sm:$0xff] }
 0x209   : > { %v5193_v43 = vld [vmem:[#allocation2 + $0xf8] sm:$0xff] }
 0x20a   : > { %v2293_v34 = vpop.permute.xlu1 %2292  ;;  %v5155_v30 = vpop.permute.xlu0 %1877 }
 0x20b   : > { %v2639_v55 = vsel %vm2626_vm8, %v2609_v4, %v2293_v34  ;;  %v5195_v4 = vld [vmem:[#allocation2 + $0x68] sm:$0xff] }
 0x20c   : > { %2214 = vrot.lane.b32.xlu1 %v5158_v44, %s3648_s16  ;;  %1802 = vrot.lane.b32.xlu0 %v4893_v40, %s3643_s14  ;;  %v5176_v40 = vld [vmem:[#allocation2 + $0xf4] sm:$0xff] }
 0x20e   : > { %v2385_v26 = vpop.permute.xlu1 %2384  ;;  %v1994_v18 = vpop.permute.xlu0 %1993 }
 0x20f   : > { %v2669_v17 = vsel %vm2656_vm3, %v2639_v55, %v2385_v26  ;;  %v2460_v55 = vsel %vm265_vm0, %v5195_v4, %v4806_v27  ;;  %v3599_v26 = vld [vmem:[#allocation2 + $0x24] sm:$0xff]  ;;  %v1601_v27 = vld [vmem:[#allocation2 + $0xfa] sm:$0xff] }
 0x210   : > { %2310 = vrot.lane.b32.xlu1 %v1600_v5, %s3650_s29  ;;  %1893 = vrot.lane.b32.xlu0 %v5118_v28, %s3647_s28 }
 0x211   : > { %3422 = vmatmul.mubr.msk.f32.gmra.mrb[12].mxu1 %vm2702_vm12, %v2669_v17 }
 0x212   : > { %v5172_v20 = vpop.permute.xlu1 %1800  ;;  %v2110_v6 = vpop.permute.xlu0 %2109  ;;  %3424 = vmatprep.mubr.msk.f32.mxu1 %vm3649_vm9, %v5949_v53 }
 0x214   : > { %2402 = vrot.lane.b32.xlu1 %v5176_v40, %s3651_s30  ;;  %2009 = vrot.lane.b32.xlu0 %v1583_v62, %s3645_s23 }
 0x216   : > { %v5181_v5 = vpop.permute.xlu1 %2202  ;;  %v5183_v15 = vpop.permute.xlu0 %1879 }
 0x218   : > { %1804 = vrot.lane.b32.xlu1 %v4929_v51, %s3643_s14  ;;  %2125 = vrot.lane.b32.xlu0 %v5075_v19, %s3644_s20  ;;  %v2490_v51 = vsel %vm2476_vm5, %v2460_v55, %v4864_v23 }
 0x219   : > { %v2520_v19 = vsel %vm2506_vm11, %v2490_v51, %v5108_v13  ;;  %v1584_v13 = vld [vmem:[#allocation2 + $0xde] sm:$0xff]  ;;  %v1561_v51 = vld [vmem:[#allocation2 + $0x26] sm:$0xff] }
 0x21a   : > { %v5189_v34 = vpop.permute.xlu1 %2119  ;;  %v5191_v9 = vpop.permute.xlu0 %1995  ;;  %v2550_v56 = vsel %vm2536_vm6, %v2520_v19, %v5116_v61 }
 0x21c   : > { %1849 = vrot.lane.b32.xlu1 %v3599_v26, %s3647_s28  ;;  %2216 = vrot.lane.b32.xlu0 %v5193_v43, %s3648_s16  ;;  %v2580_v26 = vsel %vm2566_vm14, %v2550_v56, %v5032_v59  ;;  %v5228_v56 = vld [vmem:[#allocation2 + $0xfc] sm:$0xff]  ;;  %v1475_v59 = vld [vmem:[#allocation2 + $0x28] sm:$0xff] }
 0x21d   : > { %v2610_v61 = vsel %vm2596_vm15, %v2580_v26, %v5090_v60  ;;  %v5236_v60 = vld [vmem:[#allocation2 + $0x70] sm:$0xff] }
 0x21e   : > { %v5207_v17 = vpop.permute.xlu1 %1688  ;;  %v5209_v62 = vpop.permute.xlu0 %2115  ;;  %v2461_v26 = vsel %vm265_vm0, %v5236_v60, %v4945_v57 }
 0x220   : > { %2312 = vrot.lane.b32.xlu1 %v1601_v27, %s3650_s29  ;;  %1895 = vrot.lane.b32.xlu0 %v5092_v38, %s3647_s28 }
 0x222   : > { %v2295_v23 = vpop.permute.xlu1 %2294  ;;  %v5218_v55 = vpop.permute.xlu0 %1682 }
 0x223   : > { %v2640_v19 = vsel %vm2626_vm8, %v2610_v61, %v2295_v23 }
 0x224   : > { %2011 = vrot.lane.b32.xlu1 %v1584_v13, %s3645_s23  ;;  %1965 = vrot.lane.b32.xlu0 %v1561_v51, %s3645_s23 }
 0x226   : > { %v2387_v27 = vpop.permute.xlu1 %2386  ;;  %v5225_v37 = vpop.permute.xlu0 %1881 }
 0x227   : > { %v2670_v24 = vsel %vm2656_vm3, %v2640_v19, %v2387_v27 }
 0x228   : > { %2404 = vrot.lane.b32.xlu0 %v5228_v56, %s3651_s30  ;;  %3425 = vmatmul.mubr.msk.f32.gmra.mrb[14].mxu1 %vm2702_vm12, %v2670_v24  ;;  %v2491_v24 = vsel %vm2476_vm5, %v2461_v26, %v4840_v41  ;;  %v306_v41 = vld [vmem:[%s3728_s12 + $0x118] sm:$0xff] }
 0x229   : > { %2081 = vrot.lane.b32.xlu1 %v1475_v59, %s3644_s20  ;;  %3427 = vmatprep.mubr.msk.f32.mxu1 %vm3649_vm9, %v5949_v53  ;;  %v2521_v51 = vsel %vm2506_vm11, %v2491_v24, %v5155_v30  ;;  %v305_v59 = vld [vmem:[%s3728_s12 + $0x110] sm:$0xff]  ;;  %s3503_s12 = smul.u32 232, %s5966_s22 }
 0x22a   : > { %v2201_v23 = vpop.permute.xlu1 %2200  ;;  %v5241_v13 = vpop.permute.xlu0 %1997  ;;  %v2551_v57 = vsel %vm2536_vm6, %v2521_v51, %v1994_v18  ;;  %3364 = vmatprep.mubr.msk.f32.mxu0 %vm319_vm1, %v305_v59  ;;  %v3601_v24 = vld [vmem:[#allocation2 + $0x2c] sm:$0xff] }
 0x22b   : > { %v2581_v27 = vsel %vm2566_vm14, %v2551_v57, %v2110_v6  ;;  %3365 = vmatmul.mubr.msk.f32.gmra.mrb[34].mxu0 %vm319_vm1, %v306_v41  ;;  %v1602_v57 = vld [vmem:[#allocation2 + $0x102] sm:$0xff]  ;;  %v1562_v41 = vld [vmem:[#allocation2 + $0x2e] sm:$0xff]  ;;  %s5502_s11 = scalar_lea.vmem %s5861_s6, %s3503_s12 }
 0x22c   : > { %2127 = vrot.lane.b32.xlu0 %v5085_v58, %s3644_s20  ;;  %v5257_v58 = vld [vmem:[#allocation2 + $0x100] sm:$0xff]  ;;  %v2611_v26 = vsel %vm2596_vm15, %v2581_v27, %v2201_v23  ;;  %3385 = vmatprep.mubr.msk.f32.mxu0 %vm3649_vm9, %v5949_v53 }
 0x22d   : > { %1806 = vrot.lane.b32.xlu1 %v5011_v31, %s3643_s14 }
 0x22e   : > { %v2297_v61 = vpop.permute.xlu1 %2296  ;;  %v5251_v19 = vpop.permute.xlu0 %2113 }
 0x22f   : > { %v2641_v31 = vsel %vm2626_vm8, %v2611_v26, %v2297_v61  ;;  %v3602_v61 = vld [vmem:[#allocation2 + $0x4a] sm:$0xff] }
 0x230   : > { %2172 = vrot.lane.b32.xlu0 %v4993_v12, %s3648_s16  ;;  %v1585_v26 = vld [vmem:[#allocation2 + $0xe6] sm:$0xff] }
 0x231   : > { %2218 = vrot.lane.b32.xlu1 %v5257_v58, %s3648_s16 }
 0x232   : > { %v2389_v30 = vpop.permute.xlu1 %2388  ;;  %v5266_v18 = vpop.permute.xlu0 %1883 }
 0x233   : > { %v2671_v6 = vsel %vm2656_vm3, %v2641_v31, %v2389_v30 }
 0x234   : > { %1851 = vrot.lane.b32.xlu0 %v3601_v24, %s3647_s28  ;;  %3428 = vmatmul.mubr.msk.f32.gmra.mrb[16].mxu1 %vm2702_vm12, %v2671_v6  ;;  %v5294_v6 = vld [vmem:[#allocation2 + $0x4c] sm:$0xff]  ;;  %v5298_v24 = vld [vmem:[#allocation2 + $0x104] sm:$0xff] }
 0x235   : > { %1897 = vrot.lane.b32.xlu1 %v5144_v63, %s3647_s28  ;;  %3430 = vmatprep.mubr.msk.f32.mxu1 %vm3649_vm9, %v5949_v53 }
 0x236   : > { %v5278_v23 = vpop.permute.xlu1 %1887  ;;  %v5280_v51 = vpop.permute.xlu0 %1999 }
 0x238   : > { %2268 = vrot.lane.b32.xlu0 %v3602_v61, %s3650_s29 }
 0x239   : > { %2314 = vrot.lane.b32.xlu1 %v1602_v57, %s3650_s29 }
 0x23a   : > { %v5284_v27 = vpop.permute.xlu1 %2003  ;;  %v5286_v59 = vpop.permute.xlu0 %1798 }
 0x23c   : > { %1967 = vrot.lane.b32.xlu0 %v1562_v41, %s3645_s23  ;;  %v3604_v41 = vld [vmem:[#allocation2 + $0x78] sm:$0xff] }
 0x23d   : > { %2013 = vrot.lane.b32.xlu1 %v1585_v26, %s3645_s23  ;;  %v2462_v26 = vsel %vm265_vm0, %v3604_v41, %v4828_v2 }
 0x23e   : > { %v5290_v31 = vpop.permute.xlu1 %2206  ;;  %v5292_v30 = vpop.permute.xlu0 %1686  ;;  %v2492_v47 = vsel %vm2476_vm5, %v2462_v26, %v4961_v3 }
 0x23f   : > { %v2522_v46 = vsel %vm2506_vm11, %v2492_v47, %v5183_v15  ;;  %v5330_v47 = vld [vmem:[#allocation2 + $0x108] sm:$0xff] }
 0x240   : > { %2360 = vrot.lane.b32.xlu0 %v5294_v6, %s3651_s30  ;;  %v2552_v25 = vsel %vm2536_vm6, %v2522_v46, %v5191_v9 }
 0x241   : > { %2406 = vrot.lane.b32.xlu1 %v5298_v24, %s3651_s30  ;;  %v2582_v2 = vsel %vm2566_vm14, %v2552_v25, %v5129_v29  ;;  %v3606_v29 = vld [vmem:[#allocation2 + $0x52] sm:$0xff] }
 0x242   : > { %v5302_v61 = vpop.permute.xlu1 %2123  ;;  %v5304_v57 = vpop.permute.xlu0 %1885  ;;  %v2612_v46 = vsel %vm2596_vm15, %v2582_v2, %v5181_v5  ;;  %v3607_v5 = vld [vmem:[#allocation2 + $0x80] sm:$0xff] }
 0x243   : > { %v2463_v41 = vsel %vm265_vm0, %v3607_v5, %v5044_v52 }
 0x244   : > { %2083 = vrot.lane.b32.xlu0 %v4847_v50, %s3644_s20 }
 0x245   : > { %2129 = vrot.lane.b32.xlu1 %v5120_v8, %s3644_s20  ;;  %v3605_v8 = vld [vmem:[#allocation2 + $0x34] sm:$0xff] }
 0x246   : > { %v5316_v10 = vpop.permute.xlu1 %1692  ;;  %v5318_v49 = vpop.permute.xlu0 %2001 }
 0x248   : > { %1808 = vrot.lane.b32.xlu0 %v5051_v54, %s3643_s14 }
 0x249   : > { %2174 = vrot.lane.b32.xlu1 %v5038_v22, %s3648_s16 }
 0x24a   : > { %v2299_v50 = vpop.permute.xlu1 %2298  ;;  %v5328_v3 = vpop.permute.xlu0 %2117 }
 0x24b   : > { %v2642_v54 = vsel %vm2626_vm8, %v2612_v46, %v2299_v50  ;;  %v1603_v50 = vld [vmem:[#allocation2 + $0x10a] sm:$0xff]  ;;  %v1563_v46 = vld [vmem:[#allocation2 + $0x36] sm:$0xff] }
 0x24c   : > { %2220 = vrot.lane.b32.xlu0 %v5330_v47, %s3648_s16 }
 0x24d   : > { %1853 = vrot.lane.b32.xlu1 %v3605_v8, %s3647_s28 }
 0x24e   : > { %v2391_v15 = vpop.permute.xlu1 %2390  ;;  %v5338_v9 = vpop.permute.xlu0 %1690 }
 0x24f   : > { %v2672_v25 = vsel %vm2656_vm3, %v2642_v54, %v2391_v15 }
 0x250   : > { %1899 = vrot.lane.b32.xlu0 %v5146_v35, %s3647_s28  ;;  %3431 = vmatmul.mubr.msk.f32.gmra.mrb[18].mxu1 %vm2702_vm12, %v2672_v25  ;;  %v2493_v35 = vsel %vm2476_vm5, %v2463_v41, %v4918_v32  ;;  %v1586_v25 = vld [vmem:[#allocation2 + $0xee] sm:$0xff] }
 0x251   : > { %2270 = vrot.lane.b32.xlu1 %v3606_v29, %s3650_s29  ;;  %3433 = vmatprep.mubr.msk.f32.mxu1 %vm3649_vm9, %v5949_v53  ;;  %v2523_v8 = vsel %vm2506_vm11, %v2493_v35, %v5225_v37  ;;  %v3608_v32 = vld [vmem:[#allocation2 + $0x54] sm:$0xff]  ;;  %v1608_v35 = vld [vmem:[#allocation2 + $0x10c] sm:$0xff] }
 0x252   : > { %v2205_v26 = vpop.permute.xlu1 %2204  ;;  %v5349_v2 = vpop.permute.xlu0 %1889  ;;  %v2553_v52 = vsel %vm2536_vm6, %v2523_v8, %v5241_v13 }
 0x253   : > { %v2583_v29 = vsel %vm2566_vm14, %v2553_v52, %v5251_v19 }
 0x254   : > { %2316 = vrot.lane.b32.xlu0 %v1603_v50, %s3650_s29  ;;  %v2613_v5 = vsel %vm2596_vm15, %v2583_v29, %v2205_v26 }
 0x255   : > { %1969 = vrot.lane.b32.xlu1 %v1563_v46, %s3645_s23 }
 0x256   : > { %v2301_v54 = vpop.permute.xlu1 %2300  ;;  %v5357_v15 = vpop.permute.xlu0 %2005 }
 0x257   : > { %v2643_v41 = vsel %vm2626_vm8, %v2613_v5, %v2301_v54 }
 0x258   : > { %2015 = vrot.lane.b32.xlu0 %v1586_v25, %s3645_s23  ;;  %v3609_v25 = vld [vmem:[#allocation2 + $0x3c] sm:$0xff] }
 0x259   : > { %2362 = vrot.lane.b32.xlu1 %v3608_v32, %s3651_s30 }
 0x25a   : > { %v2393_v37 = vpop.permute.xlu1 %2392  ;;  %v5367_v50 = vpop.permute.xlu0 %2121 }
 0x25b   : > { %v2673_v46 = vsel %vm2656_vm3, %v2643_v41, %v2393_v37  ;;  %v3611_v41 = vld [vmem:[#allocation2 + $0x5a] sm:$0xff]  ;;  %v1604_v37 = vld [vmem:[#allocation2 + $0x112] sm:$0xff] }
 0x25c   : > { %2408 = vrot.lane.b32.xlu0 %v1608_v35, %s3651_s30  ;;  %3434 = vmatmul.mubr.msk.f32.gmra.mrb[20].mxu1 %vm2702_vm12, %v2673_v46  ;;  %v3612_v46 = vld [vmem:[#allocation2 + $0x90] sm:$0xff] }
 0x25d   : > { %2085 = vrot.lane.b32.xlu1 %v4901_v39, %s3644_s20  ;;  %3436 = vmatprep.mubr.msk.f32.mxu1 %vm3649_vm9, %v5949_v53  ;;  %v1595_v39 = vld [vmem:[#allocation2 + $0x110] sm:$0xff] }
 0x25e   : > { %v5376_v13 = vpop.permute.xlu1 %1891  ;;  %v5378_v19 = vpop.permute.xlu0 %1694 }
 0x260   : > { %2131 = vrot.lane.b32.xlu0 %v5158_v44, %s3644_s20  ;;  %v3610_v44 = vld [vmem:[#allocation2 + $0x88] sm:$0xff] }
 0x261   : > { %1810 = vrot.lane.b32.xlu1 %v5118_v28, %s3643_s14  ;;  %v2464_v28 = vsel %vm265_vm0, %v3610_v44, %v4899_v36  ;;  %v2465_v36 = vsel %vm265_vm0, %v3612_v46, %v5140_v21  ;;  %v3614_v46 = vld [vmem:[#allocation2 + $0x5c] sm:$0xff] }
 0x262   : > { %v5384_v26 = vpop.permute.xlu1 %2007  ;;  %v2209_v8 = vpop.permute.xlu0 %2208 }
 0x264   : > { %2176 = vrot.lane.b32.xlu0 %v5094_v7, %s3648_s16  ;;  %v2494_v7 = vsel %vm2476_vm5, %v2464_v28, %v5060_v42  ;;  %v1564_v42 = vld [vmem:[#allocation2 + $0x3e] sm:$0xff] }
 0x265   : > { %2222 = vrot.lane.b32.xlu1 %v1595_v39, %s3648_s16  ;;  %v2524_v32 = vsel %vm2506_vm11, %v2494_v7, %v5266_v18  ;;  %v3613_v28 = vld [vmem:[#allocation2 + $0x98] sm:$0xff] }
 0x266   : > { %v2211_v54 = vpop.permute.xlu1 %2210  ;;  %v2305_v52 = vpop.permute.xlu0 %2304  ;;  %v2466_v21 = vsel %vm265_vm0, %v3613_v28, %v4986_v45 }
 0x268   : > { %1855 = vrot.lane.b32.xlu0 %v3609_v25, %s3647_s28  ;;  %v1587_v25 = vld [vmem:[#allocation2 + $0xf6] sm:$0xff] }
 0x269   : > { %1901 = vrot.lane.b32.xlu1 %v5176_v40, %s3647_s28  ;;  %v2554_v40 = vsel %vm2536_vm6, %v2524_v32, %v5280_v51  ;;  %v2495_v51 = vsel %vm2476_vm5, %v2465_v36, %v5005_v14 }
 0x26a   : > { %v5394_v29 = vpop.permute.xlu1 %1696  ;;  %v2397_v5 = vpop.permute.xlu0 %2396  ;;  %v2584_v18 = vsel %vm2566_vm14, %v2554_v40, %v5209_v62  ;;  %v2525_v7 = vsel %vm2506_vm11, %v2495_v51, %v5304_v57  ;;  %v1609_v57 = vld [vmem:[#allocation2 + $0x114] sm:$0xff] }
 0x26b   : > { %v2614_v44 = vsel %vm2596_vm15, %v2584_v18, %v5290_v31  ;;  %v2555_v31 = vsel %vm2536_vm6, %v2525_v7, %v5318_v49  ;;  %v3617_v7 = vld [vmem:[#allocation2 + $0x44] sm:$0xff] }
 0x26c   : > { %2272 = vrot.lane.b32.xlu0 %v3611_v41, %s3650_s29  ;;  %v2585_v45 = vsel %vm2566_vm14, %v2555_v31, %v5328_v3 }
 0x26d   : > { %2318 = vrot.lane.b32.xlu1 %v1604_v37, %s3650_s29  ;;  %v2496_v37 = vsel %vm2476_vm5, %v2466_v21, %v5081_v1  ;;  %v2615_v36 = vsel %vm2596_vm15, %v2585_v45, %v2209_v8  ;;  %v1596_v21 = vld [vmem:[#allocation2 + $0x118] sm:$0xff] }
 0x26e   : > { %v2303_v35 = vpop.permute.xlu1 %2302  ;;  %v5406_v39 = vpop.permute.xlu0 %1698  ;;  %v2526_v40 = vsel %vm2506_vm11, %v2496_v37, %v5278_v23  ;;  %v2645_v49 = vsel %vm2626_vm8, %v2615_v36, %v2305_v52 }
 0x26f   : > { %v2644_v62 = vsel %vm2626_vm8, %v2614_v44, %v2303_v35  ;;  %v2556_v1 = vsel %vm2536_vm6, %v2526_v40, %v5284_v27  ;;  %v2675_v35 = vsel %vm2656_vm3, %v2645_v49, %v2397_v5 }
 0x270   : > { %1971 = vrot.lane.b32.xlu0 %v1564_v42, %s3645_s23  ;;  %v3615_v42 = vld [vmem:[#allocation2 + $0xa0] sm:$0xff]  ;;  %v2586_v27 = vsel %vm2566_vm14, %v2556_v1, %v5189_v34 }
 0x271   : > { %2017 = vrot.lane.b32.xlu1 %v1587_v25, %s3645_s23  ;;  %v2467_v18 = vsel %vm265_vm0, %v3615_v42, %v5218_v55  ;;  %v2616_v52 = vsel %vm2596_vm15, %v2586_v27, %v2211_v54  ;;  %v1565_v1 = vld [vmem:[#allocation2 + $0x46] sm:$0xff] }
 0x272   : > { %v2395_v32 = vpop.permute.xlu1 %2394  ;;  %v2213_v41 = vpop.permute.xlu0 %2212  ;;  %v2497_v8 = vsel %vm2476_vm5, %v2467_v18, %v5286_v59  ;;  %v1610_v18 = vld [vmem:[#allocation2 + $0x11c] sm:$0xff] }
 0x273   : > { %v2674_v14 = vsel %vm2656_vm3, %v2644_v62, %v2395_v32  ;;  %v2527_v55 = vsel %vm2506_vm11, %v2497_v8, %v5349_v2  ;;  %v3616_v2 = vld [vmem:[#allocation2 + $0xa8] sm:$0xff] }
 0x274   : > { %2364 = vrot.lane.b32.xlu0 %v3614_v46, %s3651_s30  ;;  %3437 = vmatmul.mubr.msk.f32.gmra.mrb[22].mxu1 %vm2702_vm12, %v2674_v14  ;;  %v2557_v25 = vsel %vm2536_vm6, %v2527_v55, %v5357_v15  ;;  %v2468_v15 = vsel %vm265_vm0, %v3616_v2, %v5106_v48  ;;  %v3618_v14 = vld [vmem:[#allocation2 + $0x62] sm:$0xff] }
 0x275   : > { %2410 = vrot.lane.b32.xlu1 %v1609_v57, %s3651_s30  ;;  %3439 = vmatprep.mubr.msk.f32.mxu1 %vm3649_vm9, %v5949_v53  ;;  %v2587_v54 = vsel %vm2566_vm14, %v2557_v25, %v5367_v50  ;;  %v1605_v57 = vld [vmem:[#allocation2 + $0x11a] sm:$0xff] }
 0x276   : > { %v2307_v23 = vpop.permute.xlu1 %2306  ;;  %v2309_v3 = vpop.permute.xlu0 %2308 }
 0x277   : > { %v2646_v34 = vsel %vm2626_vm8, %v2616_v52, %v2307_v23  ;;  %v1588_v23 = vld [vmem:[#allocation2 + $0xfe] sm:$0xff]  ;;  %v3620_v52 = vld [vmem:[#allocation2 + $0xb0] sm:$0xff] }
 0x278   : > { %2087 = vrot.lane.b32.xlu0 %v4949_v16, %s3644_s20  ;;  %3440 = vmatmul.mubr.msk.f32.gmra.mrb[24].mxu1 %vm2702_vm12, %v2675_v35  ;;  %v2469_v55 = vsel %vm265_vm0, %v3620_v52, %v5292_v30  ;;  %v1597_v30 = vld [vmem:[#allocation2 + $0x120] sm:$0xff] }
 0x279   : > { %2133 = vrot.lane.b32.xlu1 %v5193_v43, %s3644_s20  ;;  %3442 = vmatprep.mubr.msk.f32.mxu1 %vm3649_vm9, %v5949_v53  ;;  %v2617_v43 = vsel %vm2596_vm15, %v2587_v54, %v2213_v41 }
 0x27a   : > { %v2399_v5 = vpop.permute.xlu1 %2398  ;;  %v2401_v16 = vpop.permute.xlu0 %2400  ;;  %v2647_v50 = vsel %vm2626_vm8, %v2617_v43, %v2309_v3  ;;  %v3619_v3 = vld [vmem:[#allocation2 + $0x64] sm:$0xff] }
 0x27b   : > { %v2676_v59 = vsel %vm2656_vm3, %v2646_v34, %v2399_v5  ;;  %v2677_v28 = vsel %vm2656_vm3, %v2647_v50, %v2401_v16 }
 0x27c   : > { %1812 = vrot.lane.b32.xlu0 %v5092_v38, %s3643_s14  ;;  %3443 = vmatmul.mubr.msk.f32.gmra.mrb[26].mxu1 %vm2702_vm12, %v2676_v59  ;;  %v2498_v38 = vsel %vm2476_vm5, %v2468_v15, %v5172_v20 }
 0x27d   : > { %2178 = vrot.lane.b32.xlu1 %v5135_v0, %s3648_s16  ;;  %3445 = vmatprep.mubr.msk.f32.mxu1 %vm3649_vm9, %v5949_v53  ;;  %v2528_v0 = vsel %vm2506_vm11, %v2498_v38, %v5376_v13  ;;  %v5489_v13 = vld [vmem:[%s5859_s4] ss:$0 sm:$0xff] }
 0x27e   : > { %v2215_v44 = vpop.permute.xlu1 %2214  ;;  %v1803_v51 = vpop.permute.xlu0 %1802  ;;  %v2558_v48 = vsel %vm2536_vm6, %v2528_v0, %v5384_v26 }
 0x27f   : > { %v2588_v32 = vsel %vm2566_vm14, %v2558_v48, %v5302_v61  ;;  %v2499_v34 = vsel %vm2476_vm5, %v2469_v55, %v1803_v51  ;;  %v1566_v48 = vld [vmem:[#allocation2 + $0x4e] sm:$0xff] }
 0x280   : > { %2224 = vrot.lane.b32.xlu0 %v1596_v21, %s3648_s16  ;;  %3446 = vmatmul.mubr.msk.f32.gmra.mrb[28].mxu1 %vm2702_vm12, %v2677_v28  ;;  %v2618_v26 = vsel %vm2596_vm15, %v2588_v32, %v2215_v44  ;;  %v3621_v28 = vld [vmem:[#allocation2 + $0x6a] sm:$0xff]  ;;  %v1606_v21 = vld [vmem:[#allocation2 + $0x122] sm:$0xff] }
 0x281   : > { %1857 = vrot.lane.b32.xlu1 %v3617_v7, %s3647_s28  ;;  %3448 = vmatprep.mubr.msk.f32.mxu1 %vm3649_vm9, %v5949_v53 }
 0x282   : > { %v2311_v20 = vpop.permute.xlu1 %2310  ;;  %v1894_v62 = vpop.permute.xlu0 %1893 }
 0x283   : > { %v2648_v40 = vsel %vm2626_vm8, %v2618_v26, %v2311_v20  ;;  %v2529_v5 = vsel %vm2506_vm11, %v2499_v34, %v1894_v62 }
 0x284   : > { %v2886_v41 = vpop.f32.mrb[0].mxu1  ;;  %1903 = vrot.lane.b32.xlu0 %v5228_v56, %s3647_s28 }
 0x285   : > { %v2887_v37 = vadd.f32 %v5489_v13, %v2886_v41  ;;  %v3405_v31 = vpop.f32.mrb[1].mxu1  ;;  %2274 = vrot.lane.b32.xlu1 %v3618_v14, %s3650_s29  ;;  %v1470_v41 = vld [vmem:[#allocation2] sm:$0xff] }
 0x286   : > { %v2403_v61 = vpop.permute.xlu1 %2402  ;;  %v2010_v45 = vpop.permute.xlu0 %2009  ;;  %v3622_v31 = vld [vmem:[#allocation2 + $0x6c] sm:$0xff]  ;;  %v1611_v14 = vld [vmem:[#allocation2 + $0x124] sm:$0xff] }
 0x287   : > { %v3006_v46 = vmax.f32 %v2887_v37, 0.0  ;;  %v2678_v56 = vsel %vm2656_vm3, %v2648_v40, %v2403_v61  ;;  %v2447_v40 = vsel %vm265_vm0, %v1470_v41, %v4629_v11 }
 0x288   : > { %2320 = vrot.lane.b32.xlu0 %v1605_v57, %s3650_s29  ;;  %3449 = vmatmul.mubr.msk.f32.gmra.mrb[30].mxu1 %vm2702_vm12, %v2678_v56  ;;  %v3623_v56 = vld [vmem:[#allocation2 + $0xb8] sm:$0xff] }
 0x289   : > { %3035 = vst.msk [vmem:[%s5502_s11 + $0x30] sm:$0xff] %vm2476_vm5, %v3006_v46  ;;  %1973 = vrot.lane.b32.xlu1 %v1565_v1, %s3645_s23  ;;  %3451 = vmatprep.mubr.msk.f32.mxu1 %vm3649_vm9, %v5949_v53  ;;  %v2477_v46 = vsel %vm2476_vm5, %v2447_v40, %v4660_v33  ;;  %v2470_v57 = vsel %vm265_vm0, %v3623_v56, %v5207_v17 }
 0x28a   : > { %v5512_v36 = vpop.permute.xlu1 %1804  ;;  %v2126_v49 = vpop.permute.xlu0 %2125 }
 0x28b   : > { %v2500_v1 = vsel %vm2476_vm5, %v2470_v57, %v5512_v36 }
 0x28c   : > { %2019 = vrot.lane.b32.xlu0 %v1588_v23, %s3645_s23 }
 0x28d   : > { %2366 = vrot.lane.b32.xlu1 %v3619_v3, %s3651_s30 }
 0x28e   : > { %v5516_v35 = vpop.permute.xlu1 %1849  ;;  %v2217_v42 = vpop.permute.xlu0 %2216 }
 0x28f   : > { %v2507_v11 = vsel %vm2506_vm11, %v2477_v46, %v5516_v35 }
 0x290   : > { %2412 = vrot.lane.b32.xlu0 %v1610_v18, %s3651_s30 }
 0x291   : > { %2089 = vrot.lane.b32.xlu1 %v4993_v12, %s3644_s20  ;;  %v2559_v12 = vsel %vm2536_vm6, %v2529_v5, %v2010_v45  ;;  %v1607_v5 = vld [vmem:[#allocation2 + $0x12a] sm:$0xff] }
 0x292   : > { %v2313_v27 = vpop.permute.xlu1 %2312  ;;  %v5521_v8 = vpop.permute.xlu0 %1895  ;;  %v2589_v59 = vsel %vm2566_vm14, %v2559_v12, %v2126_v49 }
 0x294   : > { %2135 = vrot.lane.b32.xlu0 %v5257_v58, %s3644_s20  ;;  %v2619_v58 = vsel %vm2596_vm15, %v2589_v59, %v2217_v42  ;;  %v3625_v59 = vld [vmem:[#allocation2 + $0x74] sm:$0xff] }
 0x295   : > { %1814 = vrot.lane.b32.xlu1 %v5144_v63, %s3643_s14  ;;  %v2649_v63 = vsel %vm2626_vm8, %v2619_v58, %v2313_v27 }
 0x296   : > { %v2012_v16 = vpop.permute.xlu1 %2011  ;;  %v1966_v25 = vpop.permute.xlu0 %1965 }
 0x297   : > { %v2537_v23 = vsel %vm2536_vm6, %v2507_v11, %v1966_v25 }
 0x298   : > { %v2891_v54 = vpop.f32.mrb[2].mxu1  ;;  %2180 = vrot.lane.b32.xlu0 %v5195_v4, %s3648_s16 }
 0x299   : > { %v2892_v43 = vadd.f32 %v5489_v13, %v2891_v54  ;;  %v3408_v2 = vpop.f32.mrb[3].mxu1  ;;  %2226 = vrot.lane.b32.xlu1 %v1597_v30, %s3648_s16  ;;  %v1612_v54 = vld [vmem:[#allocation2 + $0x12c] sm:$0xff] }
 0x29a   : > { %v2405_v15 = vpop.permute.xlu0 %2404 }
 0x29b   : > { %v3007_v50 = vmax.f32 %v2892_v43, 0.0  ;;  %v2679_v44 = vsel %vm2656_vm3, %v2649_v63, %v2405_v15  ;;  %v2082_v51 = vpop.permute.xlu1 %2081 }
 0x29c   : > { %1859 = vrot.lane.b32.xlu0 %v5294_v6, %s3647_s28  ;;  %3452 = vmatmul.mubr.msk.f32.gmra.mrb[32].mxu1 %vm2702_vm12, %v2679_v44  ;;  %v2567_v17 = vsel %vm2566_vm14, %v2537_v23, %v2082_v51  ;;  %v1471_v44 = vld [vmem:[#allocation2 + $0x8] sm:$0xff] }
 0x29d   : > { %3036 = vst.msk [vmem:[%s5502_s11 + $0x38] sm:$0xff] %vm2476_vm5, %v3007_v50  ;;  %1905 = vrot.lane.b32.xlu1 %v5298_v24, %s3647_s28  ;;  %3454 = vmatprep.mubr.msk.f32.mxu1 %vm3649_vm9, %v5949_v53  ;;  %v1589_v24 = vld [vmem:[#allocation2 + $0x106] sm:$0xff] }
 0x29e   : > { %v2128_v4 = vpop.permute.xlu0 %2127 }
 0x29f   : > { %v5549_v38 = vpop.permute.xlu1 %1806 }
 0x2a0   : > { %2276 = vrot.lane.b32.xlu0 %v3621_v28, %s3650_s29 }
 0x2a1   : > { %2322 = vrot.lane.b32.xlu1 %v1606_v21, %s3650_s29 }
 0x2a2   : > { %v2173_v6 = vpop.permute.xlu0 %2172 }
 0x2a3   : > { %v2219_v0 = vpop.permute.xlu1 %2218  ;;  %v2597_v42 = vsel %vm2596_vm15, %v2567_v17, %v2173_v6 }
 0x2a4   : > { %v2896_v7 = vpop.f32.mrb[4].mxu1  ;;  %1975 = vrot.lane.b32.xlu0 %v1566_v48, %s3645_s23 }
 0x2a5   : > { %v2897_v20 = vadd.f32 %v5489_v13, %v2896_v7  ;;  %v3411_v62 = vpop.f32.mrb[5].mxu1  ;;  %2021 = vrot.lane.b32.xlu1 %v1589_v24, %s3645_s23  ;;  %v5951_v7 = vld [vmem:[#allocation7_spill] sm:$0xff] }
 0x2a6   : > { %v5556_v32 = vpop.permute.xlu0 %1851 }
 0x2a7   : > { %v3008_v26 = vmax.f32 %v2897_v20, 0.0  ;;  %v5558_v37 = vpop.permute.xlu1 %1897 }
 0x2a8   : > { %2368 = vrot.lane.b32.xlu0 %v3622_v31, %s3651_s30  ;;  %v3626_v31 = vld [vmem:[#allocation2 + $0xc0] sm:$0xff] }
 0x2a9   : > { %3037 = vst.msk [vmem:[%s5502_s11 + $0x40] sm:$0xff] %vm2476_vm5, %v3008_v26  ;;  %2414 = vrot.lane.b32.xlu1 %v1611_v14, %s3651_s30  ;;  %v2471_v14 = vsel %vm265_vm0, %v3626_v31, %v5338_v9 }
 0x2aa   : > { %v2269_v61 = vpop.permute.xlu0 %2268 }
 0x2ab   : > { %v2315_v45 = vpop.permute.xlu1 %2314  ;;  %v2627_v18 = vsel %vm2626_vm8, %v2597_v42, %v2269_v61  ;;  %v2501_v61 = vsel %vm2476_vm5, %v2471_v14, %v5549_v38 }
 0x2ac   : > { %2091 = vrot.lane.b32.xlu0 %v5038_v22, %s3644_s20  ;;  %v2530_v22 = vsel %vm2506_vm11, %v2500_v1, %v5521_v8  ;;  %v2531_v46 = vsel %vm2506_vm11, %v2501_v61, %v5558_v37 }
 0x2ad   : > { %2137 = vrot.lane.b32.xlu1 %v5330_v47, %s3644_s20  ;;  %v2560_v3 = vsel %vm2536_vm6, %v2530_v22, %v2012_v16  ;;  %v1598_v47 = vld [vmem:[#allocation2 + $0x128] sm:$0xff] }
 0x2ae   : > { %v1968_v49 = vpop.permute.xlu0 %1967  ;;  %v2590_v36 = vsel %vm2566_vm14, %v2560_v3, %v2128_v4  ;;  %v5950_v4 = vld [vmem:[#allocation6_spill] sm:$0xff] }
 0x2af   : > { %v2014_v33 = vpop.permute.xlu1 %2013  ;;  %v2620_v35 = vsel %vm2596_vm15, %v2590_v36, %v2219_v0  ;;  %v2448_v28 = vsel %vm265_vm0, %v1471_v44, %v5950_v4 }
 0x2b0   : > { %2182 = vrot.lane.b32.xlu0 %v5236_v60, %s3648_s16  ;;  %v2650_v8 = vsel %vm2626_vm8, %v2620_v35, %v2315_v45  ;;  %v3624_v60 = vld [vmem:[#allocation2 + $0x72] sm:$0xff]  ;;  %v2478_v24 = vsel %vm2476_vm5, %v2448_v28, %v5951_v7  ;;  %v2561_v57 = vsel %vm2536_vm6, %v2531_v46, %v2014_v33 }
 0x2b1   : > { %2228 = vrot.lane.b32.xlu1 %v1598_v47, %s3648_s16  ;;  %v2508_v62 = vsel %vm2506_vm11, %v2478_v24, %v5556_v32  ;;  %v1473_v46 = vld [vmem:[#allocation2 + $0x18] sm:$0xff] }
 0x2b2   : > { %v2361_v27 = vpop.permute.xlu0 %2360  ;;  %v2538_v40 = vsel %vm2536_vm6, %v2508_v62, %v1968_v49 }
 0x2b3   : > { %v2657_v52 = vsel %vm2656_vm3, %v2627_v18, %v2361_v27  ;;  %v2407_v55 = vpop.permute.xlu1 %2406 }
 0x2b4   : > { %v2680_v34 = vsel %vm2656_vm3, %v2650_v8, %v2407_v55  ;;  %2278 = vrot.lane.b32.xlu0 %v3624_v60, %s3650_s29  ;;  %3386 = vmatmul.mubr.msk.f32.vlgmr.msra.gmra.mrb[36].mxu0 %vm2702_vm12, %v2657_v52  ;;  %v1472_v8 = vld [vmem:[#allocation2 + $0x10] sm:$0xff] }
 0x2b5   : > { %2324 = vrot.lane.b32.xlu1 %v1607_v5, %s3650_s29  ;;  %3455 = vmatmul.mubr.msk.f32.gmra.mrb[34].mxu1 %vm2702_vm12, %v2680_v34  ;;  %v5952_v34 = vld [vmem:[#allocation4_spill] sm:$0xff] }
 0x2b6   : > { %v2084_v16 = vpop.permute.xlu0 %2083  ;;  %3388 = vmatprep.mubr.msk.f32.mxu0 %vm3649_vm9, %v5949_v53  ;;  %3457 = vmatprep.mubr.msk.f32.mxu1 %vm3649_vm9, %v5949_v53  ;;  %v2449_v60 = vsel %vm265_vm0, %v1472_v8, %v5952_v34 }
 0x2b7   : > { %v2130_v25 = vpop.permute.xlu1 %2129  ;;  %v2568_v45 = vsel %vm2566_vm14, %v2538_v40, %v2084_v16 }
 0x2b8   : > { %v2901_v12 = vpop.f32.mrb[6].mxu1  ;;  %2370 = vrot.lane.b32.xlu0 %v3625_v59, %s3651_s30  ;;  %v2591_v11 = vsel %vm2566_vm14, %v2561_v57, %v2130_v25  ;;  %v5953_v25 = vld [vmem:[#allocation8_spill] sm:$0xff]  ;;  %v3627_v59 = vld [vmem:[#allocation2 + $0xc8] sm:$0xff] }
 0x2b9   : > { %v2902_v30 = vadd.f32 %v5489_v13, %v2901_v12  ;;  %v3414_v58 = vpop.f32.mrb[7].mxu1  ;;  %2416 = vrot.lane.b32.xlu1 %v1612_v54, %s3651_s30  ;;  %v2479_v12 = vsel %vm2476_vm5, %v2449_v60, %v5953_v25  ;;  %v2472_v54 = vsel %vm265_vm0, %v3627_v59, %v5316_v10 }
 0x2ba   : > { %v1809_v43 = vpop.permute.xlu0 %1808 }
 0x2bb   : > { %v3009_v2 = vmax.f32 %v2902_v30, 0.0  ;;  %v2175_v63 = vpop.permute.xlu1 %2174  ;;  %v2502_v30 = vsel %vm2476_vm5, %v2472_v54, %v1809_v43 }
 0x2bc   : > { %v2598_v32 = vsel %vm2596_vm15, %v2568_v45, %v2175_v63 }
 0x2bd   : > { %3038 = vst.msk [vmem:[%s5502_s11 + $0x48] sm:$0xff] %vm2476_vm5, %v3009_v2 }
 0x2be   : > { %v2221_v15 = vpop.permute.xlu0 %2220 }
 0x2bf   : > { %v1854_v50 = vpop.permute.xlu1 %1853  ;;  %v2621_v38 = vsel %vm2596_vm15, %v2591_v11, %v2221_v15 }
 0x2c0   : > { %v2509_v58 = vsel %vm2506_vm11, %v2479_v12, %v1854_v50 }
 0x2c2   : > { %v1900_v51 = vpop.permute.xlu0 %1899 }
 0x2c3   : > { %v2271_v21 = vpop.permute.xlu1 %2270  ;;  %v2532_v63 = vsel %vm2506_vm11, %v2502_v30, %v1900_v51 }
 0x2c4   : > { %v2906_v6 = vpop.f32.mrb[8].mxu1  ;;  %v2628_v1 = vsel %vm2626_vm8, %v2598_v32, %v2271_v21  ;;  %v5954_v32 = vld [vmem:[#allocation3_spill] sm:$0xff] }
 0x2c5   : > { %v2907_v0 = vadd.f32 %v5489_v13, %v2906_v6  ;;  %v3417_v48 = vpop.f32.mrb[9].mxu1  ;;  %v748_v57 = vadd.s32 272, %v5954_v32 }
 0x2c6   : > { %v2317_v20 = vpop.permute.xlu0 %2316 }
 0x2c7   : > { %v3010_v41 = vmax.f32 %v2907_v0, 0.0  ;;  %v1970_v26 = vpop.permute.xlu1 %1969  ;;  %v2651_v22 = vsel %vm2626_vm8, %v2621_v38, %v2317_v20 }
 0x2c8   : > { %v2539_v15 = vsel %vm2536_vm6, %v2509_v58, %v1970_v26 }
 0x2c9   : > { %3039 = vst.msk [vmem:[%s5502_s11 + $0x50] sm:$0xff] %vm2476_vm5, %v3010_v41 }
 0x2ca   : > { %v2016_v56 = vpop.permute.xlu0 %2015 }
 0x2cb   : > { %v2363_v9 = vpop.permute.xlu1 %2362  ;;  %v2562_v4 = vsel %vm2536_vm6, %v2532_v63, %v2016_v56  ;;  %v749_v56 = vadd.s32 280, %v5954_v32 }
 0x2cc   : > { %v2658_v49 = vsel %vm2656_vm3, %v2628_v1, %v2363_v9 }
 0x2cd   : > { %3389 = vmatmul.mubr.msk.f32.gmra.mrb[38].mxu0 %vm2702_vm12, %v2658_v49  ;;  %v5678_v9 = vmul.u32.u64.low 3817748708, %v749_v56  ;;  %v5679_v11 = vmul.u32.u64.high 3817748708, %v749_v56, %v5678_v9  ;;  %v5681_v49 = vmul.u32.u64.low 3817748708, %v748_v57  ;;  %v5682_v38 = vmul.u32.u64.high 3817748708, %v748_v57, %v5681_v49 }
 0x2ce   : > { %v2409_v23 = vpop.permute.xlu0 %2408  ;;  %3391 = vmatprep.mubr.msk.f32.mxu0 %vm3649_vm9, %v5949_v53 }
 0x2cf   : > { %v2681_v37 = vsel %vm2656_vm3, %v2651_v22, %v2409_v23  ;;  %v2086_v33 = vpop.permute.xlu1 %2085  ;;  %v5955_v22 = vld [vmem:[#allocation5_spill] sm:$0xff]  ;;  %v1130_v8 = vshrl.u32 %v5682_v38, 4 }
 0x2d0   : > { %3458 = vmatmul.mubr.msk.f32.gmra.mrb[36].mxu1 %vm2702_vm12, %v2681_v37  ;;  %v2569_v28 = vsel %vm2566_vm14, %v2539_v15, %v2086_v33  ;;  %v2450_v23 = vsel %vm265_vm0, %v1473_v46, %v5955_v22  ;;  %v3628_v33 = vld [vmem:[#allocation2 + $0xd0] sm:$0xff] }
 0x2d1   : > { %3460 = vmatprep.mubr.msk.f32.mxu1 %vm3649_vm9, %v5949_v53 }
 0x2d2   : > { %v2132_v3 = vpop.permute.xlu0 %2131 }
 0x2d3   : > { %v5637_v17 = vpop.permute.xlu1 %1810  ;;  %v2592_v6 = vsel %vm2566_vm14, %v2562_v4, %v2132_v3  ;;  %v2473_v3 = vsel %vm265_vm0, %v3628_v33, %v5378_v19 }
 0x2d6   : > { %v2177_v47 = vpop.permute.xlu0 %2176 }
 0x2d7   : > { %v2223_v36 = vpop.permute.xlu1 %2222  ;;  %v2599_v10 = vsel %vm2596_vm15, %v2569_v28, %v2177_v47  ;;  %v5956_v47 = vld [vmem:[#allocation9_spill] sm:$0xff] }
 0x2d8   : > { %v2911_v42 = vpop.f32.mrb[10].mxu1  ;;  %v2622_v50 = vsel %vm2596_vm15, %v2592_v6, %v2223_v36  ;;  %v2480_v36 = vsel %vm2476_vm5, %v2450_v23, %v5956_v47 }
 0x2d9   : > { %v2912_v35 = vadd.f32 %v5489_v13, %v2911_v42  ;;  %v3420_v18 = vpop.f32.mrb[11].mxu1  ;;  %v2503_v42 = vsel %vm2476_vm5, %v2473_v3, %v5637_v17  ;;  %v1131_v17 = vmul.u32 18, %v1130_v8  ;;  %v1474_v3 = vld [vmem:[#allocation2 + $0x20] sm:$0xff] }
 0x2da   : > { %v1856_v27 = vpop.permute.xlu0 %1855  ;;  %v1141_v18 = vshrl.u32 %v5679_v11, 4 }
 0x2db   : > { %v3011_v52 = vmax.f32 %v2912_v35, 0.0  ;;  %v1902_v55 = vpop.permute.xlu1 %1901  ;;  %v1132_v63 = vsub.s32 %v748_v57, %v1131_v17 }
 0x2dc   : > { %v2533_v34 = vsel %vm2506_vm11, %v2503_v42, %v1902_v55  ;;  %v1142_v12 = vmul.u32 18, %v1141_v18  ;;  %v5961_v42 = vld [vmem:[#allocation11_spill] sm:$0xff]  ;;  %v5962_v18 = vld [vmem:[#allocation12_spill] sm:$0xff] }
 0x2dd   : > { %3040 = vst.msk [vmem:[%s5502_s11 + $0x58] sm:$0xff] %vm2476_vm5, %v3011_v52  ;;  %v2510_v52 = vsel %vm2506_vm11, %v2480_v36, %v1856_v27  ;;  %vm1180_vm13 = vcmp.ne.s32.totalorder %v1132_v63, 0  ;;  %vm1216_vm2 = vcmp.lt.s32.totalorder %v1132_v63, 0 }
 0x2de   : > { %v2273_v5 = vpop.permute.xlu0 %2272  ;;  %v1143_v55 = vsub.s32 %v749_v56, %v1142_v12  ;;  %vm5719_vm4 = vmand %vm1216_vm2, %vm1180_vm13 }
 0x2df   : > { %v2319_v16 = vpop.permute.xlu1 %2318  ;;  %v2629_v51 = vsel %vm2626_vm8, %v2599_v10, %v2273_v5  ;;  %v1288_v10 = vadd.s32 18, %v1132_v63 }
 0x2e0   : > { %v2652_v7 = vsel %vm2626_vm8, %v2622_v50, %v2319_v16  ;;  %vm1181_vm1 = vcmp.ne.s32.totalorder %v1143_v55, 0  ;;  %vm1217_vm7 = vcmp.lt.s32.totalorder %v1143_v55, 0 }
 0x2e1   : > { %vm5712_vm10 = vmand %vm1217_vm7, %vm1181_vm1 }
 0x2e2   : > { %v1972_v2 = vpop.permute.xlu0 %1971 }
 0x2e3   : > { %v2018_v44 = vpop.permute.xlu1 %2017  ;;  %v2540_v19 = vsel %vm2536_vm6, %v2510_v52, %v1972_v2  ;;  %v3630_v52 = vld [vmem:[#allocation2 + $0xd8] sm:$0xff] }
 0x2e4   : > { %v2916_v21 = vpop.f32.mrb[12].mxu1  ;;  %v2563_v59 = vsel %vm2536_vm6, %v2533_v34, %v2018_v44  ;;  %v1289_v44 = vadd.s32 18, %v1143_v55  ;;  %v2474_v34 = vsel %vm265_vm0, %v3630_v52, %v5394_v29 }
 0x2e5   : > { %v2917_v43 = vadd.f32 %v5489_v13, %v2916_v21  ;;  %v3423_v0 = vpop.f32.mrb[13].mxu1 }
 0x2e6   : > { %v2365_v48 = vpop.permute.xlu0 %2364 }
 0x2e7   : > { %v3012_v24 = vmax.f32 %v2917_v43, 0.0  ;;  %v2659_v20 = vsel %vm2656_vm3, %v2629_v51, %v2365_v48  ;;  %v2411_v62 = vpop.permute.xlu1 %2410 }
 0x2e8   : > { %v2682_v41 = vsel %vm2656_vm3, %v2652_v7, %v2411_v62  ;;  %3392 = vmatmul.mubr.msk.f32.gmra.mrb[40].mxu0 %vm2702_vm12, %v2659_v20  ;;  %v1325_v7 = vsel %vm5712_vm10, %v1289_v44, %v1143_v55  ;;  %v1324_v20 = vsel %vm5719_vm4, %v1288_v10, %v1132_v63  ;;  %v3631_v44 = vld [vmem:[#allocation2 + $0x28] sm:$0xff] }
 0x2e9   : > { %3041 = vst.msk [vmem:[%s5502_s11 + $0x60] sm:$0xff] %vm2476_vm5, %v3012_v24  ;;  %3461 = vmatmul.mubr.msk.f32.gmra.mrb[38].mxu1 %vm2702_vm12, %v2682_v41  ;;  %3394 = vmatprep.mubr.msk.f32.mxu0 %vm3649_vm9, %v5949_v53  ;;  %v3629_v41 = vld [vmem:[%s5857_s2] ss:$0 sm:$0xff]  ;;  %vm1361_vm1 = vcmp.le.s32.totalorder %v1325_v7, 15  ;;  %vm1360_vm7 = vcmp.le.s32.totalorder %v1324_v20, 15 }
 0x2ea   : > { %v2088_v26 = vpop.permute.xlu0 %2087  ;;  %3463 = vmatprep.mubr.msk.f32.mxu1 %vm3649_vm9, %v5949_v53 }
 0x2eb   : > { %v2134_v31 = vpop.permute.xlu1 %2133  ;;  %v2570_v54 = vsel %vm2566_vm14, %v2540_v19, %v2088_v26 }
 0x2ec   : > { %v2593_v15 = vsel %vm2566_vm14, %v2563_v59, %v2134_v31 }
 0x2ee   : > { %v5670_v14 = vpop.permute.xlu0 %1812 }
 0x2ef   : > { %v2179_v40 = vpop.permute.xlu1 %2178 }
 0x2f0   : > { %v2600_v30 = vsel %vm2596_vm15, %v2570_v54, %v2179_v40 }
 0x2f2   : > { %v2225_v61 = vpop.permute.xlu0 %2224 }
 0x2f3   : > { %v5672_v45 = vpop.permute.xlu1 %1857  ;;  %v2623_v21 = vsel %vm2596_vm15, %v2593_v15, %v2225_v61 }
 0x2f6   : > { %v5676_v1 = vpop.permute.xlu0 %1903 }
 0x2f7   : > { %v2275_v37 = vpop.permute.xlu1 %2274 }
 0x2f8   : > { %v2630_v2 = vsel %vm2626_vm8, %v2600_v30, %v2275_v37 }
 0x2fa   : > { %v2321_v35 = vpop.permute.xlu0 %2320 }
 0x2fb   : > { %v5696_v60 = vpop.permute.xlu1 %1973  ;;  %v2921_v5 = vpop.f32.mrb[14].mxu1  ;;  %v2653_v43 = vsel %vm2626_vm8, %v2623_v21, %v2321_v35  ;;  %v2451_v35 = vsel %vm265_vm0, %v1474_v3, %v5961_v42  ;;  %v5963_v21 = vld [vmem:[#allocation10_spill] sm:$0xff] }
 0x2fc   : > { %v2922_v16 = vadd.f32 %v5489_v13, %v2921_v5  ;;  %v3426_v25 = vpop.f32.mrb[15].mxu1  ;;  %v2481_v8 = vsel %vm2476_vm5, %v2451_v35, %v5962_v18  ;;  %v2504_v5 = vsel %vm2476_vm5, %v2474_v34, %v5670_v14  ;;  %v2452_v6 = vsel %vm265_vm0, %v3631_v44, %v5963_v21 }
 0x2fd   : > { %v2511_v19 = vsel %vm2506_vm11, %v2481_v8, %v5672_v45  ;;  %v2534_v25 = vsel %vm2506_vm11, %v2504_v5, %v5676_v1 }
 0x2fe   : > { %v3013_v27 = vmax.f32 %v2922_v16, 0.0  ;;  %v5703_v58 = vpop.permute.xlu0 %2019  ;;  %v3366_v24 = vpop.f32.mrb[34].mxu0  ;;  %v2541_v12 = vsel %vm2536_vm6, %v2511_v19, %v5696_v60 }
 0x2ff   : > { %v2367_v4 = vpop.permute.xlu1 %2366  ;;  %v674_v26 = vadd.f32 %v3629_v41, %v3366_v24  ;;  %v668_v31 = vpop.f32.mrb[35].mxu0  ;;  %v2564_v59 = vsel %vm2536_vm6, %v2534_v25, %v5703_v58 }
 0x300   : > { %3042 = vst.msk [vmem:[%s5502_s11 + $0x68] sm:$0xff] %vm2476_vm5, %v3013_v27  ;;  %v2660_v28 = vsel %vm2656_vm3, %v2630_v2, %v2367_v4  ;;  %v669_v46 = vadd.f32 %v3629_v41, %v668_v31 }
 0x301   : > { %3395 = vmatmul.mubr.msk.f32.gmra.mrb[42].mxu0 %vm2702_vm12, %v2660_v28  ;;  %v712_v57 = vmax.f32 %v674_v26, 0.0 }
 0x302   : > { %v2413_v0 = vpop.permute.xlu0 %2412  ;;  %3397 = vmatprep.mubr.msk.f32.mxu0 %vm3649_vm9, %v5949_v53  ;;  %v711_v9 = vmax.f32 %v669_v46, 0.0 }
 0x303   : > { %v2683_v51 = vsel %vm2656_vm3, %v2653_v43, %v2413_v0  ;;  %v2090_v48 = vpop.permute.xlu1 %2089  ;;  %v1397_v38 = vsel %vm1361_vm1, %v712_v57, 0.0  ;;  %v5964_v0 = vld [vmem:[#allocation13_spill] sm:$0xff] }
 0x304   : > { %3464 = vmatmul.mubr.msk.f32.gmra.mrb[40].mxu1 %vm2702_vm12, %v2683_v51  ;;  %1433 = vst.msk [vmem:[%s4131_s19 + $0x118] sm:$0xff] %vm265_vm0, %v1397_v38  ;;  %v1396_v23 = vsel %vm1360_vm7, %v711_v9, 0.0  ;;  %v2571_v54 = vsel %vm2566_vm14, %v2541_v12, %v2090_v48  ;;  %v2482_v50 = vsel %vm2476_vm5, %v2452_v6, %v5964_v0  ;;  %v3632_v51 = vld [vmem:[#allocation2 + $0xe0] sm:$0xff] }
 0x305   : > { %3466 = vmatprep.mubr.msk.f32.mxu1 %vm3649_vm9, %v5949_v53  ;;  %1432 = vst.msk [vmem:[%s4131_s19 + $0x110] sm:$0xff] %vm265_vm0, %v1396_v23  ;;  %v2475_v48 = vsel %vm265_vm0, %v3632_v51, %v5406_v39 }
 0x306   : > { %v2136_v62 = vpop.permute.xlu0 %2135 }
 0x307   : > { %v1815_v40 = vpop.permute.xlu1 %1814  ;;  %v2926_v61 = vpop.f32.mrb[16].mxu1  ;;  %v2594_v29 = vsel %vm2566_vm14, %v2564_v59, %v2136_v62 }
 0x308   : > { %v2927_v32 = vadd.f32 %v5489_v13, %v2926_v61  ;;  %v3429_v56 = vpop.f32.mrb[17].mxu1 }
 0x30a   : > { %v3014_v11 = vmax.f32 %v2927_v32, 0.0  ;;  %v2181_v49 = vpop.permute.xlu0 %2180 }
 0x30b   : > { %v2227_v22 = vpop.permute.xlu1 %2226  ;;  %v2601_v14 = vsel %vm2596_vm15, %v2571_v54, %v2181_v49 }
 0x30c   : > { %3043 = vst.msk [vmem:[%s5502_s11 + $0x70] sm:$0xff] %vm2476_vm5, %v3014_v11  ;;  %v2624_v30 = vsel %vm2596_vm15, %v2594_v29, %v2227_v22 }
 0x30e   : > { %v1860_v37 = vpop.permute.xlu0 %1859 }
 0x30f   : > { %v1906_v33 = vpop.permute.xlu1 %1905  ;;  %v2512_v7 = vsel %vm2506_vm11, %v2482_v50, %v1860_v37 }
 0x312   : > { %v2277_v47 = vpop.permute.xlu0 %2276 }
 0x313   : > { %v2323_v36 = vpop.permute.xlu1 %2322  ;;  %v2631_v45 = vsel %vm2626_vm8, %v2601_v14, %v2277_v47 }
 0x314   : > { %v2654_v1 = vsel %vm2626_vm8, %v2624_v30, %v2323_v36 }
 0x316   : > { %v1976_v16 = vpop.permute.xlu0 %1975 }
 0x317   : > { %v2022_v17 = vpop.permute.xlu1 %2021  ;;  %v2542_v41 = vsel %vm2536_vm6, %v2512_v7, %v1976_v16 }
 0x31a   : > { %v2369_v27 = vpop.permute.xlu0 %2368 }
 0x31b   : > { %v2661_v55 = vsel %vm2656_vm3, %v2631_v45, %v2369_v27  ;;  %v2415_v60 = vpop.permute.xlu1 %2414 }
 0x31c   : > { %v2684_v63 = vsel %vm2656_vm3, %v2654_v1, %v2415_v60  ;;  %3398 = vmatmul.mubr.msk.f32.gmra.mrb[44].mxu0 %vm2702_vm12, %v2661_v55 }
 0x31d   : > { %3467 = vmatmul.mubr.msk.f32.gmra.mrb[42].mxu1 %vm2702_vm12, %v2684_v63  ;;  %3400 = vmatprep.mubr.msk.f32.mxu0 %vm3649_vm9, %v5949_v53 }
 0x31e   : > { %v2092_v58 = vpop.permute.xlu0 %2091  ;;  %3469 = vmatprep.mubr.msk.f32.mxu1 %vm3649_vm9, %v5949_v53  ;;  %v2505_v53 = vsel %vm2476_vm5, %v2475_v48, %v1815_v40 }
 0x31f   : > { %v2138_v15 = vpop.permute.xlu1 %2137  ;;  %v2535_v62 = vsel %vm2506_vm11, %v2505_v53, %v1906_v33  ;;  %v2572_v61 = vsel %vm2566_vm14, %v2542_v41, %v2092_v58 }
 0x320   : > { %v2565_v31 = vsel %vm2536_vm6, %v2535_v62, %v2022_v17 }
 0x321   : > { %v2595_v39 = vsel %vm2566_vm14, %v2565_v31, %v2138_v15 }
 0x322   : > { %v2183_v2 = vpop.permute.xlu0 %2182 }
 0x323   : > { %v2229_v4 = vpop.permute.xlu1 %2228  ;;  %v2931_v28 = vpop.f32.mrb[18].mxu1  ;;  %v2602_v40 = vsel %vm2596_vm15, %v2572_v61, %v2183_v2 }
 0x324   : > { %v2932_v10 = vadd.f32 %v5489_v13, %v2931_v28  ;;  %v3432_v43 = vpop.f32.mrb[19].mxu1  ;;  %v2625_v46 = vsel %vm2596_vm15, %v2595_v39, %v2229_v4 }
 0x326   : > { %v3015_v24 = vmax.f32 %v2932_v10, 0.0  ;;  %v2279_v20 = vpop.permute.xlu0 %2278 }
 0x327   : > { %v2325_v26 = vpop.permute.xlu1 %2324  ;;  %v2632_v32 = vsel %vm2626_vm8, %v2602_v40, %v2279_v20 }
 0x328   : > { %3044 = vst.msk [vmem:[%s5502_s11 + $0x78] sm:$0xff] %vm2476_vm5, %v3015_v24  ;;  %v2655_v57 = vsel %vm2626_vm8, %v2625_v46, %v2325_v26 }
 0x32a   : > { %v2371_v56 = vpop.permute.xlu0 %2370 }
 0x32b   : > { %v2662_v9 = vsel %vm2656_vm3, %v2632_v32, %v2371_v56  ;;  %v2417_v11 = vpop.permute.xlu1 %2416 }
 0x32c   : > { %v2685_v49 = vsel %vm2656_vm3, %v2655_v57, %v2417_v11  ;;  %3401 = vmatmul.mubr.msk.f32.gmra.mrb[46].mxu0 %vm2702_vm12, %v2662_v9 }
 0x32d   : > { %3470 = vmatmul.mubr.msk.f32.gmra.mrb[44].mxu1 %vm2702_vm12, %v2685_v49 }
 0x32f   : > { %v2936_v38 = vpop.f32.mrb[20].mxu1 }
 0x330   : > { %v2937_v22 = vadd.f32 %v5489_v13, %v2936_v38  ;;  %v3435_v23 = vpop.f32.mrb[21].mxu1 }
 0x332   : > { %v3016_v37 = vmax.f32 %v2937_v22, 0.0 }
 0x334   : > { %3045 = vst.msk [vmem:[%s5502_s11 + $0x80] sm:$0xff] %vm2476_vm5, %v3016_v37 }
 0x347   : > { %v2941_v33 = vpop.f32.mrb[22].mxu1 }
 0x348   : > { %v2942_v3 = vadd.f32 %v5489_v13, %v2941_v33  ;;  %v3438_v47 = vpop.f32.mrb[23].mxu1 }
 0x34a   : > { %v3017_v36 = vmax.f32 %v2942_v3, 0.0 }
 0x34b   : > { %v2946_v42 = vpop.f32.mrb[24].mxu1 }
 0x34c   : > { %3046 = vst.msk [vmem:[%s5502_s11 + $0x88] sm:$0xff] %vm2476_vm5, %v3017_v36  ;;  %v2947_v35 = vadd.f32 %v5489_v13, %v2946_v42  ;;  %v3441_v18 = vpop.f32.mrb[25].mxu1 }
 0x34e   : > { %v3018_v8 = vmax.f32 %v2947_v35, 0.0 }
 0x34f   : > { %v2951_v52 = vpop.f32.mrb[26].mxu1 }
 0x350   : > { %3047 = vst.msk [vmem:[%s5502_s11 + $0x90] sm:$0xff] %vm2476_vm5, %v3018_v8  ;;  %v2952_v34 = vadd.f32 %v5489_v13, %v2951_v52  ;;  %v3444_v5 = vpop.f32.mrb[27].mxu1 }
 0x352   : > { %v3019_v19 = vmax.f32 %v2952_v34, 0.0 }
 0x353   : > { %v2956_v16 = vpop.f32.mrb[28].mxu1 }
 0x354   : > { %3048 = vst.msk [vmem:[%s5502_s11 + $0x98] sm:$0xff] %vm2476_vm5, %v3019_v19  ;;  %v2957_v25 = vadd.f32 %v5489_v13, %v2956_v16  ;;  %v3447_v12 = vpop.f32.mrb[29].mxu1 }
 0x356   : > { %v3020_v17 = vmax.f32 %v2957_v25, 0.0 }
 0x358   : > { %3049 = vst.msk [vmem:[%s5502_s11 + $0xa0] sm:$0xff] %vm2476_vm5, %v3020_v17 }
 0x35b   : > { %v2961_v59 = vpop.f32.mrb[30].mxu1 }
 0x35c   : > { %v2962_v54 = vadd.f32 %v5489_v13, %v2961_v59  ;;  %v3450_v29 = vpop.f32.mrb[31].mxu1 }
 0x35e   : > { %v3021_v14 = vmax.f32 %v2962_v54, 0.0 }
 0x360   : > { %3050 = vst.msk [vmem:[%s5502_s11 + $0xa8] sm:$0xff] %vm2476_vm5, %v3021_v14 }
 0x36f   : > { %v2966_v30 = vpop.f32.mrb[32].mxu1 }
 0x370   : > { %v2967_v45 = vadd.f32 %v5489_v13, %v2966_v30  ;;  %v3453_v27 = vpop.f32.mrb[33].mxu1 }
 0x372   : > { %v3022_v1 = vmax.f32 %v2967_v45, 0.0 }
 0x374   : > { %3051 = vst.msk [vmem:[%s5502_s11 + $0xb0] sm:$0xff] %vm2476_vm5, %v3022_v1 }
 0x387   : > { %v2856_v55 = vpop.f32.mrb[36].mxu0 }
 0x388   : > { %v2857_v60 = vadd.f32 %v5489_v13, %v2856_v55  ;;  %v2971_v63 = vpop.f32.mrb[34].mxu1  ;;  %v3387_v58 = vpop.f32.mrb[37].mxu0 }
 0x389   : > { %v2972_v15 = vadd.f32 %v5489_v13, %v2971_v63  ;;  %v3456_v2 = vpop.f32.mrb[35].mxu1 }
 0x38a   : > { %v3000_v4 = vmax.f32 %v2857_v60, 0.0 }
 0x38b   : > { %v3023_v28 = vmax.f32 %v2972_v15, 0.0 }
 0x38c   : > { %3029 = vst.msk [vmem:[%s5502_s11] sm:$0xff] %vm2476_vm5, %v3000_v4 }
 0x38d   : > { %3052 = vst.msk [vmem:[%s5502_s11 + $0xb8] sm:$0xff] %vm2476_vm5, %v3023_v28 }
 0x3a0   : > { %v2861_v44 = vpop.f32.mrb[38].mxu0 }
 0x3a1   : > { %v2862_v21 = vadd.f32 %v5489_v13, %v2861_v44  ;;  %v3390_v6 = vpop.f32.mrb[39].mxu0 }
 0x3a3   : > { %v3001_v10 = vmax.f32 %v2862_v21, 0.0  ;;  %v2976_v43 = vpop.f32.mrb[36].mxu1 }
 0x3a4   : > { %v2977_v0 = vadd.f32 %v5489_v13, %v2976_v43  ;;  %v3459_v50 = vpop.f32.mrb[37].mxu1 }
 0x3a5   : > { %3030 = vst.msk [vmem:[%s5502_s11 + $0x8] sm:$0xff] %vm2476_vm5, %v3001_v10 }
 0x3a6   : > { %v3024_v51 = vmax.f32 %v2977_v0, 0.0 }
 0x3a8   : > { %3053 = vst.msk [vmem:[%s5502_s11 + $0xc0] sm:$0xff] %vm2476_vm5, %v3024_v51 }
 0x3bb   : > { %v2866_v48 = vpop.f32.mrb[40].mxu0 }
 0x3bc   : > { %v2867_v53 = vadd.f32 %v5489_v13, %v2866_v48  ;;  %v2981_v7 = vpop.f32.mrb[38].mxu1  ;;  %v3393_v24 = vpop.f32.mrb[41].mxu0 }
 0x3bd   : > { %v2982_v20 = vadd.f32 %v5489_v13, %v2981_v7  ;;  %v3462_v62 = vpop.f32.mrb[39].mxu1 }
 0x3be   : > { %v3002_v41 = vmax.f32 %v2867_v53, 0.0 }
 0x3bf   : > { %v3025_v26 = vmax.f32 %v2982_v20, 0.0 }
 0x3c0   : > { %3031 = vst.msk [vmem:[%s5502_s11 + $0x10] sm:$0xff] %vm2476_vm5, %v3002_v41 }
 0x3c1   : > { %3054 = vst.msk [vmem:[%s5502_s11 + $0xc8] sm:$0xff] %vm2476_vm5, %v3025_v26 }
 0x3d4   : > { %v2871_v31 = vpop.f32.mrb[42].mxu0 }
 0x3d5   : > { %v2872_v61 = vadd.f32 %v5489_v13, %v2871_v31  ;;  %v3396_v39 = vpop.f32.mrb[43].mxu0 }
 0x3d7   : > { %v3003_v40 = vmax.f32 %v2872_v61, 0.0  ;;  %v2986_v46 = vpop.f32.mrb[40].mxu1 }
 0x3d8   : > { %v2987_v32 = vadd.f32 %v5489_v13, %v2986_v46  ;;  %v3465_v56 = vpop.f32.mrb[41].mxu1 }
 0x3d9   : > { %3032 = vst.msk [vmem:[%s5502_s11 + $0x18] sm:$0xff] %vm2476_vm5, %v3003_v40 }
 0x3da   : > { %v3026_v57 = vmax.f32 %v2987_v32, 0.0 }
 0x3dc   : > { %3055 = vst.msk [vmem:[%s5502_s11 + $0xd0] sm:$0xff] %vm2476_vm5, %v3026_v57 }
 0x3ef   : > { %v2876_v9 = vpop.f32.mrb[44].mxu0 }
 0x3f0   : > { %v2877_v11 = vadd.f32 %v5489_v13, %v2876_v9  ;;  %v2991_v49 = vpop.f32.mrb[42].mxu1  ;;  %v3399_v38 = vpop.f32.mrb[45].mxu0 }
 0x3f1   : > { %v2992_v22 = vadd.f32 %v5489_v13, %v2991_v49  ;;  %v3468_v23 = vpop.f32.mrb[43].mxu1 }
 0x3f2   : > { %v3004_v37 = vmax.f32 %v2877_v11, 0.0 }
 0x3f3   : > { %v3027_v33 = vmax.f32 %v2992_v22, 0.0 }
 0x3f4   : > { %3033 = vst.msk [vmem:[%s5502_s11 + $0x20] sm:$0xff] %vm2476_vm5, %v3004_v37 }
 0x3f5   : > { %3056 = vst.msk [vmem:[%s5502_s11 + $0xd8] sm:$0xff] %vm2476_vm5, %v3027_v33 }
 0x3ff   : > { %v2881_v3 = vpop.f32.mrb[46].mxu0 }
 0x400   : > { %v2882_v47 = vadd.f32 %v5489_v13, %v2881_v3  ;;  %v2996_v36 = vpop.f32.mrb[44].mxu1  ;;  %v3402_v42 = vpop.f32.mrb[47].mxu0 }
 0x401   : > { %v2997_v35 = vadd.f32 %v5489_v13, %v2996_v36  ;;  %v3471_v18 = vpop.f32.mrb[45].mxu1 }
 0x402   : > { %v3005_v8 = vmax.f32 %v2882_v47, 0.0 }
 0x403   : > { %v3028_v52 = vmax.f32 %v2997_v35, 0.0 }
 0x404   : > { %3034 = vst.msk [vmem:[%s5502_s11 + $0x28] sm:$0xff] %vm2476_vm5, %v3005_v8 }
 0x405   : > { %3057 = vst.msk [vmem:[%s5502_s11 + $0xe0] sm:$0xff] %vm2476_vm5, %v3028_v52 }
 0x406 PF: > { %s17_s21 = sadd.s32 1, %s3639_s21  }
 0x407   : > { %p14_p4 = scmp.ge.s32.totalorder %s17_s21, 4  }
 0x409   :  { %16 = sbr.rel (!%p14_p4) target bundleno = 1 (0x1), region = 82 }

</bundles_post_ra>
